<compile_context>
chip_gen: v7x
topology: tpu7x:2x2x1
jax: 0.10.0
libtpu: 0.0.40
codegen_flags: <defaults>
</compile_context>

<pallas_src>
import functools

import jax
import jax.numpy as jnp
from jax.experimental import pallas as pl
from jax.experimental.pallas import tpu as pltpu

EPS = 1e-5                              # nn.BatchNorm2d default
LANE = 128                              # TPU lane width (channel padding target)
_VMEM_TILE_BUDGET = 10 * 1024 * 1024    # VMEM bytes a double-buffered M-tile may use
_VMEM_LIMIT = 32 * 1024 * 1024          # scoped VMEM limit (safe on v5e/v6e/v7x)


# ----------------------------------------------------------------------------
# small helpers
# ----------------------------------------------------------------------------
def _round_up(x, m):
    return (x + m - 1) // m * m


def _mosaic_params():
    cp = getattr(pltpu, "CompilerParams", None) or getattr(pltpu, "TPUCompilerParams", None)
    if cp is None:
        return None
    try:
        return cp(dimension_semantics=("parallel",), vmem_limit_bytes=_VMEM_LIMIT)
    except Exception:
        return None


def _pick_tm(m_rows, row_bytes):
    """Rows per M-tile: as large as fits the VMEM budget, multiple of 16, <= 512."""
    tm = _VMEM_TILE_BUDGET // max(row_bytes, 1)
    tm = max(16, min(512, (tm // 16) * 16))
    return min(tm, _round_up(m_rows, 16))


# ----------------------------------------------------------------------------
# Pallas kernels
# ----------------------------------------------------------------------------
def _write_partial_stats(pre, stats_ref):
    """Row 0: per-channel sum, row 1: per-channel sum of squares, rest zero."""
    s = jnp.sum(pre, axis=0, keepdims=True)           # (1, C)
    ss = jnp.sum(pre * pre, axis=0, keepdims=True)    # (1, C)
    row = jax.lax.broadcasted_iota(jnp.int32, stats_ref.shape, 0)
    stats_ref[...] = jnp.where(row == 0, s, jnp.where(row == 1, ss, jnp.zeros_like(s)))


def _matmul_stats_kernel(x_ref, w_ref, pre_ref, stats_ref):
    """pre = x @ w on the MXU; per-tile partial BN statistics."""
    pre = jnp.dot(x_ref[...], w_ref[...], preferred_element_type=jnp.float32)
    pre_ref[...] = pre
    _write_partial_stats(pre, stats_ref)


def _bn_relu_matmul_stats_kernel(x_ref, s_ref, b_ref, w_ref, pre_ref, stats_ref):
    """y = relu(x*scale+bias) (folded BN of previous conv); pre = y @ w; stats."""
    y = jnp.maximum(x_ref[...] * s_ref[...] + b_ref[...], 0.0)
    pre = jnp.dot(y.astype(w_ref.dtype), w_ref[...], preferred_element_type=jnp.float32)
    pre_ref[...] = pre
    _write_partial_stats(pre, stats_ref)


def _bn_add_bn_relu_kernel(a_ref, sa_ref, ba_ref, b_ref, sb_ref, bb_ref, out_ref):
    """out = relu( (a*sa+ba) + (b*sb+bb) ): BN2(main) + BN_sc(shortcut) + add + ReLU."""
    y = (a_ref[...] * sa_ref[...] + ba_ref[...]
         + b_ref[...] * sb_ref[...] + bb_ref[...])
    out_ref[...] = jnp.maximum(y, 0.0)


# ----------------------------------------------------------------------------
# Pallas call wrappers (M-tiled, lane-dense channels)
# ----------------------------------------------------------------------------
def _matmul_stats_call(x2d, w_mat, scale_rep=None, bias_rep=None, row_pad=None):
    """Tiled (M,K) @ (K,C) with per-tile partial BN stats.

    If scale_rep/bias_rep are given, relu(x*scale+bias) is applied to the LHS
    rows in-kernel (fused BN+ReLU of the previous layer).  Rows are padded to a
    multiple of the tile size; `row_pad` (a K-vector) is the fill value so that
    padded rows contribute ~0 to the statistics.
    Returns pre[:M] (f32 (M,C)) and the per-tile stats array.
    """
    M, K = x2d.shape
    C = w_mat.shape[1]
    row_bytes = 2 * (K * x2d.dtype.itemsize + C * 4)
    tm = _pick_tm(M, row_bytes)
    Mp = _round_up(M, tm)
    if Mp > M:
        if row_pad is None:
            x2d = jnp.pad(x2d, ((0, Mp - M), (0, 0)))
        else:
            fill = jnp.broadcast_to(row_pad.astype(x2d.dtype)[None, :], (Mp - M, K))
            x2d = jnp.concatenate([x2d, fill], axis=0)
    num_tiles = Mp // tm

    fused = scale_rep is not None
    in_specs = [pl.BlockSpec((tm, K), lambda i: (i, 0))]
    args = [x2d]
    if fused:
        in_specs += [pl.BlockSpec((1, K), lambda i: (0, 0)),
                     pl.BlockSpec((1, K), lambda i: (0, 0))]
        args += [scale_rep.reshape(1, K).astype(jnp.float32),
                 bias_rep.reshape(1, K).astype(jnp.float32)]
    in_specs.append(pl.BlockSpec((K, C), lambda i: (0, 0)))
    args.append(w_mat)

    kernel = _bn_relu_matmul_stats_kernel if fused else _matmul_stats_kernel
    pre, stats = pl.pallas_call(
        kernel,
        grid=(num_tiles,),
        in_specs=in_specs,
        out_specs=[pl.BlockSpec((tm, C), lambda i: (i, 0)),
                   pl.BlockSpec((8, C), lambda i: (i, 0))],
        out_shape=[jax.ShapeDtypeStruct((Mp, C), jnp.float32),
                   jax.ShapeDtypeStruct((num_tiles * 8, C), jnp.float32)],
        compiler_params=_mosaic_params(),
    )(*args)
    return pre[:M], stats


def _bn_add_bn_relu_call(a, sa, ba, b, sb, bb):
    """Tiled elementwise: relu(a*sa+ba + b*sb+bb) over (M, C) rows."""
    M, C = a.shape
    row_bytes = 6 * C * 4
    tm = _pick_tm(M, row_bytes)
    Mp = _round_up(M, tm)
    if Mp > M:
        a = jnp.pad(a, ((0, Mp - M), (0, 0)))
        b = jnp.pad(b, ((0, Mp - M), (0, 0)))
    num_tiles = Mp // tm
    vec = lambda v: v.reshape(1, C).astype(jnp.float32)
    out = pl.pallas_call(
        _bn_add_bn_relu_kernel,
        grid=(num_tiles,),
        in_specs=[pl.BlockSpec((tm, C), lambda i: (i, 0)),
                  pl.BlockSpec((1, C), lambda i: (0, 0)),
                  pl.BlockSpec((1, C), lambda i: (0, 0)),
                  pl.BlockSpec((tm, C), lambda i: (i, 0)),
                  pl.BlockSpec((1, C), lambda i: (0, 0)),
                  pl.BlockSpec((1, C), lambda i: (0, 0))],
        out_specs=pl.BlockSpec((tm, C), lambda i: (i, 0)),
        out_shape=jax.ShapeDtypeStruct((Mp, C), jnp.float32),
        compiler_params=_mosaic_params(),
    )(a, vec(sa), vec(ba), b, vec(sb), vec(bb))
    return out[:M]


def _bn_scale_bias(stats, m_rows, gamma, beta):
    """Fold training-mode BN (batch mean / biased var) into per-channel scale+bias.

    Uses sum/sumsq accumulated in f32 (E[x^2]-E[x]^2); adequate for these M.
    Padded channels (gamma==0, zero stats) yield scale=0, bias=0.
    """
    tot = jnp.sum(stats.reshape(-1, 8, stats.shape[-1]), axis=0)
    mean = tot[0] / m_rows
    var = jnp.maximum(tot[1] / m_rows - mean * mean, 0.0)
    scale = gamma * jax.lax.rsqrt(var + EPS)
    bias = beta - mean * scale
    return scale, bias


# ----------------------------------------------------------------------------
# Plain-JAX glue: layout conversion, patch extraction, weight reshapes
# ----------------------------------------------------------------------------
def _extract_patches(xp, k, stride, Ho, Wo):
    """im2col on an already spatially padded NHWC tensor -> (N*Ho*Wo, k*k*C)."""
    N, _, _, C = xp.shape
    cols = []
    for dy in range(k):
        for dx in range(k):
            cols.append(xp[:, dy:dy + (Ho - 1) * stride + 1:stride,
                           dx:dx + (Wo - 1) * stride + 1:stride, :])
    return jnp.concatenate(cols, axis=-1).reshape(N * Ho * Wo, k * k * C)


def _pad_hw(x, value_c):
    """Spatially pad NHWC by 1 on each side of H/W with an exact per-channel constant."""
    N, H, W, C = x.shape
    v = value_c.astype(x.dtype).reshape(1, 1, 1, C)
    col = jnp.broadcast_to(v, (N, H, 1, C))
    x = jnp.concatenate([col, x, col], axis=2)
    row = jnp.broadcast_to(v, (N, 1, W + 2, C))
    return jnp.concatenate([row, x, row], axis=1)


def _conv_weight_to_mat(w, cin_pad=None, cout_pad=None):
    """(Cout,Cin,kh,kw) -> (kh*kw*Cin_pad, Cout_pad), matching im2col ordering."""
    co, ci, kh, kw = w.shape
    if cin_pad is not None and cin_pad > ci:
        w = jnp.pad(w, ((0, 0), (0, cin_pad - ci), (0, 0), (0, 0)))
        ci = cin_pad
    m = jnp.transpose(w, (2, 3, 1, 0)).reshape(kh * kw * ci, co)
    if cout_pad is not None and cout_pad > co:
        m = jnp.pad(m, ((0, 0), (0, cout_pad - co)))
    return m


def _pad_channels(v, c_pad):
    return jnp.pad(v.astype(jnp.float32), (0, c_pad - v.shape[0]))


# ----------------------------------------------------------------------------
# ResidualBlock forward
# ----------------------------------------------------------------------------
@functools.partial(jax.jit, static_argnames=("stride", "mxu_dtype"))
def residual_block_forward(x_nchw, params, stride, mxu_dtype=jnp.float32):
    """Full ResidualBlock forward (training-mode BN).  Input/output are NCHW."""
    x = jnp.transpose(x_nchw, (0, 2, 3, 1)).astype(jnp.float32)   # NHWC
    N, H, W, Cin = x.shape
    Cout = params["w1"].shape[0]
    Cp = _round_up(Cout, LANE)                   # lane-dense channel padding
    Ho = (H + 2 - 3) // stride + 1
    Wo = (W + 2 - 3) // stride + 1
    M = N * Ho * Wo

    # ---- conv1 (3x3, stride): tiled MXU matmul over patches + BN1 partial stats
    # TODO(synk): patch extraction is still plain-JAX glue (9x HBM copy of the
    # activations); an in-kernel halo-DMA / tap-loop formulation would remove it.
    p1 = _extract_patches(jnp.pad(x, ((0, 0), (1, 1), (1, 1), (0, 0))), 3, stride, Ho, Wo)
    w1m = _conv_weight_to_mat(params["w1"], cout_pad=Cp).astype(mxu_dtype)
    pre1, stats1 = _matmul_stats_call(p1.astype(mxu_dtype), w1m)
    scale1, bias1 = _bn_scale_bias(stats1, M, _pad_channels(params["g1"], Cp),
                                   _pad_channels(params["b1"], Cp))

    # ---- shortcut: 1x1 strided conv + BN (projection) or identity
    if "wsc" in params:
        xs = x[:, ::stride, ::stride, :].reshape(M, Cin)
        wscm = _conv_weight_to_mat(params["wsc"], cout_pad=Cp).astype(mxu_dtype)
        pre_sc, stats_sc = _matmul_stats_call(xs.astype(mxu_dtype), wscm)
        scale_sc, bias_sc = _bn_scale_bias(stats_sc, M, _pad_channels(params["gsc"], Cp),
                                           _pad_channels(params["bsc"], Cp))
    else:
        pre_sc = jnp.pad(x.reshape(M, Cin), ((0, 0), (0, Cp - Cin)))
        scale_sc = jnp.ones((Cp,), jnp.float32)
        bias_sc = jnp.zeros((Cp,), jnp.float32)

    # ---- conv2 (3x3, stride 1) with BN1 + ReLU fused into the matmul kernel.
    # out1 is never written to HBM; the spatial zero-padding of out1 is emulated
    # by padding the pre-activation with v = -bias/scale (relu(v*scale+bias)==0).
    # (Exact unless gamma1 is exactly 0 with beta1 > 0 — measure-zero case.)
    v = jnp.where(scale1 != 0.0, -bias1 / jnp.where(scale1 != 0.0, scale1, 1.0), 0.0)
    p2 = _extract_patches(_pad_hw(pre1.reshape(N, Ho, Wo, Cp), v), 3, 1, Ho, Wo)
    w2m = _conv_weight_to_mat(params["w2"], cin_pad=Cp, cout_pad=Cp).astype(mxu_dtype)
    pre2, stats2 = _matmul_stats_call(p2, w2m,
                                      scale_rep=jnp.tile(scale1, 9),
                                      bias_rep=jnp.tile(bias1, 9),
                                      row_pad=jnp.tile(v, 9))
    scale2, bias2 = _bn_scale_bias(stats2, M, _pad_channels(params["g2"], Cp),
                                   _pad_channels(params["b2"], Cp))

    # ---- BN2 + shortcut-BN + residual add + ReLU (single tiled elementwise pass)
    out = _bn_add_bn_relu_call(pre2, scale2, bias2, pre_sc, scale_sc, bias_sc)
    y = out[:, :Cout].reshape(N, Ho, Wo, Cout)
    return jnp.transpose(y, (0, 3, 1, 2))        # back to NCHW


# ----------------------------------------------------------------------------
# Pure-JAX reference (lax.conv, NCHW) for verification
# ----------------------------------------------------------------------------
def reference_forward(x, params, stride):
    def conv(inp, w, s, pad):
        return jax.lax.conv_general_dilated(
            inp, w, (s, s), ((pad, pad), (pad, pad)),
            dimension_numbers=("NCHW", "OIHW", "NCHW"))

    def bn(inp, gamma, beta):  # training-mode batch stats, biased variance
        mean = jnp.mean(inp, axis=(0, 2, 3), keepdims=True)
        var = jnp.mean((inp - mean) ** 2, axis=(0, 2, 3), keepdims=True)
        return ((inp - mean) * jax.lax.rsqrt(var + EPS)
                * gamma.reshape(1, -1, 1, 1) + beta.reshape(1, -1, 1, 1))

    out = jax.nn.relu(bn(conv(x, params["w1"], stride, 1), params["g1"], params["b1"]))
    out = bn(conv(out, params["w2"], 1, 1), params["g2"], params["b2"])
    if "wsc" in params:
        sc = bn(conv(x, params["wsc"], stride, 0), params["gsc"], params["bsc"])
    else:
        sc = x
    return jax.nn.relu(out + sc)


# ----------------------------------------------------------------------------
def make_params(key, in_channels, out_channels, stride):
    # TODO(synk): BN running-stat buffer updates (a training-mode side effect) are
    # not reproduced; they do not affect the forward output.
    ks = jax.random.split(key, 8)
    p = {
        "w1": 0.1 * jax.random.normal(ks[0], (out_channels, in_channels, 3, 3), jnp.float32),
        "g1": 1.0 + 0.1 * jax.random.normal(ks[1], (out_channels,), jnp.float32),
        "b1": 0.1 * jax.random.normal(ks[2], (out_channels,), jnp.float32),
        "w2": 0.1 * jax.random.normal(ks[3], (out_channels, out_channels, 3, 3), jnp.float32),
        "g2": 1.0 + 0.1 * jax.random.normal(ks[4], (out_channels,), jnp.float32),
        "b2": 0.1 * jax.random.normal(ks[5], (out_channels,), jnp.float32),
    }
    if stride != 1 or in_channels != out_channels:
        p["wsc"] = 0.1 * jax.random.normal(ks[6], (out_channels, in_channels, 1, 1), jnp.float32)
        p["gsc"] = jnp.ones((out_channels,), jnp.float32)
        p["bsc"] = 0.1 * jax.random.normal(ks[7], (out_channels,), jnp.float32)
    return p


if __name__ == "__main__":
    key = jax.random.PRNGKey(0)
    kx, kp = jax.random.split(key)

    # Projection-shortcut config (stride 2, channel change).
    batch, in_channels, out_channels, spatial, stride = 2, 4, 8, 16, 2
    x = jax.random.normal(kx, (batch, in_channels, spatial, spatial), jnp.float32)
    params = make_params(kp, in_channels, out_channels, stride)

    y_ref = reference_forward(x, params, stride)
    y = jax.block_until_ready(residual_block_forward(x, params, stride=stride,
                                                     mxu_dtype=jnp.float32))
    assert y.shape == (batch, out_channels, spatial // stride, spatial // stride), y.shape
    assert jnp.allclose(y, y_ref, atol=1e-3, rtol=1e-3), float(jnp.max(jnp.abs(y - y_ref)))

    # bf16 MXU path (v6e/v7x oriented): looser tolerance for bf16 input rounding.
    y_bf = jax.block_until_ready(residual_block_forward(x, params, stride=stride,
                                                        mxu_dtype=jnp.bfloat16))
    assert jnp.allclose(y_bf, y_ref, atol=1.5e-1, rtol=1e-1), float(jnp.max(jnp.abs(y_bf - y_ref)))

    # Identity-shortcut config (stride 1, same channels).
    k2x, k2p = jax.random.split(jax.random.PRNGKey(1))
    x2 = jax.random.normal(k2x, (batch, out_channels, 8, 8), jnp.float32)
    params2 = make_params(k2p, out_channels, out_channels, 1)
    y2 = jax.block_until_ready(residual_block_forward(x2, params2, stride=1,
                                                      mxu_dtype=jnp.float32))
    y2_ref = reference_forward(x2, params2, 1)
    assert jnp.allclose(y2, y2_ref, atol=1e-3, rtol=1e-3), float(jnp.max(jnp.abs(y2 - y2_ref)))

    print("KERNEL_OK")
</pallas_src>

<mosaic_0001>
module attributes {stable_mosaic.version = 11 : i64} {
  func.func @_matmul_stats_kernel(%arg0: i32, %arg1: memref<128x36xf32, #tpu.memory_space<vmem>>, %arg2: memref<36x128xf32, #tpu.memory_space<vmem>>, %arg3: memref<128x128xf32, #tpu.memory_space<vmem>>, %arg4: memref<8x128xf32, #tpu.memory_space<vmem>>) attributes {dimension_semantics = [#tpu.dimension_semantics<parallel>], iteration_bounds = array<i64: 1>, scalar_prefetch = 0 : i64, scratch_operands = 0 : i64, tpu.core_type = #tpu.core_type<tc>, window_params = [{transform_indices = @transform_0, window_bounds = array<i64: 128, 36>}, {pipeline_mode = #tpu.pipeline_mode<synchronous>, transform_indices = @transform_1, window_bounds = array<i64: 36, 128>}, {transform_indices = @transform_2, window_bounds = array<i64: 128, 128>}, {transform_indices = @transform_3, window_bounds = array<i64: 8, 128>}]} {
    %c0 = arith.constant 0 : index
    %c0_0 = arith.constant 0 : index
    %0 = vector.load %arg1[%c0, %c0_0] : memref<128x36xf32, #tpu.memory_space<vmem>>, vector<128x36xf32>
    %c0_1 = arith.constant 0 : index
    %c0_2 = arith.constant 0 : index
    %1 = vector.load %arg2[%c0_1, %c0_2] : memref<36x128xf32, #tpu.memory_space<vmem>>, vector<36x128xf32>
    %cst = arith.constant dense<0.000000e+00> : vector<128x128xf32>
    %2 = tpu.matmul %0, %1, %cst {dimension_numbers = #tpu.dot_dimension_numbers<[1], [0], [0], [1], [0, 0, 1, 1], [], []>} : vector<128x36xf32>, vector<36x128xf32>, vector<128x128xf32> -> vector<128x128xf32>
    %c0_3 = arith.constant 0 : index
    %c0_4 = arith.constant 0 : index
    %3 = vector.load %arg3[%c0_3, %c0_4] : memref<128x128xf32, #tpu.memory_space<vmem>>, vector<128x128xf32>
    tpu.vector_store %arg3[%c0_3, %c0_4], %2 {strides = array<i32>} : memref<128x128xf32, #tpu.memory_space<vmem>>, vector<128x128xf32>,
    %cst_5 = arith.constant dense<0.000000e+00> : vector<128xf32>
    %4 = vector.multi_reduction <add>, %2, %cst_5 [0] : vector<128x128xf32> to vector<128xf32>
    %5 = vector.shape_cast %4 : vector<128xf32> to vector<1x128xf32>
    %6 = arith.mulf %2, %2 : vector<128x128xf32>
    %cst_6 = arith.constant dense<0.000000e+00> : vector<128xf32>
    %7 = vector.multi_reduction <add>, %6, %cst_6 [0] : vector<128x128xf32> to vector<128xf32>
    %8 = vector.shape_cast %7 : vector<128xf32> to vector<1x128xf32>
    %9 = tpu.iota {dimensions = array<i32: 0>} : vector<8x128xi32>
    %c0_i32 = arith.constant 0 : i32
    %10 = vector.broadcast %c0_i32 : i32 to vector<8x128xi32>
    %11 = arith.cmpi eq, %9, %10 : vector<8x128xi32>
    %c1_i32 = arith.constant 1 : i32
    %12 = vector.broadcast %c1_i32 : i32 to vector<8x128xi32>
    %13 = arith.cmpi eq, %9, %12 : vector<8x128xi32>
    %cst_7 = arith.constant 0.000000e+00 : f32
    %14 = vector.broadcast %cst_7 : f32 to vector<1x128xf32>
    %15 = vector.shape_cast %8 : vector<1x128xf32> to vector<1x128xf32>
    %16 = vector.broadcast %15 : vector<1x128xf32> to vector<8x128xf32>
    %17 = vector.shape_cast %14 : vector<1x128xf32> to vector<1x128xf32>
    %18 = vector.broadcast %17 : vector<1x128xf32> to vector<8x128xf32>
    %19 = arith.select %13, %16, %18 : vector<8x128xi1>, vector<8x128xf32>
    %20 = vector.shape_cast %5 : vector<1x128xf32> to vector<1x128xf32>
    %21 = vector.broadcast %20 : vector<1x128xf32> to vector<8x128xf32>
    %22 = arith.select %11, %21, %19 : vector<8x128xi1>, vector<8x128xf32>
    %c0_8 = arith.constant 0 : index
    %c0_9 = arith.constant 0 : index
    %23 = vector.load %arg4[%c0_8, %c0_9] : memref<8x128xf32, #tpu.memory_space<vmem>>, vector<8x128xf32>
    tpu.vector_store %arg4[%c0_8, %c0_9], %22 {strides = array<i32>} : memref<8x128xf32, #tpu.memory_space<vmem>>, vector<8x128xf32>,
    return
  }
  func.func @transform_0(%arg0: i32) -> (i32, i32) {
    %c0_i32 = arith.constant 0 : i32
    %c0_i32_0 = arith.constant 0 : i32
    return %arg0, %c0_i32 : i32, i32
  }
  func.func @transform_1(%arg0: i32) -> (i32, i32) {
    %c0_i32 = arith.constant 0 : i32
    %c0_i32_0 = arith.constant 0 : i32
    %c0_i32_1 = arith.constant 0 : i32
    return %c0_i32, %c0_i32_0 : i32, i32
  }
  func.func @transform_2(%arg0: i32) -> (i32, i32) {
    %c0_i32 = arith.constant 0 : i32
    %c0_i32_0 = arith.constant 0 : i32
    return %arg0, %c0_i32 : i32, i32
  }
  func.func @transform_3(%arg0: i32) -> (i32, i32) {
    %c0_i32 = arith.constant 0 : i32
    %c0_i32_0 = arith.constant 0 : i32
    return %arg0, %c0_i32 : i32, i32
  }
}

module attributes {stable_mosaic.version = 11 : i64} {
  func.func @_bn_relu_matmul_stats_kernel(%arg0: i32, %arg1: memref<128x1152xf32, #tpu.memory_space<vmem>>, %arg2: memref<1x1152xf32, #tpu.memory_space<vmem>>, %arg3: memref<1x1152xf32, #tpu.memory_space<vmem>>, %arg4: memref<1152x128xf32, #tpu.memory_space<vmem>>, %arg5: memref<128x128xf32, #tpu.memory_space<vmem>>, %arg6: memref<8x128xf32, #tpu.memory_space<vmem>>) attributes {dimension_semantics = [#tpu.dimension_semantics<parallel>], iteration_bounds = array<i64: 1>, scalar_prefetch = 0 : i64, scratch_operands = 0 : i64, tpu.core_type = #tpu.core_type<tc>, window_params = [{transform_indices = @transform_0, window_bounds = array<i64: 128, 1152>}, {pipeline_mode = #tpu.pipeline_mode<synchronous>, transform_indices = @transform_1, window_bounds = array<i64: 1, 1152>}, {pipeline_mode = #tpu.pipeline_mode<synchronous>, transform_indices = @transform_2, window_bounds = array<i64: 1, 1152>}, {pipeline_mode = #tpu.pipeline_mode<synchronous>, transform_indices = @transform_3, window_bounds = array<i64: 1152, 128>}, {transform_indices = @transform_4, window_bounds = array<i64: 128, 128>}, {transform_indices = @transform_5, window_bounds = array<i64: 8, 128>}]} {
    %c0 = arith.constant 0 : index
    %c0_0 = arith.constant 0 : index
    %0 = vector.load %arg1[%c0, %c0_0] : memref<128x1152xf32, #tpu.memory_space<vmem>>, vector<128x1152xf32>
    %c0_1 = arith.constant 0 : index
    %c0_2 = arith.constant 0 : index
    %1 = vector.load %arg2[%c0_1, %c0_2] : memref<1x1152xf32, #tpu.memory_space<vmem>>, vector<1x1152xf32>
    %2 = vector.broadcast %1 : vector<1x1152xf32> to vector<128x1152xf32>
    %3 = arith.mulf %0, %2 : vector<128x1152xf32>
    %c0_3 = arith.constant 0 : index
    %c0_4 = arith.constant 0 : index
    %4 = vector.load %arg3[%c0_3, %c0_4] : memref<1x1152xf32, #tpu.memory_space<vmem>>, vector<1x1152xf32>
    %5 = vector.broadcast %4 : vector<1x1152xf32> to vector<128x1152xf32>
    %6 = arith.addf %3, %5 : vector<128x1152xf32>
    %cst = arith.constant 0.000000e+00 : f32
    %7 = vector.broadcast %cst : f32 to vector<128x1152xf32>
    %8 = arith.maximumf %6, %7 : vector<128x1152xf32>
    %c0_5 = arith.constant 0 : index
    %c0_6 = arith.constant 0 : index
    %9 = vector.load %arg4[%c0_5, %c0_6] : memref<1152x128xf32, #tpu.memory_space<vmem>>, vector<1152x128xf32>
    %cst_7 = arith.constant dense<0.000000e+00> : vector<128x128xf32>
    %10 = tpu.matmul %8, %9, %cst_7 {dimension_numbers = #tpu.dot_dimension_numbers<[1], [0], [0], [1], [0, 0, 1, 1], [], []>} : vector<128x1152xf32>, vector<1152x128xf32>, vector<128x128xf32> -> vector<128x128xf32>
    %c0_8 = arith.constant 0 : index
    %c0_9 = arith.constant 0 : index
    %11 = vector.load %arg5[%c0_8, %c0_9] : memref<128x128xf32, #tpu.memory_space<vmem>>, vector<128x128xf32>
    tpu.vector_store %arg5[%c0_8, %c0_9], %10 {strides = array<i32>} : memref<128x128xf32, #tpu.memory_space<vmem>>, vector<128x128xf32>,
    %cst_10 = arith.constant dense<0.000000e+00> : vector<128xf32>
    %12 = vector.multi_reduction <add>, %10, %cst_10 [0] : vector<128x128xf32> to vector<128xf32>
    %13 = vector.shape_cast %12 : vector<128xf32> to vector<1x128xf32>
    %14 = arith.mulf %10, %10 : vector<128x128xf32>
    %cst_11 = arith.constant dense<0.000000e+00> : vector<128xf32>
    %15 = vector.multi_reduction <add>, %14, %cst_11 [0] : vector<128x128xf32> to vector<128xf32>
    %16 = vector.shape_cast %15 : vector<128xf32> to vector<1x128xf32>
    %17 = tpu.iota {dimensions = array<i32: 0>} : vector<8x128xi32>
    %c0_i32 = arith.constant 0 : i32
    %18 = vector.broadcast %c0_i32 : i32 to vector<8x128xi32>
    %19 = arith.cmpi eq, %17, %18 : vector<8x128xi32>
    %c1_i32 = arith.constant 1 : i32
    %20 = vector.broadcast %c1_i32 : i32 to vector<8x128xi32>
    %21 = arith.cmpi eq, %17, %20 : vector<8x128xi32>
    %cst_12 = arith.constant 0.000000e+00 : f32
    %22 = vector.broadcast %cst_12 : f32 to vector<1x128xf32>
    %23 = vector.shape_cast %16 : vector<1x128xf32> to vector<1x128xf32>
    %24 = vector.broadcast %23 : vector<1x128xf32> to vector<8x128xf32>
    %25 = vector.shape_cast %22 : vector<1x128xf32> to vector<1x128xf32>
    %26 = vector.broadcast %25 : vector<1x128xf32> to vector<8x128xf32>
    %27 = arith.select %21, %24, %26 : vector<8x128xi1>, vector<8x128xf32>
    %28 = vector.shape_cast %13 : vector<1x128xf32> to vector<1x128xf32>
    %29 = vector.broadcast %28 : vector<1x128xf32> to vector<8x128xf32>
    %30 = arith.select %19, %29, %27 : vector<8x128xi1>, vector<8x128xf32>
    %c0_13 = arith.constant 0 : index
    %c0_14 = arith.constant 0 : index
    %31 = vector.load %arg6[%c0_13, %c0_14] : memref<8x128xf32, #tpu.memory_space<vmem>>, vector<8x128xf32>
    tpu.vector_store %arg6[%c0_13, %c0_14], %30 {strides = array<i32>} : memref<8x128xf32, #tpu.memory_space<vmem>>, vector<8x128xf32>,
    return
  }
  func.func @transform_0(%arg0: i32) -> (i32, i32) {
    %c0_i32 = arith.constant 0 : i32
    %c0_i32_0 = arith.constant 0 : i32
    return %arg0, %c0_i32 : i32, i32
  }
  func.func @transform_1(%arg0: i32) -> (i32, i32) {
    %c0_i32 = arith.constant 0 : i32
    %c0_i32_0 = arith.constant 0 : i32
    %c0_i32_1 = arith.constant 0 : i32
    return %c0_i32, %c0_i32_0 : i32, i32
  }
  func.func @transform_2(%arg0: i32) -> (i32, i32) {
    %c0_i32 = arith.constant 0 : i32
    %c0_i32_0 = arith.constant 0 : i32
    %c0_i32_1 = arith.constant 0 : i32
    return %c0_i32, %c0_i32_0 : i32, i32
  }
  func.func @transform_3(%arg0: i32) -> (i32, i32) {
    %c0_i32 = arith.constant 0 : i32
    %c0_i32_0 = arith.constant 0 : i32
    %c0_i32_1 = arith.constant 0 : i32
    return %c0_i32, %c0_i32_0 : i32, i32
  }
  func.func @transform_4(%arg0: i32) -> (i32, i32) {
    %c0_i32 = arith.constant 0 : i32
    %c0_i32_0 = arith.constant 0 : i32
    return %arg0, %c0_i32 : i32, i32
  }
  func.func @transform_5(%arg0: i32) -> (i32, i32) {
    %c0_i32 = arith.constant 0 : i32
    %c0_i32_0 = arith.constant 0 : i32
    return %arg0, %c0_i32 : i32, i32
  }
}

module attributes {stable_mosaic.version = 11 : i64} {
  func.func @_matmul_stats_kernel(%arg0: i32, %arg1: memref<128x4xf32, #tpu.memory_space<vmem>>, %arg2: memref<4x128xf32, #tpu.memory_space<vmem>>, %arg3: memref<128x128xf32, #tpu.memory_space<vmem>>, %arg4: memref<8x128xf32, #tpu.memory_space<vmem>>) attributes {dimension_semantics = [#tpu.dimension_semantics<parallel>], iteration_bounds = array<i64: 1>, scalar_prefetch = 0 : i64, scratch_operands = 0 : i64, tpu.core_type = #tpu.core_type<tc>, window_params = [{transform_indices = @transform_0, window_bounds = array<i64: 128, 4>}, {pipeline_mode = #tpu.pipeline_mode<synchronous>, transform_indices = @transform_1, window_bounds = array<i64: 4, 128>}, {transform_indices = @transform_2, window_bounds = array<i64: 128, 128>}, {transform_indices = @transform_3, window_bounds = array<i64: 8, 128>}]} {
    %c0 = arith.constant 0 : index
    %c0_0 = arith.constant 0 : index
    %0 = vector.load %arg1[%c0, %c0_0] : memref<128x4xf32, #tpu.memory_space<vmem>>, vector<128x4xf32>
    %c0_1 = arith.constant 0 : index
    %c0_2 = arith.constant 0 : index
    %1 = vector.load %arg2[%c0_1, %c0_2] : memref<4x128xf32, #tpu.memory_space<vmem>>, vector<4x128xf32>
    %cst = arith.constant dense<0.000000e+00> : vector<128x128xf32>
    %2 = tpu.matmul %0, %1, %cst {dimension_numbers = #tpu.dot_dimension_numbers<[1], [0], [0], [1], [0, 0, 1, 1], [], []>} : vector<128x4xf32>, vector<4x128xf32>, vector<128x128xf32> -> vector<128x128xf32>
    %c0_3 = arith.constant 0 : index
    %c0_4 = arith.constant 0 : index
    %3 = vector.load %arg3[%c0_3, %c0_4] : memref<128x128xf32, #tpu.memory_space<vmem>>, vector<128x128xf32>
    tpu.vector_store %arg3[%c0_3, %c0_4], %2 {strides = array<i32>} : memref<128x128xf32, #tpu.memory_space<vmem>>, vector<128x128xf32>,
    %cst_5 = arith.constant dense<0.000000e+00> : vector<128xf32>
    %4 = vector.multi_reduction <add>, %2, %cst_5 [0] : vector<128x128xf32> to vector<128xf32>
    %5 = vector.shape_cast %4 : vector<128xf32> to vector<1x128xf32>
    %6 = arith.mulf %2, %2 : vector<128x128xf32>
    %cst_6 = arith.constant dense<0.000000e+00> : vector<128xf32>
    %7 = vector.multi_reduction <add>, %6, %cst_6 [0] : vector<128x128xf32> to vector<128xf32>
    %8 = vector.shape_cast %7 : vector<128xf32> to vector<1x128xf32>
    %9 = tpu.iota {dimensions = array<i32: 0>} : vector<8x128xi32>
    %c0_i32 = arith.constant 0 : i32
    %10 = vector.broadcast %c0_i32 : i32 to vector<8x128xi32>
    %11 = arith.cmpi eq, %9, %10 : vector<8x128xi32>
    %c1_i32 = arith.constant 1 : i32
    %12 = vector.broadcast %c1_i32 : i32 to vector<8x128xi32>
    %13 = arith.cmpi eq, %9, %12 : vector<8x128xi32>
    %cst_7 = arith.constant 0.000000e+00 : f32
    %14 = vector.broadcast %cst_7 : f32 to vector<1x128xf32>
    %15 = vector.shape_cast %8 : vector<1x128xf32> to vector<1x128xf32>
    %16 = vector.broadcast %15 : vector<1x128xf32> to vector<8x128xf32>
    %17 = vector.shape_cast %14 : vector<1x128xf32> to vector<1x128xf32>
    %18 = vector.broadcast %17 : vector<1x128xf32> to vector<8x128xf32>
    %19 = arith.select %13, %16, %18 : vector<8x128xi1>, vector<8x128xf32>
    %20 = vector.shape_cast %5 : vector<1x128xf32> to vector<1x128xf32>
    %21 = vector.broadcast %20 : vector<1x128xf32> to vector<8x128xf32>
    %22 = arith.select %11, %21, %19 : vector<8x128xi1>, vector<8x128xf32>
    %c0_8 = arith.constant 0 : index
    %c0_9 = arith.constant 0 : index
    %23 = vector.load %arg4[%c0_8, %c0_9] : memref<8x128xf32, #tpu.memory_space<vmem>>, vector<8x128xf32>
    tpu.vector_store %arg4[%c0_8, %c0_9], %22 {strides = array<i32>} : memref<8x128xf32, #tpu.memory_space<vmem>>, vector<8x128xf32>,
    return
  }
  func.func @transform_0(%arg0: i32) -> (i32, i32) {
    %c0_i32 = arith.constant 0 : i32
    %c0_i32_0 = arith.constant 0 : i32
    return %arg0, %c0_i32 : i32, i32
  }
  func.func @transform_1(%arg0: i32) -> (i32, i32) {
    %c0_i32 = arith.constant 0 : i32
    %c0_i32_0 = arith.constant 0 : i32
    %c0_i32_1 = arith.constant 0 : i32
    return %c0_i32, %c0_i32_0 : i32, i32
  }
  func.func @transform_2(%arg0: i32) -> (i32, i32) {
    %c0_i32 = arith.constant 0 : i32
    %c0_i32_0 = arith.constant 0 : i32
    return %arg0, %c0_i32 : i32, i32
  }
  func.func @transform_3(%arg0: i32) -> (i32, i32) {
    %c0_i32 = arith.constant 0 : i32
    %c0_i32_0 = arith.constant 0 : i32
    return %arg0, %c0_i32 : i32, i32
  }
}

module attributes {stable_mosaic.version = 11 : i64} {
  func.func @_bn_add_bn_relu_kernel(%arg0: i32, %arg1: memref<128x128xf32, #tpu.memory_space<vmem>>, %arg2: memref<1x128xf32, #tpu.memory_space<vmem>>, %arg3: memref<1x128xf32, #tpu.memory_space<vmem>>, %arg4: memref<128x128xf32, #tpu.memory_space<vmem>>, %arg5: memref<1x128xf32, #tpu.memory_space<vmem>>, %arg6: memref<1x128xf32, #tpu.memory_space<vmem>>, %arg7: memref<128x128xf32, #tpu.memory_space<vmem>>) attributes {dimension_semantics = [#tpu.dimension_semantics<parallel>], iteration_bounds = array<i64: 1>, scalar_prefetch = 0 : i64, scratch_operands = 0 : i64, tpu.core_type = #tpu.core_type<tc>, window_params = [{transform_indices = @transform_0, window_bounds = array<i64: 128, 128>}, {pipeline_mode = #tpu.pipeline_mode<synchronous>, transform_indices = @transform_1, window_bounds = array<i64: 1, 128>}, {pipeline_mode = #tpu.pipeline_mode<synchronous>, transform_indices = @transform_2, window_bounds = array<i64: 1, 128>}, {transform_indices = @transform_3, window_bounds = array<i64: 128, 128>}, {pipeline_mode = #tpu.pipeline_mode<synchronous>, transform_indices = @transform_4, window_bounds = array<i64: 1, 128>}, {pipeline_mode = #tpu.pipeline_mode<synchronous>, transform_indices = @transform_5, window_bounds = array<i64: 1, 128>}, {transform_indices = @transform_6, window_bounds = array<i64: 128, 128>}]} {
    %c0 = arith.constant 0 : index
    %c0_0 = arith.constant 0 : index
    %0 = vector.load %arg1[%c0, %c0_0] : memref<128x128xf32, #tpu.memory_space<vmem>>, vector<128x128xf32>
    %c0_1 = arith.constant 0 : index
    %c0_2 = arith.constant 0 : index
    %1 = vector.load %arg2[%c0_1, %c0_2] : memref<1x128xf32, #tpu.memory_space<vmem>>, vector<1x128xf32>
    %2 = vector.broadcast %1 : vector<1x128xf32> to vector<128x128xf32>
    %3 = arith.mulf %0, %2 : vector<128x128xf32>
    %c0_3 = arith.constant 0 : index
    %c0_4 = arith.constant 0 : index
    %4 = vector.load %arg3[%c0_3, %c0_4] : memref<1x128xf32, #tpu.memory_space<vmem>>, vector<1x128xf32>
    %5 = vector.broadcast %4 : vector<1x128xf32> to vector<128x128xf32>
    %6 = arith.addf %3, %5 : vector<128x128xf32>
    %c0_5 = arith.constant 0 : index
    %c0_6 = arith.constant 0 : index
    %7 = vector.load %arg4[%c0_5, %c0_6] : memref<128x128xf32, #tpu.memory_space<vmem>>, vector<128x128xf32>
    %c0_7 = arith.constant 0 : index
    %c0_8 = arith.constant 0 : index
    %8 = vector.load %arg5[%c0_7, %c0_8] : memref<1x128xf32, #tpu.memory_space<vmem>>, vector<1x128xf32>
    %9 = vector.broadcast %8 : vector<1x128xf32> to vector<128x128xf32>
    %10 = arith.mulf %7, %9 : vector<128x128xf32>
    %11 = arith.addf %6, %10 : vector<128x128xf32>
    %c0_9 = arith.constant 0 : index
    %c0_10 = arith.constant 0 : index
    %12 = vector.load %arg6[%c0_9, %c0_10] : memref<1x128xf32, #tpu.memory_space<vmem>>, vector<1x128xf32>
    %13 = vector.broadcast %12 : vector<1x128xf32> to vector<128x128xf32>
    %14 = arith.addf %11, %13 : vector<128x128xf32>
    %cst = arith.constant 0.000000e+00 : f32
    %15 = vector.broadcast %cst : f32 to vector<128x128xf32>
    %16 = arith.maximumf %14, %15 : vector<128x128xf32>
    %c0_11 = arith.constant 0 : index
    %c0_12 = arith.constant 0 : index
    %17 = vector.load %arg7[%c0_11, %c0_12] : memref<128x128xf32, #tpu.memory_space<vmem>>, vector<128x128xf32>
    tpu.vector_store %arg7[%c0_11, %c0_12], %16 {strides = array<i32>} : memref<128x128xf32, #tpu.memory_space<vmem>>, vector<128x128xf32>,
    return
  }
  func.func @transform_0(%arg0: i32) -> (i32, i32) {
    %c0_i32 = arith.constant 0 : i32
    %c0_i32_0 = arith.constant 0 : i32
    return %arg0, %c0_i32 : i32, i32
  }
  func.func @transform_1(%arg0: i32) -> (i32, i32) {
    %c0_i32 = arith.constant 0 : i32
    %c0_i32_0 = arith.constant 0 : i32
    %c0_i32_1 = arith.constant 0 : i32
    return %c0_i32, %c0_i32_0 : i32, i32
  }
  func.func @transform_2(%arg0: i32) -> (i32, i32) {
    %c0_i32 = arith.constant 0 : i32
    %c0_i32_0 = arith.constant 0 : i32
    %c0_i32_1 = arith.constant 0 : i32
    return %c0_i32, %c0_i32_0 : i32, i32
  }
  func.func @transform_3(%arg0: i32) -> (i32, i32) {
    %c0_i32 = arith.constant 0 : i32
    %c0_i32_0 = arith.constant 0 : i32
    return %arg0, %c0_i32 : i32, i32
  }
  func.func @transform_4(%arg0: i32) -> (i32, i32) {
    %c0_i32 = arith.constant 0 : i32
    %c0_i32_0 = arith.constant 0 : i32
    %c0_i32_1 = arith.constant 0 : i32
    return %c0_i32, %c0_i32_0 : i32, i32
  }
  func.func @transform_5(%arg0: i32) -> (i32, i32) {
    %c0_i32 = arith.constant 0 : i32
    %c0_i32_0 = arith.constant 0 : i32
    %c0_i32_1 = arith.constant 0 : i32
    return %c0_i32, %c0_i32_0 : i32, i32
  }
  func.func @transform_6(%arg0: i32) -> (i32, i32) {
    %c0_i32 = arith.constant 0 : i32
    %c0_i32_0 = arith.constant 0 : i32
    return %arg0, %c0_i32 : i32, i32
  }
}

</mosaic_0001>

<bundles_post_ra>
// kernel: residual_block_forward.4
= control target key start
LH: loop header
LB: loop body
LE: loop exit
PB: predicated region body
PF: predicated region fallthrough
CT: control target
= control target key end

     0   :  { %vm34_vm0 = vcmask 293888   ;;  %vm83_vm1 = vcmask 1043456   ;;  %s557_s1 = inlined_call_operand.vmem [shape: f32[36,128], index: 1, kind: input, shape index: {}]   ;;  %s558_s0 = inlined_call_operand.vmem [shape: f32[128,36], index: 0, kind: input, shape index: {}]   ;;  %s559_s2 = inlined_call_operand.vmem [shape: f32[128,128], index: 2, kind: output, shape index: {0}]   ;;  %s560_s3 = inlined_call_operand.vmem [shape: f32[8,128], index: 3, kind: output, shape index: {1}]  }
   0x1   :  { %v29_v0 = vld [vmem:[%s557_s1] sm:$0xff]  ;;  %v30_v1 = vld [vmem:[%s557_s1 + $0x8] sm:$0xff]  ;;  %v31_v2 = vld [vmem:[%s557_s1 + $0x10] sm:$0xff] }
   0x2   :  { %v393_v3 = vpack.c.bf16 %v30_v1, %v29_v0  ;;  %v32_v4 = vld [vmem:[%s557_s1 + $0x18] sm:$0xff]  ;;  %v13_v5 = vld [vmem:[%s558_s0] sm:$0xff]  ;;  %v14_v9 = vld [vmem:[%s558_s0 + $0x8] sm:$0xff] }
   0x3   :  { %v397_v6 = vpack.c.bf16 %v32_v4, %v31_v2  ;;  %369 = vmatprep.mubr.msk.f32.mxu0 %vm34_vm0, %v13_v5  ;;  %v21_v7 = vld [vmem:[%s558_s0 + $0x40] sm:$0xff]  ;;  %v22_v10 = vld [vmem:[%s558_s0 + $0x48] sm:$0xff]  ;;  %v15_v11 = vld [vmem:[%s558_s0 + $0x10] sm:$0xff] }
   0x4   :  { %394 = vmatprep.subr.bf16.mxu0 %v393_v3  ;;  %401 = vmatprep.subr.bf16.mxu1 %v393_v3  ;;  %v33_v8 = vld [vmem:[%s557_s1 + $0x20] sm:$0xf]  ;;  %v23_v12 = vld [vmem:[%s558_s0 + $0x50] sm:$0xff]  ;;  %v16_v13 = vld [vmem:[%s558_s0 + $0x18] sm:$0xff] }
   0x5   :  { %396 = vmatpush3.bf16.msra.mxu0 %v393_v3  ;;  %404 = vmatpush3.bf16.msra.mxu1 %v393_v3  ;;  %v24_v14 = vld [vmem:[%s558_s0 + $0x58] sm:$0xff]  ;;  %v17_v15 = vld [vmem:[%s558_s0 + $0x20] sm:$0xff]  ;;  %v18_v17 = vld [vmem:[%s558_s0 + $0x28] sm:$0xff] }
   0x6   :  { %398 = vmatprep.subr.bf16.mxu0 %v397_v6  ;;  %402 = vmatprep.subr.bf16.mxu1 %v397_v6  ;;  %v25_v16 = vld [vmem:[%s558_s0 + $0x60] sm:$0xff]  ;;  %v26_v18 = vld [vmem:[%s558_s0 + $0x68] sm:$0xff]  ;;  %v19_v19 = vld [vmem:[%s558_s0 + $0x30] sm:$0xff] }
   0x7   :  { %381 = vmatprep.mubr.msk.f32.mxu1 %vm34_vm0, %v21_v7  ;;  %v27_v20 = vld [vmem:[%s558_s0 + $0x70] sm:$0xff]  ;;  %v20_v21 = vld [vmem:[%s558_s0 + $0x38] sm:$0xff] }
   0x8   :  { %v28_v22 = vld [vmem:[%s558_s0 + $0x78] sm:$0xff] }
   0x9   :  { %400 = vmatpush3.bf16.msra.mxu0 %v397_v6  ;;  %405 = vmatpush3.bf16.msra.mxu1 %v397_v6 }
   0xa   :  { %367 = vmatprep.subr.msk.mxu0 %vm83_vm1, %v33_v8  ;;  %403 = vmatprep.subr.msk.mxu1 %vm83_vm1, %v33_v8 }
   0xd   :  { %368 = vmatpush3.msk.msra.mxu0 %vm83_vm1, %v33_v8  ;;  %406 = vmatpush3.msk.msra.mxu1 %vm83_vm1, %v33_v8 }
   0xe   :  { %370 = vmatmul.mubr.msk.f32.vlgmr.msra.gmra.mrb[0].mxu0 %vm34_vm0, %v14_v9  ;;  %382 = vmatmul.mubr.msk.f32.vlgmr.msra.gmra.mrb[0].mxu1 %vm34_vm0, %v22_v10 }
   0xf   :  { %372 = vmatprep.mubr.msk.f32.mxu0 %vm34_vm0, %v15_v11  ;;  %384 = vmatprep.mubr.msk.f32.mxu1 %vm34_vm0, %v23_v12 }
  0x12   :  { %373 = vmatmul.mubr.msk.f32.gmra.mrb[2].mxu0 %vm34_vm0, %v16_v13  ;;  %385 = vmatmul.mubr.msk.f32.gmra.mrb[2].mxu1 %vm34_vm0, %v24_v14 }
  0x13   :  { %375 = vmatprep.mubr.msk.f32.mxu0 %vm34_vm0, %v17_v15  ;;  %387 = vmatprep.mubr.msk.f32.mxu1 %vm34_vm0, %v25_v16 }
  0x16   :  { %376 = vmatmul.mubr.msk.f32.gmra.mrb[4].mxu0 %vm34_vm0, %v18_v17  ;;  %388 = vmatmul.mubr.msk.f32.gmra.mrb[4].mxu1 %vm34_vm0, %v26_v18 }
  0x17   :  { %378 = vmatprep.mubr.msk.f32.mxu0 %vm34_vm0, %v19_v19  ;;  %390 = vmatprep.mubr.msk.f32.mxu1 %vm34_vm0, %v27_v20 }
  0x1a   :  { %379 = vmatmul.mubr.msk.f32.gmra.mrb[6].mxu0 %vm34_vm0, %v20_v21  ;;  %391 = vmatmul.mubr.msk.f32.gmra.mrb[6].mxu1 %vm34_vm0, %v28_v22 }
  0xe1   :  { %v371_v23 = vpop.f32.mrb[0].mxu0  ;;  %v383_v24 = vpop.f32.mrb[0].mxu1 }
  0xe2   :  { %233 = vst [vmem:[%s559_s2 + $0x8] sm:$0xff] %v371_v23  ;;  %v270_v25 = vmul.f32 %v371_v23, %v371_v23  ;;  %v153_v26 = vpop.f32.mrb[1].mxu0  ;;  %241 = vst [vmem:[%s559_s2 + $0x48] sm:$0xff] %v383_v24  ;;  %v193_v27 = vpop.f32.mrb[1].mxu1  ;;  %v278_v63 = vmul.f32 %v383_v24, %v383_v24 }
  0xe3   :  { %232 = vst [vmem:[%s559_s2] sm:$0xff] %v153_v26  ;;  %v248_v28 = vadd.f32 %v371_v23, %v153_v26  ;;  %v269_v29 = vmul.f32 %v153_v26, %v153_v26  ;;  %240 = vst [vmem:[%s559_s2 + $0x40] sm:$0xff] %v193_v27  ;;  %v277_v60 = vmul.f32 %v193_v27, %v193_v27 }
  0xe5   :  { %v285_v30 = vadd.f32 %v270_v25, %v269_v29  ;;  %v374_v31 = vpop.f32.mrb[2].mxu0  ;;  %v386_v32 = vpop.f32.mrb[2].mxu1 }
  0xe6   :  { %235 = vst [vmem:[%s559_s2 + $0x18] sm:$0xff] %v374_v31  ;;  %v163_v33 = vpop.f32.mrb[3].mxu0  ;;  %243 = vst [vmem:[%s559_s2 + $0x58] sm:$0xff] %v386_v32  ;;  %v203_v34 = vpop.f32.mrb[3].mxu1  ;;  %v272_v37 = vmul.f32 %v374_v31, %v374_v31  ;;  %v280_v5 = vmul.f32 %v386_v32, %v386_v32 }
  0xe7   :  { %234 = vst [vmem:[%s559_s2 + $0x10] sm:$0xff] %v163_v33  ;;  %v249_v35 = vadd.f32 %v248_v28, %v163_v33  ;;  %v271_v36 = vmul.f32 %v163_v33, %v163_v33  ;;  %242 = vst [vmem:[%s559_s2 + $0x50] sm:$0xff] %v203_v34  ;;  %v279_v2 = vmul.f32 %v203_v34, %v203_v34 }
  0xe9   :  { %v286_v38 = vadd.f32 %v285_v30, %v271_v36  ;;  %v377_v39 = vpop.f32.mrb[4].mxu0  ;;  %v250_v40 = vadd.f32 %v374_v31, %v249_v35  ;;  %v389_v41 = vpop.f32.mrb[4].mxu1 }
  0xea   :  { %237 = vst [vmem:[%s559_s2 + $0x28] sm:$0xff] %v377_v39  ;;  %v173_v42 = vpop.f32.mrb[5].mxu0  ;;  %245 = vst [vmem:[%s559_s2 + $0x68] sm:$0xff] %v389_v41  ;;  %v213_v43 = vpop.f32.mrb[5].mxu1  ;;  %v274_v47 = vmul.f32 %v377_v39, %v377_v39  ;;  %v282_v11 = vmul.f32 %v389_v41, %v389_v41 }
  0xeb   :  { %236 = vst [vmem:[%s559_s2 + $0x20] sm:$0xff] %v173_v42  ;;  %v251_v44 = vadd.f32 %v250_v40, %v173_v42  ;;  %v273_v45 = vmul.f32 %v173_v42, %v173_v42  ;;  %v287_v46 = vadd.f32 %v286_v38, %v272_v37  ;;  %244 = vst [vmem:[%s559_s2 + $0x60] sm:$0xff] %v213_v43 }
  0xec   :  { %v281_v8 = vmul.f32 %v213_v43, %v213_v43 }
  0xed   :  { %v288_v48 = vadd.f32 %v287_v46, %v273_v45  ;;  %v380_v49 = vpop.f32.mrb[6].mxu0  ;;  %v252_v50 = vadd.f32 %v377_v39, %v251_v44  ;;  %v392_v51 = vpop.f32.mrb[6].mxu1 }
  0xee   :  { %239 = vst [vmem:[%s559_s2 + $0x38] sm:$0xff] %v380_v49  ;;  %v183_v52 = vpop.f32.mrb[7].mxu0  ;;  %247 = vst [vmem:[%s559_s2 + $0x78] sm:$0xff] %v392_v51  ;;  %v223_v53 = vpop.f32.mrb[7].mxu1  ;;  %v276_v57 = vmul.f32 %v380_v49, %v380_v49  ;;  %v284_v17 = vmul.f32 %v392_v51, %v392_v51 }
  0xef   :  { %238 = vst [vmem:[%s559_s2 + $0x30] sm:$0xff] %v183_v52  ;;  %v253_v54 = vadd.f32 %v252_v50, %v183_v52  ;;  %v275_v55 = vmul.f32 %v183_v52, %v183_v52  ;;  %v289_v56 = vadd.f32 %v288_v48, %v274_v47  ;;  %246 = vst [vmem:[%s559_s2 + $0x70] sm:$0xff] %v223_v53 }
  0xf0   :  { %v283_v14 = vmul.f32 %v223_v53, %v223_v53 }
  0xf1   :  { %v254_v58 = vadd.f32 %v380_v49, %v253_v54  ;;  %v290_v59 = vadd.f32 %v289_v56, %v275_v55 }
  0xf3   :  { %v291_v61 = vadd.f32 %v290_v59, %v276_v57  ;;  %v255_v62 = vadd.f32 %v254_v58, %v193_v27 }
  0xf5   :  { %v292_v0 = vadd.f32 %v291_v61, %v277_v60  ;;  %v256_v1 = vadd.f32 %v383_v24, %v255_v62  ;;  %v306_v24 = vlaneseq }
  0xf7   :  { %v257_v3 = vadd.f32 %v256_v1, %v203_v34  ;;  %v293_v4 = vadd.f32 %v292_v0, %v278_v63  ;;  %v307_v29 = vshrl.u32 %v306_v24, 7 }
  0xf9   :  { %v294_v6 = vadd.f32 %v293_v4, %v279_v2  ;;  %v258_v7 = vadd.f32 %v386_v32, %v257_v3  ;;  %vm309_vm2 = vcmp.eq.s32.totalorder %v307_v29, 1  ;;  %vm308_vm3 = vcmp.eq.s32.totalorder %v307_v29, 0 }
  0xfb   :  { %v259_v9 = vadd.f32 %v258_v7, %v213_v43  ;;  %v295_v10 = vadd.f32 %v294_v6, %v280_v5 }
  0xfd   :  { %v296_v12 = vadd.f32 %v295_v10, %v281_v8  ;;  %v260_v13 = vadd.f32 %v389_v41, %v259_v9 }
  0xff   :  { %v261_v15 = vadd.f32 %v260_v13, %v223_v53  ;;  %v297_v16 = vadd.f32 %v296_v12, %v282_v11 }
 0x101   :  { %v262_v18 = vadd.f32 %v392_v51, %v261_v15  ;;  %v298_v19 = vadd.f32 %v297_v16, %v283_v14 }
 0x103   :  { %v263_v20 = vrot.slane %v262_v18, 4  ;;  %v299_v21 = vadd.f32 %v298_v19, %v284_v17 }
 0x105   :  { %v264_v22 = vadd.f32 %v263_v20, %v262_v18  ;;  %v300_v23 = vrot.slane %v299_v21, 4 }
 0x107   :  { %v265_v25 = vrot.slane %v264_v22, 2  ;;  %v301_v26 = vadd.f32 %v300_v23, %v299_v21 }
 0x109   :  { %v266_v27 = vadd.f32 %v265_v25, %v264_v22  ;;  %v302_v28 = vrot.slane %v301_v26, 2 }
 0x10b   :  { %v303_v30 = vadd.f32 %v302_v28, %v301_v26  ;;  %v267_v31 = vrot.slane %v266_v27, 1 }
 0x10d   :  { %v304_v32 = vrot.slane %v303_v30, 1  ;;  %v268_v34 = vadd.f32 %v267_v31, %v266_v27 }
 0x10f   :  { %v305_v33 = vadd.f32 %v304_v32, %v303_v30 }
 0x111   :  { %v310_v35 = vsel %vm309_vm2, %v305_v33, 0.0 }
 0x112   :  { %v311_v36 = vsel %vm308_vm3, %v268_v34, %v310_v35 }
 0x113   :  { %312 = vst [vmem:[%s560_s3] sm:$0xff] %v311_v36 }

// kernel: residual_block_forward.5
= control target key start
LH: loop header
LB: loop body
LE: loop exit
PB: predicated region body
PF: predicated region fallthrough
CT: control target
= control target key end

     0   :  { %vm79_vm0 = vcmask 1043456   ;;  %vm30_vm1 = vcmask 31744   ;;  %s517_s1 = inlined_call_operand.vmem [shape: f32[4,128], index: 1, kind: input, shape index: {}]   ;;  %s518_s0 = inlined_call_operand.vmem [shape: f32[128,4], index: 0, kind: input, shape index: {}]   ;;  %s519_s2 = inlined_call_operand.vmem [shape: f32[128,128], index: 2, kind: output, shape index: {0}]   ;;  %s520_s3 = inlined_call_operand.vmem [shape: f32[8,128], index: 3, kind: output, shape index: {1}]  }
   0x1   :  { %v29_v0 = vld [vmem:[%s517_s1] sm:$0xf]  ;;  %v14_v2 = vld [vmem:[%s518_s0 + $0x8] sm:$0xff]  ;;  %v15_v3 = vld [vmem:[%s518_s0 + $0x10] sm:$0xff] }
   0x2   :  { %v13_v1 = vld [vmem:[%s518_s0] sm:$0xff]  ;;  %351 = vmatprep.subr.msk.mxu0 %vm79_vm0, %v29_v0  ;;  %377 = vmatprep.subr.msk.mxu1 %vm79_vm0, %v29_v0  ;;  %v22_v5 = vld [vmem:[%s518_s0 + $0x48] sm:$0xff]  ;;  %v23_v6 = vld [vmem:[%s518_s0 + $0x50] sm:$0xff] }
   0x3   :  { %353 = vmatprep.mubr.msk.f32.mxu0 %vm30_vm1, %v13_v1  ;;  %352 = vmatpush3.msk.msra.mxu0 %vm79_vm0, %v29_v0  ;;  %v21_v4 = vld [vmem:[%s518_s0 + $0x40] sm:$0xff]  ;;  %v16_v7 = vld [vmem:[%s518_s0 + $0x18] sm:$0xff]  ;;  %v18_v11 = vld [vmem:[%s518_s0 + $0x28] sm:$0xff] }
   0x4   :  { %354 = vmatmul.mubr.msk.f32.vlgmr.msra.gmra.mrb[0].mxu0 %vm30_vm1, %v14_v2  ;;  %378 = vmatpush3.msk.msra.mxu1 %vm79_vm0, %v29_v0  ;;  %v17_v8 = vld [vmem:[%s518_s0 + $0x20] sm:$0xff]  ;;  %v24_v9 = vld [vmem:[%s518_s0 + $0x58] sm:$0xff]  ;;  %v19_v12 = vld [vmem:[%s518_s0 + $0x30] sm:$0xff] }
   0x5   :  { %356 = vmatprep.mubr.msk.f32.mxu0 %vm30_vm1, %v15_v3  ;;  %365 = vmatprep.mubr.msk.f32.mxu1 %vm30_vm1, %v21_v4  ;;  %v25_v10 = vld [vmem:[%s518_s0 + $0x60] sm:$0xff]  ;;  %v26_v13 = vld [vmem:[%s518_s0 + $0x68] sm:$0xff]  ;;  %v27_v14 = vld [vmem:[%s518_s0 + $0x70] sm:$0xff] }
   0x6   :  { %366 = vmatmul.mubr.msk.f32.vlgmr.msra.gmra.mrb[0].mxu1 %vm30_vm1, %v22_v5  ;;  %v20_v15 = vld [vmem:[%s518_s0 + $0x38] sm:$0xff] }
   0x7   :  { %368 = vmatprep.mubr.msk.f32.mxu1 %vm30_vm1, %v23_v6  ;;  %v28_v16 = vld [vmem:[%s518_s0 + $0x78] sm:$0xff] }
   0x8   :  { %357 = vmatmul.mubr.msk.f32.gmra.mrb[2].mxu0 %vm30_vm1, %v16_v7 }
   0x9   :  { %359 = vmatprep.mubr.msk.f32.mxu0 %vm30_vm1, %v17_v8 }
   0xa   :  { %369 = vmatmul.mubr.msk.f32.gmra.mrb[2].mxu1 %vm30_vm1, %v24_v9 }
   0xb   :  { %371 = vmatprep.mubr.msk.f32.mxu1 %vm30_vm1, %v25_v10 }
   0xc   :  { %360 = vmatmul.mubr.msk.f32.gmra.mrb[4].mxu0 %vm30_vm1, %v18_v11 }
   0xd   :  { %362 = vmatprep.mubr.msk.f32.mxu0 %vm30_vm1, %v19_v12 }
   0xe   :  { %372 = vmatmul.mubr.msk.f32.gmra.mrb[4].mxu1 %vm30_vm1, %v26_v13 }
   0xf   :  { %374 = vmatprep.mubr.msk.f32.mxu1 %vm30_vm1, %v27_v14 }
  0x10   :  { %363 = vmatmul.mubr.msk.f32.gmra.mrb[6].mxu0 %vm30_vm1, %v20_v15 }
  0x12   :  { %375 = vmatmul.mubr.msk.f32.gmra.mrb[6].mxu1 %vm30_vm1, %v28_v16 }
  0xd7   :  { %v355_v17 = vpop.f32.mrb[0].mxu0 }
  0xd8   :  { %229 = vst [vmem:[%s519_s2 + $0x8] sm:$0xff] %v355_v17  ;;  %v266_v18 = vmul.f32 %v355_v17, %v355_v17  ;;  %v149_v19 = vpop.f32.mrb[1].mxu0 }
  0xd9   :  { %228 = vst [vmem:[%s519_s2] sm:$0xff] %v149_v19  ;;  %v244_v20 = vadd.f32 %v355_v17, %v149_v19  ;;  %v265_v21 = vmul.f32 %v149_v19, %v149_v19  ;;  %v367_v22 = vpop.f32.mrb[0].mxu1 }
  0xda   :  { %237 = vst [vmem:[%s519_s2 + $0x48] sm:$0xff] %v367_v22  ;;  %v189_v23 = vpop.f32.mrb[1].mxu1  ;;  %v274_v57 = vmul.f32 %v367_v22, %v367_v22 }
  0xdb   :  { %v281_v24 = vadd.f32 %v266_v18, %v265_v21  ;;  %v358_v25 = vpop.f32.mrb[2].mxu0  ;;  %236 = vst [vmem:[%s519_s2 + $0x40] sm:$0xff] %v189_v23  ;;  %v273_v54 = vmul.f32 %v189_v23, %v189_v23  ;;  %v302_v18 = vlaneseq }
  0xdc   :  { %231 = vst [vmem:[%s519_s2 + $0x18] sm:$0xff] %v358_v25  ;;  %v159_v26 = vpop.f32.mrb[3].mxu0  ;;  %v268_v31 = vmul.f32 %v358_v25, %v358_v25 }
  0xdd   :  { %230 = vst [vmem:[%s519_s2 + $0x10] sm:$0xff] %v159_v26  ;;  %v245_v27 = vadd.f32 %v244_v20, %v159_v26  ;;  %v267_v28 = vmul.f32 %v159_v26, %v159_v26  ;;  %v370_v29 = vpop.f32.mrb[2].mxu1 }
  0xde   :  { %239 = vst [vmem:[%s519_s2 + $0x58] sm:$0xff] %v370_v29  ;;  %v199_v30 = vpop.f32.mrb[3].mxu1  ;;  %v276_v63 = vmul.f32 %v370_v29, %v370_v29 }
  0xdf   :  { %v282_v32 = vadd.f32 %v281_v24, %v267_v28  ;;  %v361_v33 = vpop.f32.mrb[4].mxu0  ;;  %v246_v34 = vadd.f32 %v358_v25, %v245_v27  ;;  %238 = vst [vmem:[%s519_s2 + $0x50] sm:$0xff] %v199_v30  ;;  %v275_v60 = vmul.f32 %v199_v30, %v199_v30 }
  0xe0   :  { %233 = vst [vmem:[%s519_s2 + $0x28] sm:$0xff] %v361_v33  ;;  %v169_v35 = vpop.f32.mrb[5].mxu0  ;;  %v270_v41 = vmul.f32 %v361_v33, %v361_v33 }
  0xe1   :  { %232 = vst [vmem:[%s519_s2 + $0x20] sm:$0xff] %v169_v35  ;;  %v247_v36 = vadd.f32 %v246_v34, %v169_v35  ;;  %v269_v37 = vmul.f32 %v169_v35, %v169_v35  ;;  %v283_v38 = vadd.f32 %v282_v32, %v268_v31  ;;  %v373_v39 = vpop.f32.mrb[4].mxu1 }
  0xe2   :  { %241 = vst [vmem:[%s519_s2 + $0x68] sm:$0xff] %v373_v39  ;;  %v209_v40 = vpop.f32.mrb[5].mxu1  ;;  %v278_v5 = vmul.f32 %v373_v39, %v373_v39 }
  0xe3   :  { %v284_v42 = vadd.f32 %v283_v38, %v269_v37  ;;  %v364_v43 = vpop.f32.mrb[6].mxu0  ;;  %v248_v44 = vadd.f32 %v361_v33, %v247_v36  ;;  %240 = vst [vmem:[%s519_s2 + $0x60] sm:$0xff] %v209_v40  ;;  %v277_v2 = vmul.f32 %v209_v40, %v209_v40 }
  0xe4   :  { %235 = vst [vmem:[%s519_s2 + $0x38] sm:$0xff] %v364_v43  ;;  %v179_v45 = vpop.f32.mrb[7].mxu0  ;;  %v272_v51 = vmul.f32 %v364_v43, %v364_v43 }
  0xe5   :  { %234 = vst [vmem:[%s519_s2 + $0x30] sm:$0xff] %v179_v45  ;;  %v249_v46 = vadd.f32 %v248_v44, %v179_v45  ;;  %v271_v47 = vmul.f32 %v179_v45, %v179_v45  ;;  %v285_v48 = vadd.f32 %v284_v42, %v270_v41  ;;  %v376_v49 = vpop.f32.mrb[6].mxu1 }
  0xe6   :  { %243 = vst [vmem:[%s519_s2 + $0x78] sm:$0xff] %v376_v49  ;;  %v219_v50 = vpop.f32.mrb[7].mxu1  ;;  %v280_v11 = vmul.f32 %v376_v49, %v376_v49 }
  0xe7   :  { %v250_v52 = vadd.f32 %v364_v43, %v249_v46  ;;  %v286_v53 = vadd.f32 %v285_v48, %v271_v47  ;;  %242 = vst [vmem:[%s519_s2 + $0x70] sm:$0xff] %v219_v50  ;;  %v279_v8 = vmul.f32 %v219_v50, %v219_v50 }
  0xe9   :  { %v287_v55 = vadd.f32 %v286_v53, %v272_v51  ;;  %v251_v56 = vadd.f32 %v250_v52, %v189_v23  ;;  %v303_v23 = vshrl.u32 %v302_v18, 7 }
  0xeb   :  { %v288_v58 = vadd.f32 %v287_v55, %v273_v54  ;;  %v252_v59 = vadd.f32 %v367_v22, %v251_v56  ;;  %vm305_vm2 = vcmp.eq.s32.totalorder %v303_v23, 1  ;;  %vm304_vm3 = vcmp.eq.s32.totalorder %v303_v23, 0 }
  0xed   :  { %v253_v61 = vadd.f32 %v252_v59, %v199_v30  ;;  %v289_v62 = vadd.f32 %v288_v58, %v274_v57 }
  0xef   :  { %v290_v0 = vadd.f32 %v289_v62, %v275_v60  ;;  %v254_v1 = vadd.f32 %v370_v29, %v253_v61 }
  0xf1   :  { %v255_v3 = vadd.f32 %v254_v1, %v209_v40  ;;  %v291_v4 = vadd.f32 %v290_v0, %v276_v63 }
  0xf3   :  { %v292_v6 = vadd.f32 %v291_v4, %v277_v2  ;;  %v256_v7 = vadd.f32 %v373_v39, %v255_v3 }
  0xf5   :  { %v257_v9 = vadd.f32 %v256_v7, %v219_v50  ;;  %v293_v10 = vadd.f32 %v292_v6, %v278_v5 }
  0xf7   :  { %v258_v12 = vadd.f32 %v376_v49, %v257_v9  ;;  %v294_v13 = vadd.f32 %v293_v10, %v279_v8 }
  0xf9   :  { %v259_v14 = vrot.slane %v258_v12, 4  ;;  %v295_v15 = vadd.f32 %v294_v13, %v280_v11 }
  0xfb   :  { %v260_v16 = vadd.f32 %v259_v14, %v258_v12  ;;  %v296_v17 = vrot.slane %v295_v15, 4 }
  0xfd   :  { %v261_v19 = vrot.slane %v260_v16, 2  ;;  %v297_v20 = vadd.f32 %v296_v17, %v295_v15 }
  0xff   :  { %v262_v21 = vadd.f32 %v261_v19, %v260_v16  ;;  %v298_v22 = vrot.slane %v297_v20, 2 }
 0x101   :  { %v299_v24 = vadd.f32 %v298_v22, %v297_v20  ;;  %v263_v25 = vrot.slane %v262_v21, 1 }
 0x103   :  { %v300_v26 = vrot.slane %v299_v24, 1  ;;  %v264_v28 = vadd.f32 %v263_v25, %v262_v21 }
 0x105   :  { %v301_v27 = vadd.f32 %v300_v26, %v299_v24 }
 0x107   :  { %v306_v29 = vsel %vm305_vm2, %v301_v27, 0.0 }
 0x108   :  { %v307_v30 = vsel %vm304_vm3, %v264_v28, %v306_v29 }
 0x109   :  { %308 = vst [vmem:[%s520_s3] sm:$0xff] %v307_v30 }

// kernel: residual_block_forward.7
= control target key start
LH: loop header
LB: loop body
LE: loop exit
PB: predicated region body
PF: predicated region fallthrough
CT: control target
= control target key end

     0   :  { %s466_s0 = inlined_call_operand.vmem [shape: f32[128,128], index: 0, kind: input, shape index: {}]   ;;  %s467_s1 = inlined_call_operand.vmem [shape: f32[1,128], index: 1, kind: input, shape index: {}]   ;;  %s468_s2 = inlined_call_operand.vmem [shape: f32[1,128], index: 2, kind: input, shape index: {}]   ;;  %s469_s3 = inlined_call_operand.vmem [shape: f32[128,128], index: 3, kind: input, shape index: {}]   ;;  %s470_s4 = inlined_call_operand.vmem [shape: f32[1,128], index: 4, kind: input, shape index: {}]   ;;  %s471_s5 = inlined_call_operand.vmem [shape: f32[1,128], index: 5, kind: input, shape index: {}]   ;;  %s472_s6 = inlined_call_operand.vmem [shape: f32[128,128], index: 6, kind: output, shape index: {}]  }
   0x1   :  { %v23_v0 = vld [vmem:[%s466_s0] sm:$0xff]  ;;  %v24_v8 = vld [vmem:[%s466_s0 + $0x8] sm:$0xff]  ;;  %v25_v10 = vld [vmem:[%s466_s0 + $0x10] sm:$0xff] }
   0x2   :  { %v244_v1 = vld [vmem:[%s467_s1] ss:$0 sm:$0xff]  ;;  %v86_v9 = vld [vmem:[%s469_s3 + $0x8] sm:$0xff]  ;;  %v87_v15 = vld [vmem:[%s469_s3 + $0x10] sm:$0xff] }
   0x3   :  { %v249_v2 = vld [vmem:[%s468_s2] ss:$0 sm:$0xff]  ;;  %v46_v3 = vmul.f32 %v244_v1, %v23_v0  ;;  %v47_v12 = vmul.f32 %v244_v1, %v24_v8  ;;  %v48_v14 = vmul.f32 %v244_v1, %v25_v10  ;;  %v26_v16 = vld [vmem:[%s466_s0 + $0x18] sm:$0xff]  ;;  %v28_v23 = vld [vmem:[%s466_s0 + $0x28] sm:$0xff] }
   0x4   :  { %v85_v4 = vld [vmem:[%s469_s3] sm:$0xff]  ;;  %v88_v17 = vld [vmem:[%s469_s3 + $0x18] sm:$0xff]  ;;  %v49_v19 = vmul.f32 %v244_v1, %v26_v16  ;;  %v90_v28 = vld [vmem:[%s469_s3 + $0x28] sm:$0xff]  ;;  %v51_v33 = vmul.f32 %v244_v1, %v28_v23 }
   0x5   :  { %v258_v5 = vld [vmem:[%s470_s4] ss:$0 sm:$0xff]  ;;  %v69_v11 = vadd.f32 %v249_v2, %v46_v3  ;;  %v70_v25 = vadd.f32 %v249_v2, %v47_v12  ;;  %v71_v26 = vadd.f32 %v249_v2, %v48_v14  ;;  %v29_v29 = vld [vmem:[%s466_s0 + $0x30] sm:$0xff]  ;;  %v30_v39 = vld [vmem:[%s466_s0 + $0x38] sm:$0xff] }
   0x6   :  { %v108_v6 = vmul.f32 %v258_v5, %v85_v4  ;;  %v264_v7 = vld [vmem:[%s471_s5] ss:$0 sm:$0xff]  ;;  %v109_v13 = vmul.f32 %v258_v5, %v86_v9  ;;  %v110_v18 = vmul.f32 %v258_v5, %v87_v15  ;;  %v111_v20 = vmul.f32 %v258_v5, %v88_v17  ;;  %v91_v30 = vld [vmem:[%s469_s3 + $0x30] sm:$0xff]  ;;  %v92_v44 = vld [vmem:[%s469_s3 + $0x38] sm:$0xff] }
   0x7   :  { %v27_v21 = vld [vmem:[%s466_s0 + $0x20] sm:$0xff]  ;;  %v72_v31 = vadd.f32 %v249_v2, %v49_v19  ;;  %v113_v34 = vmul.f32 %v258_v5, %v90_v28  ;;  %v74_v41 = vadd.f32 %v249_v2, %v51_v33  ;;  %v52_v42 = vmul.f32 %v244_v1, %v29_v29  ;;  %v32_v55 = vld [vmem:[%s466_s0 + $0x48] sm:$0xff]  ;;  %v33_v3 = vld [vmem:[%s466_s0 + $0x50] sm:$0xff] }
   0x8   :  { %v89_v22 = vld [vmem:[%s469_s3 + $0x20] sm:$0xff]  ;;  %v124_v24 = vadd.f32 %v108_v6, %v69_v11  ;;  %v50_v27 = vmul.f32 %v244_v1, %v27_v21  ;;  %v125_v36 = vadd.f32 %v109_v13, %v70_v25  ;;  %v126_v37 = vadd.f32 %v110_v18, %v71_v26  ;;  %v94_v60 = vld [vmem:[%s469_s3 + $0x48] sm:$0xff]  ;;  %v95_v4 = vld [vmem:[%s469_s3 + $0x50] sm:$0xff] }
   0x9   :  { %v112_v32 = vmul.f32 %v258_v5, %v89_v22  ;;  %v127_v40 = vadd.f32 %v111_v20, %v72_v31  ;;  %v114_v43 = vmul.f32 %v258_v5, %v91_v30  ;;  %v129_v50 = vadd.f32 %v113_v34, %v74_v41  ;;  %v31_v53 = vld [vmem:[%s466_s0 + $0x40] sm:$0xff]  ;;  %v34_v11 = vld [vmem:[%s466_s0 + $0x58] sm:$0xff]  ;;  %v36_v23 = vld [vmem:[%s466_s0 + $0x68] sm:$0xff] }
   0xa   :  { %v147_v35 = vadd.f32 %v264_v7, %v124_v24  ;;  %v73_v38 = vadd.f32 %v249_v2, %v50_v27  ;;  %v148_v46 = vadd.f32 %v264_v7, %v125_v36  ;;  %v149_v47 = vadd.f32 %v264_v7, %v126_v37  ;;  %v93_v54 = vld [vmem:[%s469_s3 + $0x40] sm:$0xff]  ;;  %v96_v12 = vld [vmem:[%s469_s3 + $0x58] sm:$0xff]  ;;  %v37_v33 = vld [vmem:[%s466_s0 + $0x70] sm:$0xff] }
   0xb   :  { %v150_v49 = vadd.f32 %v264_v7, %v127_v40  ;;  %v75_v51 = vadd.f32 %v249_v2, %v52_v42  ;;  %v53_v52 = vmul.f32 %v244_v1, %v30_v39  ;;  %v115_v59 = vmul.f32 %v258_v5, %v92_v44  ;;  %v35_v17 = vld [vmem:[%s466_s0 + $0x60] sm:$0xff]  ;;  %v99_v42 = vld [vmem:[%s469_s3 + $0x70] sm:$0xff] }
   0xc   :  { %v163_v45 = vmax.f32 %v147_v35, 0.0  ;;  %v128_v48 = vadd.f32 %v112_v32, %v73_v38  ;;  %v164_v56 = vmax.f32 %v148_v46, 0.0  ;;  %v165_v57 = vmax.f32 %v149_v47, 0.0  ;;  %v97_v22 = vld [vmem:[%s469_s3 + $0x60] sm:$0xff]  ;;  %v98_v32 = vld [vmem:[%s469_s3 + $0x68] sm:$0xff]  ;;  %v38_v47 = vld [vmem:[%s466_s0 + $0x78] sm:$0xff] }
   0xd   :  { %v166_v61 = vmax.f32 %v150_v49, 0.0  ;;  %v152_v62 = vadd.f32 %v264_v7, %v129_v50  ;;  %v130_v63 = vadd.f32 %v114_v43, %v75_v51  ;;  %v76_v0 = vadd.f32 %v249_v2, %v53_v52 }
   0xe   :  { %179 = vst [vmem:[%s472_s6] sm:$0xff] %v163_v45  ;;  %v151_v58 = vadd.f32 %v264_v7, %v128_v48  ;;  %180 = vst [vmem:[%s472_s6 + $0x8] sm:$0xff] %v164_v56  ;;  %v54_v8 = vmul.f32 %v244_v1, %v31_v53  ;;  %v116_v9 = vmul.f32 %v258_v5, %v93_v54  ;;  %v100_v48 = vld [vmem:[%s469_s3 + $0x78] sm:$0xff] }
   0xf   :  { %181 = vst [vmem:[%s472_s6 + $0x10] sm:$0xff] %v165_v57  ;;  %v55_v10 = vmul.f32 %v244_v1, %v32_v55  ;;  %182 = vst [vmem:[%s472_s6 + $0x18] sm:$0xff] %v166_v61  ;;  %v168_v13 = vmax.f32 %v152_v62, 0.0  ;;  %v153_v14 = vadd.f32 %v264_v7, %v130_v63  ;;  %v131_v15 = vadd.f32 %v115_v59, %v76_v0 }
  0x10   :  { %v167_v6 = vmax.f32 %v151_v58, 0.0  ;;  %v117_v16 = vmul.f32 %v258_v5, %v94_v60  ;;  %v77_v18 = vadd.f32 %v249_v2, %v54_v8  ;;  %v56_v20 = vmul.f32 %v244_v1, %v33_v3 }
  0x11   :  { %v78_v19 = vadd.f32 %v249_v2, %v55_v10  ;;  %v118_v21 = vmul.f32 %v258_v5, %v95_v4  ;;  %184 = vst [vmem:[%s472_s6 + $0x28] sm:$0xff] %v168_v13  ;;  %v169_v24 = vmax.f32 %v153_v14, 0.0  ;;  %v154_v25 = vadd.f32 %v264_v7, %v131_v15 }
  0x12   :  { %183 = vst [vmem:[%s472_s6 + $0x20] sm:$0xff] %v167_v6  ;;  %v57_v26 = vmul.f32 %v244_v1, %v34_v11  ;;  %v119_v27 = vmul.f32 %v258_v5, %v96_v12  ;;  %v132_v28 = vadd.f32 %v116_v9, %v77_v18  ;;  %v79_v30 = vadd.f32 %v249_v2, %v56_v20 }
  0x13   :  { %v133_v29 = vadd.f32 %v117_v16, %v78_v19  ;;  %v58_v31 = vmul.f32 %v244_v1, %v35_v17  ;;  %185 = vst [vmem:[%s472_s6 + $0x30] sm:$0xff] %v169_v24  ;;  %v170_v34 = vmax.f32 %v154_v25, 0.0  ;;  %v120_v36 = vmul.f32 %v258_v5, %v97_v22 }
  0x14   :  { %v80_v35 = vadd.f32 %v249_v2, %v57_v26  ;;  %v59_v37 = vmul.f32 %v244_v1, %v36_v23  ;;  %v155_v38 = vadd.f32 %v264_v7, %v132_v28  ;;  %v134_v40 = vadd.f32 %v118_v21, %v79_v30 }
  0x15   :  { %v156_v39 = vadd.f32 %v264_v7, %v133_v29  ;;  %v81_v41 = vadd.f32 %v249_v2, %v58_v31  ;;  %186 = vst [vmem:[%s472_s6 + $0x38] sm:$0xff] %v170_v34  ;;  %v121_v45 = vmul.f32 %v258_v5, %v98_v32  ;;  %v60_v46 = vmul.f32 %v244_v1, %v37_v33 }
  0x16   :  { %v135_v43 = vadd.f32 %v119_v27, %v80_v35  ;;  %v82_v44 = vadd.f32 %v249_v2, %v59_v37  ;;  %v171_v49 = vmax.f32 %v155_v38, 0.0  ;;  %v157_v51 = vadd.f32 %v264_v7, %v134_v40 }
  0x17   :  { %v172_v50 = vmax.f32 %v156_v39, 0.0  ;;  %v136_v52 = vadd.f32 %v120_v36, %v81_v41  ;;  %v83_v55 = vadd.f32 %v249_v2, %v60_v46  ;;  %v122_v56 = vmul.f32 %v258_v5, %v99_v42 }
  0x18   :  { %v158_v53 = vadd.f32 %v264_v7, %v135_v43  ;;  %v137_v54 = vadd.f32 %v121_v45, %v82_v44  ;;  %187 = vst [vmem:[%s472_s6 + $0x40] sm:$0xff] %v171_v49  ;;  %v173_v57 = vmax.f32 %v157_v51, 0.0  ;;  %v61_v59 = vmul.f32 %v244_v1, %v38_v47 }
  0x19   :  { %188 = vst [vmem:[%s472_s6 + $0x48] sm:$0xff] %v172_v50  ;;  %v159_v58 = vadd.f32 %v264_v7, %v136_v52  ;;  %v123_v60 = vmul.f32 %v258_v5, %v100_v48  ;;  %v138_v63 = vadd.f32 %v122_v56, %v83_v55 }
  0x1a   :  { %v174_v61 = vmax.f32 %v158_v53, 0.0  ;;  %v160_v62 = vadd.f32 %v264_v7, %v137_v54  ;;  %189 = vst [vmem:[%s472_s6 + $0x50] sm:$0xff] %v173_v57  ;;  %v84_v3 = vadd.f32 %v249_v2, %v61_v59 }
  0x1b   :  { %v175_v0 = vmax.f32 %v159_v58, 0.0  ;;  %v161_v1 = vadd.f32 %v264_v7, %v138_v63 }
  0x1c   :  { %190 = vst [vmem:[%s472_s6 + $0x58] sm:$0xff] %v174_v61  ;;  %v176_v4 = vmax.f32 %v160_v62, 0.0  ;;  %v139_v5 = vadd.f32 %v123_v60, %v84_v3 }
  0x1d   :  { %191 = vst [vmem:[%s472_s6 + $0x60] sm:$0xff] %v175_v0  ;;  %v177_v6 = vmax.f32 %v161_v1, 0.0 }
  0x1e   :  { %192 = vst [vmem:[%s472_s6 + $0x68] sm:$0xff] %v176_v4  ;;  %v162_v8 = vadd.f32 %v264_v7, %v139_v5 }
  0x1f   :  { %193 = vst [vmem:[%s472_s6 + $0x70] sm:$0xff] %v177_v6 }
  0x20   :  { %v178_v2 = vmax.f32 %v162_v8, 0.0 }
  0x22   :  { %194 = vst [vmem:[%s472_s6 + $0x78] sm:$0xff] %v178_v2 }

// kernel: residual_block_forward.6
= control target key start
LH: loop header
LB: loop body
LE: loop exit
PB: predicated region body
PF: predicated region fallthrough
CT: control target
= control target key end

     0   :  { %v167_v47 = vlaneseq  ;;  %s3989_s3 = inlined_call_operand.vmem [shape: f32[1152,128], index: 3, kind: input, shape index: {}]   ;;  %s3990_s0 = inlined_call_operand.vmem [shape: f32[128,1152], index: 0, kind: input, shape index: {}]   ;;  %s3991_s1 = inlined_call_operand.vmem [shape: f32[1,1152], index: 1, kind: input, shape index: {}]   ;;  %s3992_s2 = inlined_call_operand.vmem [shape: f32[1,1152], index: 2, kind: input, shape index: {}]   ;;  %s3993_s4 = inlined_call_operand.vmem [shape: f32[128,128], index: 4, kind: output, shape index: {0}]   ;;  %s3994_s5 = inlined_call_operand.vmem [shape: f32[8,128], index: 5, kind: output, shape index: {1}]  }
   0x1   :  { %v709_v0 = vld [vmem:[%s3989_s3 + $0x80] sm:$0xff]  ;;  %v710_v1 = vld [vmem:[%s3989_s3 + $0x88] sm:$0xff]  ;;  %v711_v11 = vld [vmem:[%s3989_s3 + $0x90] sm:$0xff] }
   0x2   :  { %v741_v2 = vld [vmem:[%s3989_s3 + $0x180] sm:$0xff]  ;;  %v2061_v3 = vpack.c.bf16 %v710_v1, %v709_v0  ;;  %v742_v4 = vld [vmem:[%s3989_s3 + $0x188] sm:$0xff]  ;;  %v712_v13 = vld [vmem:[%s3989_s3 + $0x98] sm:$0xff]  ;;  %v2393_v61 = vshrl.u32 %v167_v47, 7 }
   0x3   :  { %v693_v5 = vld [vmem:[%s3989_s3] sm:$0xff]  ;;  %v694_v6 = vld [vmem:[%s3989_s3 + $0x8] sm:$0xff]  ;;  %v2093_v7 = vpack.c.bf16 %v742_v4, %v741_v2  ;;  %v743_v14 = vld [vmem:[%s3989_s3 + $0x190] sm:$0xff]  ;;  %v2065_v16 = vpack.c.bf16 %v712_v13, %v711_v11 }
   0x4   :  { %v2063_v8 = vpack.c.bf16 %v694_v6, %v693_v5  ;;  %v725_v9 = vld [vmem:[%s3989_s3 + $0x100] sm:$0xff]  ;;  %v726_v10 = vld [vmem:[%s3989_s3 + $0x108] sm:$0xff]  ;;  %2062 = vmatprep.subr.bf16.mxu0 %v2061_v3  ;;  %v744_v15 = vld [vmem:[%s3989_s3 + $0x198] sm:$0xff]  ;;  %vm1639_vm0 = vcmp.eq.s32.totalorder %v2393_v61, 1  ;;  %vm1638_vm1 = vcmp.eq.s32.totalorder %v2393_v61, 0 }
   0x5   :  { %v2095_v12 = vpack.c.bf16 %v726_v10, %v725_v9  ;;  %2094 = vmatprep.subr.bf16.mxu1 %v2093_v7  ;;  %v2097_v17 = vpack.c.bf16 %v744_v15, %v743_v14  ;;  %v695_v18 = vld [vmem:[%s3989_s3 + $0x10] sm:$0xff]  ;;  %v696_v19 = vld [vmem:[%s3989_s3 + $0x18] sm:$0xff]  ;;  %v713_v23 = vld [vmem:[%s3989_s3 + $0xa0] sm:$0xff]  ;;  %v173_v14 = vsub.s32 1, %v2393_v61  ;;  %v181_v15 = vsub.s32 3, %v2393_v61 }
   0x6   :  { %2064 = vmatpush3.bf16.msra.mxu0 %v2063_v8  ;;  %v727_v20 = vld [vmem:[%s3989_s3 + $0x110] sm:$0xff]  ;;  %v2067_v21 = vpack.c.bf16 %v696_v19, %v695_v18  ;;  %v728_v22 = vld [vmem:[%s3989_s3 + $0x118] sm:$0xff]  ;;  %v714_v24 = vld [vmem:[%s3989_s3 + $0xa8] sm:$0xff]  ;;  %v177_v19 = vsub.s32 2, %v2393_v61 }
   0x7   :  { %2096 = vmatpush3.bf16.msra.mxu1 %v2095_v12  ;;  %2066 = vmatprep.subr.bf16.mxu0 %v2065_v16  ;;  %v2099_v25 = vpack.c.bf16 %v728_v22, %v727_v20  ;;  %v2069_v26 = vpack.c.bf16 %v714_v24, %v713_v23  ;;  %v745_v27 = vld [vmem:[%s3989_s3 + $0x1a0] sm:$0xff]  ;;  %v746_v28 = vld [vmem:[%s3989_s3 + $0x1a8] sm:$0xff]  ;;  %v715_v35 = vld [vmem:[%s3989_s3 + $0xb0] sm:$0xff]  ;;  %v169_v16 = vsub.s32 0, %v2393_v61 }
   0x8   :  { %2098 = vmatprep.subr.bf16.mxu1 %v2097_v17  ;;  %v697_v29 = vld [vmem:[%s3989_s3 + $0x20] sm:$0xff]  ;;  %v2101_v30 = vpack.c.bf16 %v746_v28, %v745_v27  ;;  %v698_v31 = vld [vmem:[%s3989_s3 + $0x28] sm:$0xff]  ;;  %v716_v36 = vld [vmem:[%s3989_s3 + $0xb8] sm:$0xff] }
   0x9   :  { %v729_v32 = vld [vmem:[%s3989_s3 + $0x120] sm:$0xff]  ;;  %v730_v33 = vld [vmem:[%s3989_s3 + $0x128] sm:$0xff]  ;;  %v2071_v34 = vpack.c.bf16 %v698_v31, %v697_v29  ;;  %v747_v37 = vld [vmem:[%s3989_s3 + $0x1b0] sm:$0xff]  ;;  %v2073_v39 = vpack.c.bf16 %v716_v36, %v715_v35 }
   0xa   :  { %2068 = vmatpush3.bf16.msra.mxu0 %v2067_v21  ;;  %v2103_v38 = vpack.c.bf16 %v730_v33, %v729_v32  ;;  %v748_v40 = vld [vmem:[%s3989_s3 + $0x1b8] sm:$0xff]  ;;  %v699_v41 = vld [vmem:[%s3989_s3 + $0x30] sm:$0xff]  ;;  %v717_v46 = vld [vmem:[%s3989_s3 + $0xc0] sm:$0xff] }
   0xb   :  { %2100 = vmatpush3.bf16.msra.mxu1 %v2099_v25  ;;  %2070 = vmatprep.subr.bf16.mxu0 %v2069_v26  ;;  %v700_v42 = vld [vmem:[%s3989_s3 + $0x38] sm:$0xff]  ;;  %v2105_v43 = vpack.c.bf16 %v748_v40, %v747_v37  ;;  %v731_v44 = vld [vmem:[%s3989_s3 + $0x130] sm:$0xff]  ;;  %v718_v48 = vld [vmem:[%s3989_s3 + $0xc8] sm:$0xff] }
   0xc   :  { %2102 = vmatprep.subr.bf16.mxu1 %v2101_v30  ;;  %v732_v45 = vld [vmem:[%s3989_s3 + $0x138] sm:$0xff]  ;;  %v749_v49 = vld [vmem:[%s3989_s3 + $0x1c0] sm:$0xff]  ;;  %v750_v50 = vld [vmem:[%s3989_s3 + $0x1c8] sm:$0xff]  ;;  %v2075_v51 = vpack.c.bf16 %v700_v42, %v699_v41  ;;  %v2077_v53 = vpack.c.bf16 %v718_v48, %v717_v46 }
   0xd   :  { %v2107_v52 = vpack.c.bf16 %v732_v45, %v731_v44  ;;  %v701_v54 = vld [vmem:[%s3989_s3 + $0x40] sm:$0xff]  ;;  %v702_v55 = vld [vmem:[%s3989_s3 + $0x48] sm:$0xff]  ;;  %v2109_v57 = vpack.c.bf16 %v750_v50, %v749_v49  ;;  %v719_v59 = vld [vmem:[%s3989_s3 + $0xd0] sm:$0xff] }
   0xe   :  { %2072 = vmatpush3.bf16.msra.mxu0 %v2071_v34  ;;  %v733_v56 = vld [vmem:[%s3989_s3 + $0x140] sm:$0xff]  ;;  %v734_v58 = vld [vmem:[%s3989_s3 + $0x148] sm:$0xff]  ;;  %v720_v60 = vld [vmem:[%s3989_s3 + $0xd8] sm:$0xff]  ;;  %v2079_v1 = vpack.c.bf16 %v702_v55, %v701_v54 }
   0xf   :  { %2104 = vmatpush3.bf16.msra.mxu1 %v2103_v38  ;;  %2074 = vmatprep.subr.bf16.mxu0 %v2073_v39  ;;  %v751_v62 = vld [vmem:[%s3989_s3 + $0x1d0] sm:$0xff]  ;;  %v752_v63 = vld [vmem:[%s3989_s3 + $0x1d8] sm:$0xff]  ;;  %v2111_v5 = vpack.c.bf16 %v734_v58, %v733_v56  ;;  %v2081_v6 = vpack.c.bf16 %v720_v60, %v719_v59  ;;  %v721_v7 = vld [vmem:[%s3989_s3 + $0xe0] sm:$0xff] }
  0x10   :  { %2106 = vmatprep.subr.bf16.mxu1 %v2105_v43  ;;  %v703_v0 = vld [vmem:[%s3989_s3 + $0x50] sm:$0xff]  ;;  %v704_v2 = vld [vmem:[%s3989_s3 + $0x58] sm:$0xff]  ;;  %v722_v8 = vld [vmem:[%s3989_s3 + $0xe8] sm:$0xff]  ;;  %v2113_v10 = vpack.c.bf16 %v752_v63, %v751_v62 }
  0x11   :  { %v735_v3 = vld [vmem:[%s3989_s3 + $0x150] sm:$0xff]  ;;  %v736_v4 = vld [vmem:[%s3989_s3 + $0x158] sm:$0xff]  ;;  %v753_v9 = vld [vmem:[%s3989_s3 + $0x1e0] sm:$0xff]  ;;  %v2083_v20 = vpack.c.bf16 %v704_v2, %v703_v0  ;;  %v2085_v25 = vpack.c.bf16 %v722_v8, %v721_v7 }
  0x12   :  { %2076 = vmatpush3.bf16.msra.mxu0 %v2075_v51  ;;  %v754_v11 = vld [vmem:[%s3989_s3 + $0x1e8] sm:$0xff]  ;;  %v2428_v12 = vld [vmem:[%s3989_s3 + $0x60] sm:$0xff]  ;;  %v2115_v21 = vpack.c.bf16 %v736_v4, %v735_v3  ;;  %v2452_v22 = vld [vmem:[%s3989_s3 + $0xf0] sm:$0xff] }
  0x13   :  { %2108 = vmatpush3.bf16.msra.mxu1 %v2107_v52  ;;  %2078 = vmatprep.subr.bf16.mxu0 %v2077_v53  ;;  %v2433_v13 = vld [vmem:[%s3989_s3 + $0x68] sm:$0xff]  ;;  %v2441_v17 = vld [vmem:[%s3989_s3 + $0x160] sm:$0xff]  ;;  %v724_v23 = vld [vmem:[%s3989_s3 + $0xf8] sm:$0xff]  ;;  %v2117_v26 = vpack.c.bf16 %v754_v11, %v753_v9 }
  0x14   :  { %2110 = vmatprep.subr.bf16.mxu1 %v2109_v57  ;;  %v2446_v18 = vld [vmem:[%s3989_s3 + $0x168] sm:$0xff]  ;;  %v2460_v24 = vld [vmem:[%s3989_s3 + $0x1f0] sm:$0xff]  ;;  %v2087_v27 = vpack.c.bf16 %v2433_v13, %v2428_v12  ;;  %v756_v28 = vld [vmem:[%s3989_s3 + $0x1f8] sm:$0xff]  ;;  %v2089_v52 = vpack.c.bf16 %v724_v23, %v2452_v22 }
  0x15   :  { %v20_v29 = vld [vmem:[%s3990_s0 + $0x8] sm:$0xff]  ;;  %v2473_v30 = vld [vmem:[%s3991_s1] sm:$0xff]  ;;  %v2119_v31 = vpack.c.bf16 %v2446_v18, %v2441_v17  ;;  %v22_v34 = vld [vmem:[%s3990_s0 + $0x18] sm:$0xff]  ;;  %v2121_v53 = vpack.c.bf16 %v756_v28, %v2460_v24 }
  0x16   :  { %2080 = vmatpush3.bf16.msra.mxu0 %v2079_v1  ;;  %v2478_v32 = vrot.slane %v2473_v30, %v173_v14  ;;  %v2483_v33 = vld [vmem:[%s3992_s2] sm:$0xff]  ;;  %v2489_v35 = vrot.slane %v2473_v30, %v181_v15  ;;  %v2495_v37 = vrot.slane %v2473_v30, %v169_v16  ;;  %v2500_v38 = vld [vmem:[%s3989_s3 + $0x70] sm:$0xff]  ;;  %v2505_v39 = vld [vmem:[%s3989_s3 + $0x78] sm:$0xff]  ;;  %v2520_v44 = vrot.slane %v2473_v30, %v177_v19 }
  0x17   :  { %2112 = vmatpush3.bf16.msra.mxu1 %v2111_v5  ;;  %2082 = vmatprep.subr.bf16.mxu0 %v2081_v6  ;;  %v19_v36 = vld [vmem:[%s3990_s0] sm:$0xff]  ;;  %v2508_v40 = vrot.slane %v2483_v33, %v173_v14  ;;  %v2511_v41 = vrot.slane %v2483_v33, %v181_v15  ;;  %v2514_v42 = vrot.slane %v2483_v33, %v169_v16  ;;  %v21_v43 = vld [vmem:[%s3990_s0 + $0x10] sm:$0xff]  ;;  %v740_v46 = vld [vmem:[%s3989_s3 + $0x178] sm:$0xff] }
  0x18   :  { %2114 = vmatprep.subr.bf16.mxu1 %v2113_v10  ;;  %v739_v45 = vld [vmem:[%s3989_s3 + $0x170] sm:$0xff]  ;;  %v213_v47 = vmul.f32 %v2478_v32, %v20_v29  ;;  %v215_v48 = vmul.f32 %v2489_v35, %v22_v34  ;;  %v212_v49 = vmul.f32 %v2495_v37, %v19_v36  ;;  %v2532_v50 = vrot.slane %v2483_v33, %v177_v19  ;;  %v31_v55 = vld [vmem:[%s3990_s0 + $0x60] sm:$0xff]  ;;  %v28_v56 = vld [vmem:[%s3990_s0 + $0x48] sm:$0xff] }
  0x19   :  { %v29_v51 = vld [vmem:[%s3990_s0 + $0x50] sm:$0xff]  ;;  %v214_v54 = vmul.f32 %v2520_v44, %v21_v43  ;;  %v30_v57 = vld [vmem:[%s3990_s0 + $0x58] sm:$0xff]  ;;  %v2091_v58 = vpack.c.bf16 %v2505_v39, %v2500_v38  ;;  %v773_v62 = vld [vmem:[%s3989_s3 + $0x280] sm:$0xff]  ;;  %v224_v2 = vmul.f32 %v2489_v35, %v31_v55  ;;  %v221_v3 = vmul.f32 %v2495_v37, %v28_v56 }
  0x1a   :  { %2084 = vmatpush3.bf16.msra.mxu0 %v2083_v20  ;;  %v406_v59 = vadd.f32 %v2508_v40, %v213_v47  ;;  %v408_v60 = vadd.f32 %v2511_v41, %v215_v48  ;;  %v774_v63 = vld [vmem:[%s3989_s3 + $0x288] sm:$0xff]  ;;  %v222_v0 = vmul.f32 %v2478_v32, %v29_v51  ;;  %v405_v1 = vadd.f32 %v2514_v42, %v212_v49  ;;  %v38_v5 = vld [vmem:[%s3990_s0 + $0x98] sm:$0xff]  ;;  %v37_v7 = vld [vmem:[%s3990_s0 + $0x90] sm:$0xff] }
  0x1b   :  { %2116 = vmatpush3.bf16.msra.mxu1 %v2115_v21  ;;  %2086 = vmatprep.subr.bf16.mxu0 %v2085_v25  ;;  %v223_v4 = vmul.f32 %v2520_v44, %v30_v57  ;;  %v40_v6 = vld [vmem:[%s3990_s0 + $0xa8] sm:$0xff]  ;;  %v2123_v8 = vpack.c.bf16 %v740_v46, %v739_v45  ;;  %v407_v11 = vadd.f32 %v2532_v50, %v214_v54  ;;  %v39_v12 = vld [vmem:[%s3990_s0 + $0xa0] sm:$0xff]  ;;  %v49_v28 = vld [vmem:[%s3990_s0 + $0xf0] sm:$0xff] }
  0x1c   :  { %2118 = vmatprep.subr.bf16.mxu1 %v2117_v26  ;;  %v550_v9 = vmax.f32 %v406_v59, 0.0  ;;  %v552_v10 = vmax.f32 %v408_v60, 0.0  ;;  %v2125_v13 = vpack.c.bf16 %v774_v63, %v773_v62  ;;  %v757_v14 = vld [vmem:[%s3989_s3 + $0x200] sm:$0xff]  ;;  %v758_v15 = vld [vmem:[%s3989_s3 + $0x208] sm:$0xff]  ;;  %v415_v16 = vadd.f32 %v2508_v40, %v222_v0  ;;  %v775_v26 = vld [vmem:[%s3989_s3 + $0x290] sm:$0xff] }
  0x1d   :  { %v417_v17 = vadd.f32 %v2511_v41, %v224_v2  ;;  %v231_v18 = vmul.f32 %v2478_v32, %v38_v5  ;;  %v233_v19 = vmul.f32 %v2489_v35, %v40_v6  ;;  %v230_v20 = vmul.f32 %v2495_v37, %v37_v7  ;;  %v47_v21 = vld [vmem:[%s3990_s0 + $0xe0] sm:$0xff]  ;;  %v46_v36 = vld [vmem:[%s3990_s0 + $0xd8] sm:$0xff]  ;;  %v48_v38 = vld [vmem:[%s3990_s0 + $0xe8] sm:$0xff] }
  0x1e   :  { %2088 = vmatpush3.bf16.msra.mxu0 %v2087_v27  ;;  %901 = vmatprep.mubr.f32.mxu0 %v550_v9  ;;  %v549_v22 = vmax.f32 %v405_v1, 0.0  ;;  %v414_v23 = vadd.f32 %v2514_v42, %v221_v3  ;;  %v2593_v24 = vadd.f32 %v2532_v50, %v223_v4  ;;  %v232_v25 = vmul.f32 %v2520_v44, %v39_v12  ;;  %v776_v27 = vld [vmem:[%s3989_s3 + $0x298] sm:$0xff]  ;;  %v56_v47 = vld [vmem:[%s3990_s0 + $0x128] sm:$0xff]  ;;  %v55_v56 = vld [vmem:[%s3990_s0 + $0x120] sm:$0xff] }
  0x1f   :  { %2120 = vmatpush3.bf16.msra.mxu1 %v2119_v31  ;;  %2090 = vmatprep.subr.bf16.mxu0 %v2089_v52  ;;  %v551_v29 = vmax.f32 %v407_v11, 0.0  ;;  %v2127_v31 = vpack.c.bf16 %v758_v15, %v757_v14  ;;  %v424_v34 = vadd.f32 %v2508_v40, %v231_v18  ;;  %v559_v39 = vmax.f32 %v415_v16, 0.0  ;;  %v58_v48 = vld [vmem:[%s3990_s0 + $0x138] sm:$0xff]  ;;  %v57_v62 = vld [vmem:[%s3990_s0 + $0x130] sm:$0xff]  ;;  %v777_v3 = vld [vmem:[%s3989_s3 + $0x2a0] sm:$0xff] }
  0x20   :  { %2122 = vmatprep.subr.bf16.mxu1 %v2121_v53  ;;  %1046 = vmatprep.mubr.f32.mxu1 %v552_v10  ;;  %v561_v43 = vmax.f32 %v417_v17, 0.0  ;;  %v426_v45 = vadd.f32 %v2511_v41, %v233_v19  ;;  %v240_v46 = vmul.f32 %v2478_v32, %v47_v21  ;;  %v2621_v49 = vadd.f32 %v2514_v42, %v230_v20  ;;  %v759_v53 = vld [vmem:[%s3989_s3 + $0x210] sm:$0xff]  ;;  %v760_v54 = vld [vmem:[%s3989_s3 + $0x218] sm:$0xff]  ;;  %v778_v4 = vld [vmem:[%s3989_s3 + $0x2a8] sm:$0xff] }
  0x21   :  { %v2624_v51 = vadd.f32 %v2532_v50, %v232_v25  ;;  %v2129_v52 = vpack.c.bf16 %v776_v27, %v775_v26  ;;  %v242_v55 = vmul.f32 %v2489_v35, %v49_v28  ;;  %v558_v57 = vmax.f32 %v414_v23, 0.0  ;;  %v805_v5 = vld [vmem:[%s3989_s3 + $0x380] sm:$0xff]  ;;  %v806_v10 = vld [vmem:[%s3989_s3 + $0x388] sm:$0xff]  ;;  %v65_v18 = vld [vmem:[%s3990_s0 + $0x170] sm:$0xff] }
  0x22   :  { %2092 = vmatpush3.bf16.msra.mxu0 %v2091_v58  ;;  %v560_v58 = vmax.f32 %v2593_v24, 0.0  ;;  %v239_v59 = vmul.f32 %v2495_v37, %v46_v36  ;;  %v241_v60 = vmul.f32 %v2520_v44, %v48_v38  ;;  %v568_v63 = vmax.f32 %v424_v34, 0.0  ;;  %v761_v11 = vld [vmem:[%s3989_s3 + $0x220] sm:$0xff]  ;;  %v762_v12 = vld [vmem:[%s3989_s3 + $0x228] sm:$0xff] }
  0x23   :  { %2124 = vmatpush3.bf16.msra.mxu1 %v2123_v8  ;;  %2126 = vmatprep.subr.bf16.mxu0 %v2125_v13  ;;  %v433_v0 = vadd.f32 %v2508_v40, %v240_v46  ;;  %v249_v1 = vmul.f32 %v2478_v32, %v56_v47  ;;  %v251_v2 = vmul.f32 %v2489_v35, %v58_v48  ;;  %v570_v6 = vmax.f32 %v426_v45, 0.0  ;;  %v789_v16 = vld [vmem:[%s3989_s3 + $0x300] sm:$0xff]  ;;  %v790_v17 = vld [vmem:[%s3989_s3 + $0x308] sm:$0xff]  ;;  %v73_v48 = vld [vmem:[%s3990_s0 + $0x1b0] sm:$0xff] }
  0x24   :  { %v2131_v7 = vpack.c.bf16 %v760_v54, %v759_v53  ;;  %v435_v8 = vadd.f32 %v2511_v41, %v242_v55  ;;  %v248_v9 = vmul.f32 %v2495_v37, %v55_v56  ;;  %v567_v13 = vmax.f32 %v2621_v49, 0.0  ;;  %v67_v23 = vld [vmem:[%s3990_s0 + $0x180] sm:$0xff]  ;;  %v64_v24 = vld [vmem:[%s3990_s0 + $0x168] sm:$0xff]  ;;  %v779_v55 = vld [vmem:[%s3989_s3 + $0x2b0] sm:$0xff] }
  0x25   :  { %902 = vmatmul.mubr.f32.vlgmr.msra.gmra.mrb[0].mxu0 %v549_v22  ;;  %v569_v14 = vmax.f32 %v2624_v51, 0.0  ;;  %v250_v15 = vmul.f32 %v2520_v44, %v57_v62  ;;  %v432_v19 = vadd.f32 %v2514_v42, %v239_v59  ;;  %v2679_v20 = vadd.f32 %v2532_v50, %v241_v60  ;;  %v76_v34 = vld [vmem:[%s3990_s0 + $0x1c8] sm:$0xff]  ;;  %v75_v54 = vld [vmem:[%s3990_s0 + $0x1c0] sm:$0xff]  ;;  %v780_v59 = vld [vmem:[%s3989_s3 + $0x2b8] sm:$0xff] }
  0x26   :  { %1047 = vmatmul.mubr.f32.vlgmr.msra.gmra.mrb[0].mxu1 %v551_v29  ;;  %2128 = vmatpush3.bf16.msra.mxu0 %v2127_v31  ;;  %v2682_v21 = vadd.f32 %v2508_v40, %v249_v1  ;;  %v2133_v22 = vpack.c.bf16 %v778_v4, %v777_v3  ;;  %v577_v25 = vmax.f32 %v433_v0, 0.0  ;;  %v2691_v26 = vadd.f32 %v2511_v41, %v251_v2  ;;  %v66_v29 = vld [vmem:[%s3990_s0 + $0x178] sm:$0xff]  ;;  %v807_v60 = vld [vmem:[%s3989_s3 + $0x390] sm:$0xff] }
  0x27   :  { %906 = vmatprep.mubr.f32.mxu0 %v559_v39  ;;  %1051 = vmatprep.mubr.f32.mxu1 %v561_v43  ;;  %v2694_v27 = vadd.f32 %v2514_v42, %v248_v9  ;;  %v2157_v28 = vpack.c.bf16 %v806_v10, %v805_v5  ;;  %v74_v31 = vld [vmem:[%s3990_s0 + $0x1b8] sm:$0xff]  ;;  %v579_v36 = vmax.f32 %v435_v8, 0.0  ;;  %v2135_v38 = vpack.c.bf16 %v762_v12, %v761_v11  ;;  %v763_v2 = vld [vmem:[%s3989_s3 + $0x230] sm:$0xff]  ;;  %v83_v10 = vld [vmem:[%s3990_s0 + $0x200] sm:$0xff] }
  0x28   :  { %2130 = vmatprep.subr.bf16.mxu0 %v2129_v52  ;;  %v2159_v39 = vpack.c.bf16 %v790_v17, %v789_v16  ;;  %v258_v43 = vmul.f32 %v2478_v32, %v65_v18  ;;  %v2707_v45 = vadd.f32 %v2532_v50, %v250_v15  ;;  %v260_v46 = vmul.f32 %v2489_v35, %v67_v23  ;;  %v808_v62 = vld [vmem:[%s3989_s3 + $0x398] sm:$0xff]  ;;  %v791_v4 = vld [vmem:[%s3989_s3 + $0x310] sm:$0xff]  ;;  %v84_v17 = vld [vmem:[%s3990_s0 + $0x208] sm:$0xff] }
  0x29   :  { %907 = vmatmul.mubr.f32.gmra.mrb[2].mxu0 %v558_v57  ;;  %2158 = vmatprep.subr.bf16.mxu1 %v2157_v28  ;;  %v257_v47 = vmul.f32 %v2495_v37, %v64_v24  ;;  %v576_v49 = vmax.f32 %v432_v19, 0.0  ;;  %v259_v51 = vmul.f32 %v2520_v44, %v66_v29  ;;  %v267_v52 = vmul.f32 %v2478_v32, %v74_v31  ;;  %v764_v3 = vld [vmem:[%s3989_s3 + $0x238] sm:$0xff]  ;;  %v85_v11 = vld [vmem:[%s3990_s0 + $0x210] sm:$0xff] }
  0x2a   :  { %1052 = vmatmul.mubr.f32.gmra.mrb[2].mxu1 %v560_v58  ;;  %911 = vmatprep.mubr.f32.mxu0 %v568_v63  ;;  %v269_v53 = vmul.f32 %v2489_v35, %v76_v34  ;;  %v578_v56 = vmax.f32 %v2679_v20, 0.0  ;;  %v586_v57 = vmax.f32 %v2682_v21, 0.0  ;;  %v451_v58 = vadd.f32 %v2508_v40, %v258_v43  ;;  %v792_v9 = vld [vmem:[%s3989_s3 + $0x318] sm:$0xff]  ;;  %v91_v34 = vld [vmem:[%s3990_s0 + $0x240] sm:$0xff]  ;;  %v93_v43 = vld [vmem:[%s3990_s0 + $0x250] sm:$0xff] }
  0x2b   :  { %1056 = vmatprep.mubr.f32.mxu1 %v570_v6  ;;  %2132 = vmatpush3.bf16.msra.mxu0 %v2131_v7  ;;  %v588_v63 = vmax.f32 %v2691_v26, 0.0  ;;  %v453_v0 = vadd.f32 %v2511_v41, %v260_v46  ;;  %v266_v1 = vmul.f32 %v2495_v37, %v73_v48  ;;  %v585_v5 = vmax.f32 %v2694_v27, 0.0  ;;  %v82_v16 = vld [vmem:[%s3990_s0 + $0x1f8] sm:$0xff]  ;;  %v782_v46 = vld [vmem:[%s3989_s3 + $0x2c8] sm:$0xff] }
  0x2c   :  { %2134 = vmatprep.subr.bf16.mxu0 %v2133_v22  ;;  %2160 = vmatpush3.bf16.msra.mxu1 %v2159_v39  ;;  %v587_v6 = vmax.f32 %v2707_v45, 0.0  ;;  %v450_v7 = vadd.f32 %v2514_v42, %v257_v47  ;;  %v268_v8 = vmul.f32 %v2520_v44, %v75_v54  ;;  %v2761_v12 = vadd.f32 %v2532_v50, %v259_v51  ;;  %v92_v22 = vld [vmem:[%s3990_s0 + $0x248] sm:$0xff]  ;;  %v94_v23 = vld [vmem:[%s3990_s0 + $0x258] sm:$0xff]  ;;  %v781_v45 = vld [vmem:[%s3989_s3 + $0x2c0] sm:$0xff] }
  0x2d   :  { %912 = vmatmul.mubr.f32.gmra.mrb[4].mxu0 %v567_v13  ;;  %v2764_v13 = vadd.f32 %v2508_v40, %v267_v52  ;;  %v2137_v15 = vpack.c.bf16 %v780_v59, %v779_v55  ;;  %v595_v18 = vmax.f32 %v451_v58, 0.0  ;;  %v2776_v19 = vadd.f32 %v2514_v42, %v266_v1  ;;  %v809_v51 = vld [vmem:[%s3989_s3 + $0x3a0] sm:$0xff]  ;;  %v810_v52 = vld [vmem:[%s3989_s3 + $0x3a8] sm:$0xff] }
  0x2e   :  { %1057 = vmatmul.mubr.f32.gmra.mrb[4].mxu1 %v569_v14  ;;  %916 = vmatprep.mubr.f32.mxu0 %v577_v25  ;;  %v2767_v14 = vadd.f32 %v2511_v41, %v269_v53  ;;  %v2161_v20 = vpack.c.bf16 %v808_v62, %v807_v60  ;;  %v2139_v21 = vpack.c.bf16 %v764_v3, %v763_v2  ;;  %v597_v24 = vmax.f32 %v453_v0, 0.0  ;;  %v765_v53 = vld [vmem:[%s3989_s3 + $0x240] sm:$0xff]  ;;  %v766_v58 = vld [vmem:[%s3989_s3 + $0x248] sm:$0xff]  ;;  %v101_v2 = vld [vmem:[%s3990_s0 + $0x290] sm:$0xff] }
  0x2f   :  { %1061 = vmatprep.mubr.f32.mxu1 %v579_v36  ;;  %2136 = vmatpush3.bf16.msra.mxu0 %v2135_v38  ;;  %v2163_v25 = vpack.c.bf16 %v792_v9, %v791_v4  ;;  %v276_v26 = vmul.f32 %v2478_v32, %v83_v10  ;;  %v278_v27 = vmul.f32 %v2489_v35, %v85_v11  ;;  %v594_v36 = vmax.f32 %v450_v7, 0.0  ;;  %v793_v59 = vld [vmem:[%s3989_s3 + $0x320] sm:$0xff]  ;;  %v794_v60 = vld [vmem:[%s3989_s3 + $0x328] sm:$0xff]  ;;  %v102_v9 = vld [vmem:[%s3990_s0 + $0x298] sm:$0xff] }
  0x30   :  { %2138 = vmatprep.subr.bf16.mxu0 %v2137_v15  ;;  %v2787_v28 = vadd.f32 %v2532_v50, %v268_v8  ;;  %2162 = vmatprep.subr.bf16.mxu1 %v2161_v20  ;;  %v275_v29 = vmul.f32 %v2495_v37, %v82_v16  ;;  %v277_v31 = vmul.f32 %v2520_v44, %v84_v17  ;;  %v596_v47 = vmax.f32 %v2761_v12, 0.0  ;;  %v103_v3 = vld [vmem:[%s3990_s0 + $0x2a0] sm:$0xff]  ;;  %v100_v8 = vld [vmem:[%s3990_s0 + $0x288] sm:$0xff]  ;;  %v110_v10 = vld [vmem:[%s3990_s0 + $0x2d8] sm:$0xff] }
  0x31   :  { %917 = vmatmul.mubr.f32.gmra.mrb[6].mxu0 %v576_v49  ;;  %2164 = vmatpush3.bf16.msra.mxu1 %v2163_v25  ;;  %v285_v38 = vmul.f32 %v2478_v32, %v92_v22  ;;  %v287_v39 = vmul.f32 %v2489_v35, %v94_v23  ;;  %v604_v48 = vmax.f32 %v2764_v13, 0.0  ;;  %v469_v49 = vadd.f32 %v2508_v40, %v276_v26  ;;  %v112_v15 = vld [vmem:[%s3990_s0 + $0x2e8] sm:$0xff]  ;;  %v109_v23 = vld [vmem:[%s3990_s0 + $0x2d0] sm:$0xff] }
  0x32   :  { %1062 = vmatmul.mubr.f32.gmra.mrb[6].mxu1 %v578_v56  ;;  %921 = vmatprep.mubr.f32.mxu0 %v586_v57  ;;  %v606_v54 = vmax.f32 %v2767_v14, 0.0  ;;  %v603_v55 = vmax.f32 %v2776_v19, 0.0  ;;  %v471_v56 = vadd.f32 %v2511_v41, %v278_v27  ;;  %v284_v57 = vmul.f32 %v2495_v37, %v91_v34  ;;  %v783_v27 = vld [vmem:[%s3989_s3 + $0x2d0] sm:$0xff] }
  0x33   :  { %1066 = vmatprep.mubr.f32.mxu1 %v588_v63  ;;  %2140 = vmatpush3.bf16.msra.mxu0 %v2139_v21  ;;  %v605_v62 = vmax.f32 %v2787_v28, 0.0  ;;  %v2832_v63 = vadd.f32 %v2514_v42, %v275_v29  ;;  %v2835_v0 = vadd.f32 %v2532_v50, %v277_v31  ;;  %v286_v1 = vmul.f32 %v2520_v44, %v93_v43  ;;  %v784_v28 = vld [vmem:[%s3989_s3 + $0x2d8] sm:$0xff]  ;;  %v811_v29 = vld [vmem:[%s3989_s3 + $0x3b0] sm:$0xff] }
  0x34   :  { %v2845_v4 = vadd.f32 %v2508_v40, %v285_v38  ;;  %v2165_v7 = vpack.c.bf16 %v810_v52, %v809_v51  ;;  %v613_v11 = vmax.f32 %v469_v49, 0.0  ;;  %v2860_v12 = vadd.f32 %v2514_v42, %v284_v57  ;;  %v812_v43 = vld [vmem:[%s3989_s3 + $0x3b8] sm:$0xff]  ;;  %v795_v52 = vld [vmem:[%s3989_s3 + $0x330] sm:$0xff] }
  0x35   :  { %922 = vmatmul.mubr.f32.gmra.mrb[8].mxu0 %v585_v5  ;;  %v2848_v5 = vadd.f32 %v2511_v41, %v287_v39  ;;  %v2143_v13 = vpack.c.bf16 %v766_v58, %v765_v53  ;;  %v2167_v14 = vpack.c.bf16 %v794_v60, %v793_v59  ;;  %v615_v16 = vmax.f32 %v471_v56, 0.0  ;;  %v796_v53 = vld [vmem:[%s3989_s3 + $0x338] sm:$0xff]  ;;  %v121_v59 = vld [vmem:[%s3990_s0 + $0x330] sm:$0xff] }
  0x36   :  { %1067 = vmatmul.mubr.f32.gmra.mrb[8].mxu1 %v587_v6  ;;  %926 = vmatprep.mubr.f32.mxu0 %v595_v18  ;;  %v2141_v6 = vpack.c.bf16 %v782_v46, %v781_v45  ;;  %v2866_v17 = vadd.f32 %v2532_v50, %v286_v1  ;;  %v294_v18 = vmul.f32 %v2478_v32, %v101_v2  ;;  %v612_v25 = vmax.f32 %v2832_v63, 0.0  ;;  %v767_v45 = vld [vmem:[%s3989_s3 + $0x250] sm:$0xff]  ;;  %v768_v46 = vld [vmem:[%s3989_s3 + $0x258] sm:$0xff]  ;;  %v120_v2 = vld [vmem:[%s3990_s0 + $0x328] sm:$0xff] }
  0x37   :  { %1071 = vmatprep.mubr.f32.mxu1 %v597_v24  ;;  %v296_v19 = vmul.f32 %v2489_v35, %v103_v3  ;;  %2166 = vmatprep.subr.bf16.mxu1 %v2165_v7  ;;  %v293_v20 = vmul.f32 %v2495_v37, %v100_v8  ;;  %v295_v21 = vmul.f32 %v2520_v44, %v102_v9  ;;  %v111_v24 = vld [vmem:[%s3990_s0 + $0x2e0] sm:$0xff]  ;;  %v189_v31 = vsub.s32 5, %v2393_v61  ;;  %v118_v60 = vld [vmem:[%s3990_s0 + $0x318] sm:$0xff]  ;;  %v128_v3 = vld [vmem:[%s3990_s0 + $0x368] sm:$0xff] }
  0x38   :  { %2142 = vmatprep.subr.bf16.mxu0 %v2141_v6  ;;  %v303_v22 = vmul.f32 %v2478_v32, %v110_v10  ;;  %2168 = vmatpush3.bf16.msra.mxu1 %v2167_v14  ;;  %v305_v26 = vmul.f32 %v2489_v35, %v112_v15  ;;  %v614_v34 = vmax.f32 %v2835_v0, 0.0  ;;  %v624_v38 = vmax.f32 %v2848_v5, 0.0 }
  0x39   :  { %927 = vmatmul.mubr.f32.gmra.mrb[10].mxu0 %v594_v36  ;;  %v622_v36 = vmax.f32 %v2845_v4, 0.0  ;;  %v487_v39 = vadd.f32 %v2508_v40, %v294_v18  ;;  %v489_v49 = vadd.f32 %v2511_v41, %v296_v19  ;;  %v302_v51 = vmul.f32 %v2495_v37, %v109_v23  ;;  %v130_v4 = vld [vmem:[%s3990_s0 + $0x378] sm:$0xff]  ;;  %v785_v18 = vld [vmem:[%s3989_s3 + $0x2e0] sm:$0xff]  ;;  %v786_v19 = vld [vmem:[%s3989_s3 + $0x2e8] sm:$0xff] }
  0x3a   :  { %1072 = vmatmul.mubr.f32.gmra.mrb[10].mxu1 %v596_v47  ;;  %931 = vmatprep.mubr.f32.mxu0 %v604_v48  ;;  %v621_v47 = vmax.f32 %v2860_v12, 0.0  ;;  %v623_v48 = vmax.f32 %v2866_v17, 0.0  ;;  %v2921_v56 = vadd.f32 %v2532_v50, %v295_v21  ;;  %v2924_v57 = vadd.f32 %v2508_v40, %v303_v22  ;;  %v129_v17 = vld [vmem:[%s3990_s0 + $0x370] sm:$0xff] }
  0x3b   :  { %1076 = vmatprep.mubr.f32.mxu1 %v606_v54  ;;  %2144 = vmatpush3.bf16.msra.mxu0 %v2143_v13  ;;  %v119_v54 = vld [vmem:[%s3990_s0 + $0x320] sm:$0xff]  ;;  %v304_v58 = vmul.f32 %v2520_v44, %v111_v24  ;;  %v2145_v63 = vpack.c.bf16 %v784_v28, %v783_v27  ;;  %v2169_v0 = vpack.c.bf16 %v812_v43, %v811_v29  ;;  %v631_v5 = vmax.f32 %v487_v39, 0.0  ;;  %v798_v39 = vld [vmem:[%s3989_s3 + $0x348] sm:$0xff] }
  0x3c   :  { %v2147_v1 = vpack.c.bf16 %v768_v46, %v767_v45  ;;  %v2946_v6 = vadd.f32 %v2514_v42, %v302_v51  ;;  %v2171_v7 = vpack.c.bf16 %v796_v53, %v795_v52  ;;  %v312_v8 = vmul.f32 %v2478_v32, %v119_v54  ;;  %v127_v13 = vld [vmem:[%s3990_s0 + $0x360] sm:$0xff]  ;;  %v136_v51 = vld [vmem:[%s3990_s0 + $0x3a8] sm:$0xff] }
  0x3d   :  { %932 = vmatmul.mubr.f32.gmra.mrb[12].mxu0 %v603_v55  ;;  %v2918_v55 = vadd.f32 %v2514_v42, %v293_v20  ;;  %v633_v9 = vmax.f32 %v489_v49, 0.0  ;;  %v2950_v10 = vadd.f32 %v2532_v50, %v304_v58  ;;  %2146 = vmatprep.subr.bf16.mxu0 %v2145_v63  ;;  %v311_v12 = vmul.f32 %v2495_v37, %v118_v60  ;;  %v813_v24 = vld [vmem:[%s3989_s3 + $0x3c0] sm:$0xff]  ;;  %v816_v58 = vld [vmem:[%s3989_s3 + $0x3d8] sm:$0xff] }
  0x3e   :  { %1077 = vmatmul.mubr.f32.gmra.mrb[12].mxu1 %v605_v62  ;;  %936 = vmatprep.mubr.f32.mxu0 %v613_v11  ;;  %v2934_v62 = vadd.f32 %v2511_v41, %v305_v26  ;;  %v314_v11 = vmul.f32 %v2489_v35, %v121_v59  ;;  %v313_v14 = vmul.f32 %v2520_v44, %v120_v2  ;;  %v197_v20 = vsub.s32 7, %v2393_v61  ;;  %v769_v26 = vld [vmem:[%s3989_s3 + $0x260] sm:$0xff] }
  0x3f   :  { %1081 = vmatprep.mubr.f32.mxu1 %v615_v16  ;;  %2170 = vmatprep.subr.bf16.mxu1 %v2169_v0  ;;  %v321_v15 = vmul.f32 %v2478_v32, %v128_v3  ;;  %v323_v16 = vmul.f32 %v2489_v35, %v130_v4  ;;  %v630_v21 = vmax.f32 %v2918_v55, 0.0  ;;  %v632_v22 = vmax.f32 %v2921_v56, 0.0  ;;  %v139_v49 = vld [vmem:[%s3990_s0 + $0x3c0] sm:$0xff]  ;;  %v138_v56 = vld [vmem:[%s3990_s0 + $0x3b8] sm:$0xff]  ;;  %v799_v0 = vld [vmem:[%s3989_s3 + $0x350] sm:$0xff] }
  0x40   :  { %2148 = vmatpush3.bf16.msra.mxu0 %v2147_v1  ;;  %v640_v23 = vmax.f32 %v2924_v57, 0.0  ;;  %2172 = vmatpush3.bf16.msra.mxu1 %v2171_v7  ;;  %v642_v27 = vmax.f32 %v2934_v62, 0.0  ;;  %v639_v28 = vmax.f32 %v2946_v6, 0.0  ;;  %v505_v29 = vadd.f32 %v2508_v40, %v312_v8  ;;  %v815_v57 = vld [vmem:[%s3989_s3 + $0x3d0] sm:$0xff]  ;;  %v800_v1 = vld [vmem:[%s3989_s3 + $0x358] sm:$0xff]  ;;  %v148_v7 = vld [vmem:[%s3990_s0 + $0x408] sm:$0xff] }
  0x41   :  { %937 = vmatmul.mubr.f32.gmra.mrb[14].mxu0 %v612_v25  ;;  %v814_v25 = vld [vmem:[%s3989_s3 + $0x3c8] sm:$0xff]  ;;  %v641_v43 = vmax.f32 %v2950_v10, 0.0  ;;  %v507_v45 = vadd.f32 %v2511_v41, %v314_v11  ;;  %v2998_v46 = vadd.f32 %v2514_v42, %v311_v12  ;;  %v3011_v52 = vadd.f32 %v2532_v50, %v313_v14  ;;  %v146_v6 = vld [vmem:[%s3990_s0 + $0x3f8] sm:$0xff]  ;;  %v145_v12 = vld [vmem:[%s3990_s0 + $0x3f0] sm:$0xff] }
  0x42   :  { %1082 = vmatmul.mubr.f32.gmra.mrb[14].mxu1 %v614_v34  ;;  %941 = vmatprep.mubr.f32.mxu0 %v622_v36  ;;  %v320_v34 = vmul.f32 %v2495_v37, %v127_v13  ;;  %v770_v36 = vld [vmem:[%s3989_s3 + $0x268] sm:$0xff]  ;;  %v3014_v53 = vadd.f32 %v2508_v40, %v321_v15  ;;  %v3017_v54 = vadd.f32 %v2511_v41, %v323_v16  ;;  %v649_v2 = vmax.f32 %v505_v29, 0.0  ;;  %v147_v13 = vld [vmem:[%s3990_s0 + $0x400] sm:$0xff]  ;;  %v787_v16 = vld [vmem:[%s3989_s3 + $0x2f0] sm:$0xff] }
  0x43   :  { %1086 = vmatprep.mubr.f32.mxu1 %v624_v38  ;;  %v797_v38 = vld [vmem:[%s3989_s3 + $0x340] sm:$0xff]  ;;  %v2149_v55 = vpack.c.bf16 %v786_v19, %v785_v18  ;;  %v2173_v60 = vpack.c.bf16 %v814_v25, %v813_v24  ;;  %v2151_v62 = vpack.c.bf16 %v770_v36, %v769_v26  ;;  %v651_v8 = vmax.f32 %v507_v45, 0.0  ;;  %v818_v26 = vld [vmem:[%s3989_s3 + $0x3e8] sm:$0xff] }
  0x44   :  { %v3029_v59 = vadd.f32 %v2514_v42, %v320_v34  ;;  %v2175_v63 = vpack.c.bf16 %v798_v39, %v797_v38  ;;  %v331_v10 = vmul.f32 %v2520_v44, %v138_v56  ;;  %v2177_v11 = vpack.c.bf16 %v816_v58, %v815_v57  ;;  %v817_v18 = vld [vmem:[%s3989_s3 + $0x3e0] sm:$0xff]  ;;  %v802_v45 = vld [vmem:[%s3989_s3 + $0x368] sm:$0xff]  ;;  %v819_v58 = vld [vmem:[%s3989_s3 + $0x3f0] sm:$0xff] }
  0x45   :  { %942 = vmatmul.mubr.f32.gmra.mrb[16].mxu0 %v621_v47  ;;  %v322_v47 = vmul.f32 %v2520_v44, %v129_v17  ;;  %2150 = vmatprep.subr.bf16.mxu0 %v2149_v55  ;;  %v648_v14 = vmax.f32 %v2998_v46, 0.0  ;;  %v2179_v15 = vpack.c.bf16 %v800_v1, %v799_v0  ;;  %v788_v17 = vld [vmem:[%s3989_s3 + $0x2f8] sm:$0xff]  ;;  %v185_v19 = vsub.s32 4, %v2393_v61  ;;  %v801_v39 = vld [vmem:[%s3989_s3 + $0x360] sm:$0xff]  ;;  %v156_v57 = vld [vmem:[%s3990_s0 + $0x448] sm:$0xff] }
  0x46   :  { %1087 = vmatmul.mubr.f32.gmra.mrb[16].mxu1 %v623_v48  ;;  %946 = vmatprep.mubr.f32.mxu0 %v631_v5  ;;  %v137_v48 = vld [vmem:[%s3990_s0 + $0x3b0] sm:$0xff]  ;;  %v332_v5 = vmul.f32 %v2489_v35, %v139_v49  ;;  %v339_v24 = vmul.f32 %v2478_v32, %v146_v6  ;;  %v341_v25 = vmul.f32 %v2489_v35, %v148_v7  ;;  %v658_v29 = vmax.f32 %v3014_v53, 0.0  ;;  %v155_v49 = vld [vmem:[%s3990_s0 + $0x440] sm:$0xff] }
  0x47   :  { %1091 = vmatprep.mubr.f32.mxu1 %v633_v9  ;;  %v3038_v3 = vadd.f32 %v2532_v50, %v322_v47  ;;  %v330_v4 = vmul.f32 %v2478_v32, %v137_v48  ;;  %v329_v9 = vmul.f32 %v2495_v37, %v136_v51  ;;  %2174 = vmatprep.subr.bf16.mxu1 %v2173_v60  ;;  %v660_v34 = vmax.f32 %v3017_v54, 0.0  ;;  %v157_v51 = vld [vmem:[%s3990_s0 + $0x450] sm:$0xff] }
  0x48   :  { %2152 = vmatpush3.bf16.msra.mxu0 %v2151_v62  ;;  %2176 = vmatpush3.bf16.msra.mxu1 %v2175_v63  ;;  %v657_v36 = vmax.f32 %v3029_v59, 0.0  ;;  %v525_v38 = vadd.f32 %v2511_v41, %v332_v5  ;;  %v3098_v47 = vadd.f32 %v2532_v50, %v331_v10  ;;  %v338_v48 = vmul.f32 %v2495_v37, %v145_v12  ;;  %v820_v59 = vld [vmem:[%s3989_s3 + $0x3f8] sm:$0xff]  ;;  %v803_v1 = vld [vmem:[%s3989_s3 + $0x370] sm:$0xff] }
  0x49   :  { %947 = vmatmul.mubr.f32.gmra.mrb[18].mxu0 %v630_v21  ;;  %v193_v21 = vsub.s32 6, %v2393_v61  ;;  %v3095_v46 = vadd.f32 %v2514_v42, %v329_v9  ;;  %2178 = vmatprep.subr.bf16.mxu1 %v2177_v11  ;;  %v340_v53 = vmul.f32 %v2520_v44, %v147_v13  ;;  %v2153_v54 = vpack.c.bf16 %v788_v17, %v787_v16 }
  0x4a   :  { %1092 = vmatmul.mubr.f32.gmra.mrb[18].mxu1 %v632_v22  ;;  %951 = vmatprep.mubr.f32.mxu0 %v640_v23  ;;  %v650_v22 = vmax.f32 %v3011_v52, 0.0  ;;  %v3070_v23 = vadd.f32 %v2508_v40, %v330_v4  ;;  %v154_v52 = vld [vmem:[%s3990_s0 + $0x438] sm:$0xff]  ;;  %v2181_v55 = vpack.c.bf16 %v818_v26, %v817_v18  ;;  %v532_v62 = vadd.f32 %v2508_v40, %v339_v24  ;;  %v25_v26 = vld [vmem:[%s3990_s0 + $0x30] sm:$0xff] }
  0x4b   :  { %1096 = vmatprep.mubr.f32.mxu1 %v642_v27  ;;  %v771_v27 = vld [vmem:[%s3989_s3 + $0x270] sm:$0xff]  ;;  %v3123_v63 = vadd.f32 %v2511_v41, %v341_v25  ;;  %v2183_v0 = vpack.c.bf16 %v802_v45, %v801_v39  ;;  %v348_v4 = vmul.f32 %v2478_v32, %v155_v49  ;;  %v350_v5 = vmul.f32 %v2489_v35, %v157_v51 }
  0x4c   :  { %v667_v60 = vmax.f32 %v3070_v23, 0.0  ;;  %2180 = vmatpush3.bf16.msra.mxu1 %v2179_v15  ;;  %v347_v6 = vmul.f32 %v2495_v37, %v154_v52  ;;  %v666_v7 = vmax.f32 %v3095_v46, 0.0  ;;  %2154 = vmatprep.subr.bf16.mxu0 %v2153_v54  ;;  %v349_v9 = vmul.f32 %v2520_v44, %v156_v57  ;;  %v24_v37 = vld [vmem:[%s3990_s0 + $0x28] sm:$0xff]  ;;  %v26_v15 = vld [vmem:[%s3990_s0 + $0x38] sm:$0xff] }
  0x4d   :  { %952 = vmatmul.mubr.f32.gmra.mrb[20].mxu0 %v639_v28  ;;  %v772_v28 = vld [vmem:[%s3989_s3 + $0x278] sm:$0xff]  ;;  %v2185_v10 = vpack.c.bf16 %v820_v59, %v819_v58  ;;  %v668_v11 = vmax.f32 %v3098_v47, 0.0  ;;  %v3141_v12 = vadd.f32 %v2532_v50, %v340_v53  ;;  %2182 = vmatprep.subr.bf16.mxu1 %v2181_v55  ;;  %v3144_v32 = vadd.f32 %v2508_v40, %v348_v4  ;;  %v44_v54 = vld [vmem:[%s3990_s0 + $0xc8] sm:$0xff]  ;;  %v41_v58 = vld [vmem:[%s3990_s0 + $0xb0] sm:$0xff] }
  0x4e   :  { %1097 = vmatmul.mubr.f32.gmra.mrb[20].mxu1 %v641_v43  ;;  %956 = vmatprep.mubr.f32.mxu0 %v649_v2  ;;  %v659_v43 = vmax.f32 %v3038_v3, 0.0  ;;  %v2155_v56 = vpack.c.bf16 %v772_v28, %v771_v27  ;;  %v804_v2 = vld [vmem:[%s3989_s3 + $0x378] sm:$0xff]  ;;  %v669_v3 = vmax.f32 %v525_v38, 0.0  ;;  %v676_v13 = vmax.f32 %v532_v62, 0.0  ;;  %v33_v27 = vld [vmem:[%s3990_s0 + $0x70] sm:$0xff]  ;;  %v32_v38 = vld [vmem:[%s3990_s0 + $0x68] sm:$0xff] }
  0x4f   :  { %1101 = vmatprep.mubr.f32.mxu1 %v651_v8  ;;  %v3136_v8 = vadd.f32 %v2514_v42, %v338_v48  ;;  %v2187_v35 = vpack.c.bf16 %v804_v2, %v803_v1  ;;  %v3150_v44 = vadd.f32 %v2511_v41, %v350_v5  ;;  %v3160_v40 = vrot.slane %v2483_v33, %v189_v31  ;;  %v42_v48 = vld [vmem:[%s3990_s0 + $0xb8] sm:$0xff]  ;;  %v51_v5 = vld [vmem:[%s3990_s0 + $0x100] sm:$0xff] }
  0x50   :  { %2156 = vmatpush3.bf16.msra.mxu0 %v2155_v56  ;;  %2184 = vmatpush3.bf16.msra.mxu1 %v2183_v0  ;;  %v678_v16 = vmax.f32 %v3123_v63, 0.0  ;;  %v3167_v41 = vadd.f32 %v2514_v42, %v347_v6  ;;  %v3170_v17 = vadd.f32 %v2532_v50, %v349_v9  ;;  %v3175_v18 = vrot.slane %v2473_v30, %v197_v20  ;;  %v822_v42 = vld [vmem:[%s3989_s3 + $0x408] sm:$0xff]  ;;  %v43_v0 = vld [vmem:[%s3990_s0 + $0xc0] sm:$0xff]  ;;  %v53_v6 = vld [vmem:[%s3990_s0 + $0x110] sm:$0xff] }
  0x51   :  { %957 = vmatmul.mubr.f32.gmra.mrb[22].mxu0 %v648_v14  ;;  %v3155_v14 = vrot.slane %v2473_v30, %v189_v31  ;;  %v23_v31 = vld [vmem:[%s3990_s0 + $0x20] sm:$0xff]  ;;  %v675_v50 = vmax.f32 %v3136_v8, 0.0  ;;  %2186 = vmatprep.subr.bf16.mxu1 %v2185_v10  ;;  %v3191_v24 = vrot.slane %v2483_v33, %v197_v20  ;;  %v3196_v25 = vrot.slane %v2473_v30, %v185_v19  ;;  %v50_v10 = vld [vmem:[%s3990_s0 + $0xf8] sm:$0xff] }
  0x52   :  { %1102 = vmatmul.mubr.f32.gmra.mrb[22].mxu1 %v650_v22  ;;  %961 = vmatprep.mubr.f32.mxu0 %v658_v29  ;;  %v821_v22 = vld [vmem:[%s3989_s3 + $0x400] sm:$0xff]  ;;  %v219_v28 = vmul.f32 %v3175_v18, %v26_v15  ;;  %v3208_v20 = vrot.slane %v2483_v33, %v185_v19  ;;  %v3213_v29 = vrot.slane %v2473_v30, %v193_v21  ;;  %v677_v19 = vmax.f32 %v3141_v12, 0.0  ;;  %v823_v15 = vld [vmem:[%s3989_s3 + $0x410] sm:$0xff] }
  0x53   :  { %1106 = vmatprep.mubr.f32.mxu1 %v660_v34  ;;  %v217_v23 = vmul.f32 %v3155_v14, %v24_v37  ;;  %v3218_v34 = vrot.slane %v2483_v33, %v193_v21  ;;  %v216_v39 = vmul.f32 %v3196_v25, %v23_v31  ;;  %v3229_v45 = vpack.c.bf16 %v822_v42, %v821_v22  ;;  %v34_v33 = vld [vmem:[%s3990_s0 + $0x78] sm:$0xff]  ;;  %v60_v37 = vld [vmem:[%s3990_s0 + $0x148] sm:$0xff] }
  0x54   :  { %2188 = vmatpush3.bf16.msra.mxu1 %v2187_v35  ;;  %v685_v21 = vmax.f32 %v3144_v32, 0.0  ;;  %v218_v46 = vmul.f32 %v3213_v29, %v25_v26  ;;  %v226_v47 = vmul.f32 %v3155_v14, %v33_v27  ;;  %v687_v49 = vmax.f32 %v3150_v44, 0.0  ;;  %v62_v31 = vld [vmem:[%s3990_s0 + $0x158] sm:$0xff]  ;;  %v59_v26 = vld [vmem:[%s3990_s0 + $0x140] sm:$0xff] }
  0x55   :  { %962 = vmatmul.mubr.f32.gmra.mrb[24].mxu0 %v657_v36  ;;  %v35_v36 = vld [vmem:[%s3990_s0 + $0x80] sm:$0xff]  ;;  %v410_v30 = vadd.f32 %v3160_v40, %v217_v23  ;;  %v409_v51 = vadd.f32 %v3208_v20, %v216_v39  ;;  %2190 = vmatprep.subr.bf16.mxu0 %v3229_v45  ;;  %v225_v53 = vmul.f32 %v3196_v25, %v32_v38  ;;  %v684_v59 = vmax.f32 %v3167_v41, 0.0 }
  0x56   :  { %1107 = vmatmul.mubr.f32.gmra.mrb[24].mxu1 %v659_v43  ;;  %966 = vmatprep.mubr.f32.mxu0 %v667_v60  ;;  %v412_v43 = vadd.f32 %v3191_v24, %v219_v28  ;;  %v228_v52 = vmul.f32 %v3175_v18, %v35_v36  ;;  %v3250_v55 = vadd.f32 %v3218_v34, %v218_v46  ;;  %v686_v1 = vmax.f32 %v3170_v17, 0.0  ;;  %v826_v46 = vld [vmem:[%s3989_s3 + $0x428] sm:$0xff] }
  0x57   :  { %1111 = vmatprep.mubr.f32.mxu1 %v669_v3  ;;  %v3253_v56 = vadd.f32 %v3160_v40, %v226_v47  ;;  %v227_v57 = vmul.f32 %v3213_v29, %v34_v33  ;;  %2221 = vmatprep.subr.bf16.mxu1 %v3229_v45  ;;  %v3265_v62 = vadd.f32 %v3208_v20, %v225_v53  ;;  %v554_v2 = vmax.f32 %v410_v30, 0.0  ;;  %v69_v47 = vld [vmem:[%s3990_s0 + $0x190] sm:$0xff]  ;;  %v68_v53 = vld [vmem:[%s3990_s0 + $0x188] sm:$0xff] }
  0x58   :  { %v3262_v60 = vadd.f32 %v3191_v24, %v228_v52  ;;  %v235_v63 = vmul.f32 %v3155_v14, %v42_v48  ;;  %v237_v4 = vmul.f32 %v3175_v18, %v44_v54  ;;  %v234_v9 = vmul.f32 %v3196_v25, %v41_v58  ;;  %v71_v52 = vld [vmem:[%s3990_s0 + $0x1a0] sm:$0xff]  ;;  %v70_v58 = vld [vmem:[%s3990_s0 + $0x198] sm:$0xff] }
  0x59   :  { %967 = vmatmul.mubr.f32.gmra.mrb[26].mxu0 %v666_v7  ;;  %v3273_v3 = vadd.f32 %v3218_v34, %v227_v57  ;;  %v556_v7 = vmax.f32 %v412_v43, 0.0  ;;  %v553_v12 = vmax.f32 %v409_v51, 0.0  ;;  %v236_v35 = vmul.f32 %v3213_v29, %v43_v0  ;;  %v825_v43 = vld [vmem:[%s3989_s3 + $0x420] sm:$0xff] }
  0x5a   :  { %1112 = vmatmul.mubr.f32.gmra.mrb[26].mxu1 %v668_v11  ;;  %971 = vmatprep.mubr.f32.mxu0 %v676_v13  ;;  %v3283_v8 = vadd.f32 %v3160_v40, %v235_v63  ;;  %v52_v11 = vld [vmem:[%s3990_s0 + $0x108] sm:$0xff]  ;;  %v3293_v32 = vadd.f32 %v3191_v24, %v237_v4  ;;  %v555_v13 = vmax.f32 %v3250_v55, 0.0  ;;  %v3301_v44 = vadd.f32 %v3208_v20, %v234_v9 }
  0x5b   :  { %1116 = vmatprep.mubr.f32.mxu1 %v678_v16  ;;  %v824_v16 = vld [vmem:[%s3989_s3 + $0x418] sm:$0xff]  ;;  %v244_v41 = vmul.f32 %v3155_v14, %v51_v5  ;;  %v246_v17 = vmul.f32 %v3175_v18, %v53_v6  ;;  %v563_v22 = vmax.f32 %v3253_v56, 0.0  ;;  %v3316_v42 = vadd.f32 %v3218_v34, %v236_v35  ;;  %v77_v6 = vld [vmem:[%s3990_s0 + $0x1d0] sm:$0xff] }
  0x5c   :  { %v245_v23 = vmul.f32 %v3213_v29, %v52_v11  ;;  %v565_v27 = vmax.f32 %v3262_v60, 0.0  ;;  %v253_v38 = vmul.f32 %v3155_v14, %v60_v37  ;;  %v2193_v30 = vpack.c.bf16 %v824_v16, %v823_v15  ;;  %v827_v37 = vld [vmem:[%s3989_s3 + $0x430] sm:$0xff] }
  0x5d   :  { %972 = vmatmul.mubr.f32.gmra.mrb[28].mxu0 %v675_v50  ;;  %v243_v50 = vmul.f32 %v3196_v25, %v50_v10  ;;  %v3325_v28 = vadd.f32 %v3160_v40, %v244_v41  ;;  %v3328_v36 = vadd.f32 %v3191_v24, %v246_v17  ;;  %v562_v48 = vmax.f32 %v3265_v62, 0.0  ;;  %v87_v17 = vld [vmem:[%s3990_s0 + $0x220] sm:$0xff] }
  0x5e   :  { %1117 = vmatmul.mubr.f32.gmra.mrb[28].mxu1 %v677_v19  ;;  %976 = vmatprep.mubr.f32.mxu0 %v685_v21  ;;  %v61_v19 = vld [vmem:[%s3990_s0 + $0x150] sm:$0xff]  ;;  %v3338_v33 = vadd.f32 %v3218_v34, %v245_v23  ;;  %v255_v21 = vmul.f32 %v3175_v18, %v62_v31  ;;  %v252_v51 = vmul.f32 %v3196_v25, %v59_v26  ;;  %v564_v54 = vmax.f32 %v3273_v3, 0.0  ;;  %v88_v23 = vld [vmem:[%s3990_s0 + $0x228] sm:$0xff] }
  0x5f   :  { %1121 = vmatprep.mubr.f32.mxu1 %v687_v49  ;;  %v3335_v39 = vadd.f32 %v3208_v20, %v243_v50  ;;  %v3352_v49 = vadd.f32 %v3160_v40, %v253_v38  ;;  %v572_v55 = vmax.f32 %v3283_v8, 0.0  ;;  %v254_v57 = vmul.f32 %v3213_v29, %v61_v19  ;;  %v89_v31 = vld [vmem:[%s3990_s0 + $0x230] sm:$0xff]  ;;  %v86_v50 = vld [vmem:[%s3990_s0 + $0x218] sm:$0xff]  ;;  %v96_v26 = vld [vmem:[%s3990_s0 + $0x268] sm:$0xff] }
  0x60   :  { %v3365_v56 = vadd.f32 %v3191_v24, %v255_v21  ;;  %v574_v60 = vmax.f32 %v3293_v32, 0.0  ;;  %v3376_v62 = vadd.f32 %v3208_v20, %v252_v51  ;;  %v3378_v63 = vpack.c.bf16 %v826_v46, %v825_v43  ;;  %v98_v19 = vld [vmem:[%s3990_s0 + $0x278] sm:$0xff]  ;;  %v95_v43 = vld [vmem:[%s3990_s0 + $0x260] sm:$0xff]  ;;  %v97_v51 = vld [vmem:[%s3990_s0 + $0x270] sm:$0xff] }
  0x61   :  { %977 = vmatmul.mubr.f32.gmra.mrb[30].mxu0 %v684_v59  ;;  %v78_v59 = vld [vmem:[%s3990_s0 + $0x1d8] sm:$0xff]  ;;  %v262_v0 = vmul.f32 %v3155_v14, %v69_v47  ;;  %v3386_v3 = vadd.f32 %v3218_v34, %v254_v57  ;;  %v264_v4 = vmul.f32 %v3175_v18, %v71_v52  ;;  %v261_v5 = vmul.f32 %v3196_v25, %v68_v53 }
  0x62   :  { %1122 = vmatmul.mubr.f32.gmra.mrb[30].mxu1 %v686_v1  ;;  %1191 = vmatprep.mubr.f32.mxu0 %v554_v2  ;;  %v80_v1 = vld [vmem:[%s3990_s0 + $0x1e8] sm:$0xff]  ;;  %v571_v2 = vmax.f32 %v3301_v44, 0.0  ;;  %v263_v9 = vmul.f32 %v3213_v29, %v70_v58  ;;  %v271_v10 = vmul.f32 %v3155_v14, %v78_v59  ;;  %v581_v11 = vmax.f32 %v3325_v28, 0.0 }
  0x63   :  { %1336 = vmatprep.mubr.f32.mxu1 %v556_v7  ;;  %v573_v7 = vmax.f32 %v3316_v42, 0.0  ;;  %v3396_v8 = vadd.f32 %v3160_v40, %v262_v0  ;;  %v3408_v32 = vadd.f32 %v3208_v20, %v261_v5  ;;  %v273_v35 = vmul.f32 %v3175_v18, %v80_v1  ;;  %v107_v5 = vld [vmem:[%s3990_s0 + $0x2c0] sm:$0xff] }
  0x64   :  { %v583_v44 = vmax.f32 %v3328_v36, 0.0  ;;  %v3419_v15 = vadd.f32 %v3218_v34, %v263_v9  ;;  %v3422_v16 = vadd.f32 %v3160_v40, %v271_v10  ;;  %v270_v41 = vmul.f32 %v3196_v25, %v77_v6  ;;  %v104_v6 = vld [vmem:[%s3990_s0 + $0x2a8] sm:$0xff]  ;;  %v114_v9 = vld [vmem:[%s3990_s0 + $0x2f8] sm:$0xff] }
  0x65   :  { %1192 = vmatmul.mubr.f32.vlgmr.msra.gmra.mrb[32].mxu0 %v553_v12  ;;  %v3405_v12 = vadd.f32 %v3191_v24, %v264_v4  ;;  %v582_v28 = vmax.f32 %v3338_v33, 0.0  ;;  %v282_v33 = vmul.f32 %v3175_v18, %v89_v31  ;;  %v592_v46 = vmax.f32 %v3365_v56, 0.0  ;;  %v116_v10 = vld [vmem:[%s3990_s0 + $0x308] sm:$0xff] }
  0x66   :  { %1337 = vmatmul.mubr.f32.vlgmr.msra.gmra.mrb[32].mxu1 %v555_v13  ;;  %2192 = vmatpush3.bf16.msra.mxu0 %v3229_v45  ;;  %v828_v13 = vld [vmem:[%s3989_s3 + $0x438] sm:$0xff]  ;;  %v3448_v36 = vadd.f32 %v3208_v20, %v270_v41  ;;  %v279_v47 = vmul.f32 %v3196_v25, %v86_v50  ;;  %v589_v52 = vmax.f32 %v3376_v62, 0.0  ;;  %v288_v59 = vmul.f32 %v3196_v25, %v95_v43  ;;  %v830_v62 = vld [vmem:[%s3989_s3 + $0x448] sm:$0xff]  ;;  %v115_v50 = vld [vmem:[%s3990_s0 + $0x300] sm:$0xff] }
  0x67   :  { %1196 = vmatprep.mubr.f32.mxu0 %v563_v22  ;;  %1341 = vmatprep.mubr.f32.mxu1 %v565_v27  ;;  %v3433_v22 = vadd.f32 %v3191_v24, %v273_v35  ;;  %v580_v27 = vmax.f32 %v3335_v39, 0.0  ;;  %v2201_v38 = vpack.c.bf16 %v828_v13, %v827_v37  ;;  %v280_v39 = vmul.f32 %v3155_v14, %v87_v17  ;;  %v122_v43 = vld [vmem:[%s3990_s0 + $0x338] sm:$0xff] }
  0x68   :  { %2194 = vmatprep.subr.bf16.mxu0 %v2193_v30  ;;  %2229 = vmatpush3.bf16.msra.mxu1 %v3229_v45  ;;  %v79_v45 = vld [vmem:[%s3990_s0 + $0x1e0] sm:$0xff]  ;;  %v3481_v56 = vadd.f32 %v3208_v20, %v279_v47  ;;  %v591_v0 = vmax.f32 %v3386_v3, 0.0  ;;  %v599_v1 = vmax.f32 %v3396_v8, 0.0  ;;  %v290_v4 = vmul.f32 %v3213_v29, %v97_v51  ;;  %v132_v51 = vld [vmem:[%s3990_s0 + $0x388] sm:$0xff] }
  0x69   :  { %1197 = vmatmul.mubr.f32.gmra.mrb[34].mxu0 %v562_v48  ;;  %2222 = vmatprep.subr.bf16.mxu1 %v2193_v30  ;;  %v272_v42 = vmul.f32 %v3213_v29, %v79_v45  ;;  %v281_v48 = vmul.f32 %v3213_v29, %v88_v23  ;;  %v3473_v53 = vadd.f32 %v3160_v40, %v280_v39  ;;  %v601_v3 = vmax.f32 %v3405_v12, 0.0  ;;  %v123_v39 = vld [vmem:[%s3990_s0 + $0x340] sm:$0xff] }
  0x6a   :  { %1342 = vmatmul.mubr.f32.gmra.mrb[34].mxu1 %v564_v54  ;;  %1201 = vmatprep.mubr.f32.mxu0 %v572_v55  ;;  %v3476_v54 = vadd.f32 %v3191_v24, %v282_v33  ;;  %v291_v55 = vmul.f32 %v3175_v18, %v98_v19  ;;  %v3516_v8 = vadd.f32 %v3208_v20, %v288_v59  ;;  %v598_v45 = vmax.f32 %v3408_v32, 0.0  ;;  %v113_v32 = vld [vmem:[%s3990_s0 + $0x2f0] sm:$0xff] }
  0x6b   :  { %1346 = vmatprep.mubr.f32.mxu1 %v574_v60  ;;  %2196 = vmatpush3.bf16.msra.mxu0 %v2193_v30  ;;  %v3456_v21 = vadd.f32 %v3218_v34, %v272_v42  ;;  %v3484_v57 = vadd.f32 %v3218_v34, %v281_v48  ;;  %v829_v60 = vld [vmem:[%s3989_s3 + $0x440] sm:$0xff]  ;;  %v600_v37 = vmax.f32 %v3419_v15, 0.0  ;;  %v300_v13 = vmul.f32 %v3175_v18, %v107_v5  ;;  %v125_v33 = vld [vmem:[%s3990_s0 + $0x350] sm:$0xff] }
  0x6c   :  { %2198 = vmatprep.subr.bf16.mxu0 %v3378_v63  ;;  %2230 = vmatpush3.bf16.msra.mxu1 %v2193_v30  ;;  %v590_v30 = vmax.f32 %v3352_v49, 0.0  ;;  %v289_v49 = vmul.f32 %v3155_v14, %v96_v26  ;;  %v2205_v35 = vpack.c.bf16 %v830_v62, %v829_v60  ;;  %v608_v17 = vmax.f32 %v3422_v16, 0.0  ;;  %v131_v5 = vld [vmem:[%s3990_s0 + $0x380] sm:$0xff] }
  0x6d   :  { %1202 = vmatmul.mubr.f32.gmra.mrb[36].mxu0 %v571_v2  ;;  %2223 = vmatprep.subr.bf16.mxu1 %v3378_v63  ;;  %v3502_v2 = vadd.f32 %v3191_v24, %v291_v55  ;;  %v307_v15 = vmul.f32 %v3155_v14, %v114_v9  ;;  %v309_v42 = vmul.f32 %v3175_v18, %v116_v10  ;;  %v610_v23 = vmax.f32 %v3433_v22, 0.0  ;;  %v133_v9 = vld [vmem:[%s3990_s0 + $0x390] sm:$0xff]  ;;  %v833_v10 = vld [vmem:[%s3989_s3 + $0x460] sm:$0xff] }
  0x6e   :  { %1347 = vmatmul.mubr.f32.gmra.mrb[36].mxu1 %v573_v7  ;;  %1206 = vmatprep.mubr.f32.mxu0 %v581_v11  ;;  %v3487_v58 = vadd.f32 %v3160_v40, %v289_v49  ;;  %v106_v7 = vld [vmem:[%s3990_s0 + $0x2b8] sm:$0xff]  ;;  %v3526_v11 = vadd.f32 %v3218_v34, %v290_v4  ;;  %v3547_v26 = vadd.f32 %v3191_v24, %v300_v13  ;;  %v609_v47 = vmax.f32 %v3456_v21, 0.0  ;;  %v124_v49 = vld [vmem:[%s3990_s0 + $0x348] sm:$0xff]  ;;  %v141_v13 = vld [vmem:[%s3990_s0 + $0x3d0] sm:$0xff] }
  0x6f   :  { %1351 = vmatprep.mubr.f32.mxu1 %v583_v44  ;;  %2200 = vmatpush3.bf16.msra.mxu0 %v3378_v63  ;;  %v297_v44 = vmul.f32 %v3196_v25, %v104_v6  ;;  %v299_v41 = vmul.f32 %v3213_v29, %v106_v7  ;;  %v3562_v22 = vadd.f32 %v3160_v40, %v307_v15  ;;  %v619_v21 = vmax.f32 %v3476_v54, 0.0 }
  0x70   :  { %2202 = vmatprep.subr.bf16.mxu0 %v2201_v38  ;;  %2231 = vmatpush3.bf16.msra.mxu1 %v3378_v63  ;;  %v105_v63 = vld [vmem:[%s3990_s0 + $0x2b0] sm:$0xff]  ;;  %v3565_v19 = vadd.f32 %v3191_v24, %v309_v42  ;;  %v308_v48 = vmul.f32 %v3213_v29, %v115_v50  ;;  %v316_v62 = vmul.f32 %v3155_v14, %v123_v39  ;;  %v618_v6 = vmax.f32 %v3484_v57, 0.0 }
  0x71   :  { %1207 = vmatmul.mubr.f32.gmra.mrb[38].mxu0 %v580_v27  ;;  %v298_v12 = vmul.f32 %v3155_v14, %v105_v63  ;;  %2224 = vmatprep.subr.bf16.mxu1 %v2201_v38  ;;  %v3550_v16 = vadd.f32 %v3208_v20, %v297_v44  ;;  %v3553_v27 = vadd.f32 %v3218_v34, %v299_v41  ;;  %v626_v57 = vmax.f32 %v3487_v58, 0.0  ;;  %v143_v58 = vld [vmem:[%s3990_s0 + $0x3e0] sm:$0xff] }
  0x72   :  { %1352 = vmatmul.mubr.f32.gmra.mrb[38].mxu1 %v582_v28  ;;  %1211 = vmatprep.mubr.f32.mxu0 %v590_v30  ;;  %v831_v28 = vld [vmem:[%s3989_s3 + $0x450] sm:$0xff]  ;;  %v306_v30 = vmul.f32 %v3196_v25, %v113_v32  ;;  %v3595_v60 = vadd.f32 %v3218_v34, %v308_v48  ;;  %v318_v63 = vmul.f32 %v3175_v18, %v125_v33  ;;  %v628_v44 = vmax.f32 %v3502_v2, 0.0  ;;  %v140_v32 = vld [vmem:[%s3990_s0 + $0x3c8] sm:$0xff]  ;;  %v150_v2 = vld [vmem:[%s3990_s0 + $0x418] sm:$0xff] }
  0x73   :  { %1356 = vmatprep.mubr.f32.mxu1 %v592_v46  ;;  %2204 = vmatpush3.bf16.msra.mxu0 %v2201_v38  ;;  %v3538_v31 = vadd.f32 %v3160_v40, %v298_v12  ;;  %v607_v46 = vmax.f32 %v3448_v36, 0.0  ;;  %v617_v36 = vmax.f32 %v3473_v53, 0.0  ;;  %v317_v53 = vmul.f32 %v3213_v29, %v124_v49 }
  0x74   :  { %2232 = vmatpush3.bf16.msra.mxu1 %v2201_v38  ;;  %2206 = vmatprep.subr.bf16.mxu0 %v2205_v35  ;;  %v832_v38 = vld [vmem:[%s3989_s3 + $0x458] sm:$0xff]  ;;  %v3592_v55 = vadd.f32 %v3208_v20, %v306_v30  ;;  %v325_v54 = vmul.f32 %v3155_v14, %v132_v51  ;;  %v3609_v7 = vadd.f32 %v3160_v40, %v316_v62  ;;  %v625_v15 = vmax.f32 %v3516_v8, 0.0  ;;  %v152_v8 = vld [vmem:[%s3990_s0 + $0x428] sm:$0xff]  ;;  %v151_v51 = vld [vmem:[%s3990_s0 + $0x420] sm:$0xff] }
  0x75   :  { %1212 = vmatmul.mubr.f32.gmra.mrb[40].mxu0 %v589_v52  ;;  %2225 = vmatprep.subr.bf16.mxu1 %v2205_v35  ;;  %v134_v52 = vld [vmem:[%s3990_s0 + $0x398] sm:$0xff]  ;;  %v2209_v59 = vpack.c.bf16 %v832_v38, %v831_v28  ;;  %v324_v41 = vmul.f32 %v3196_v25, %v131_v5  ;;  %v627_v42 = vmax.f32 %v3526_v11, 0.0  ;;  %v326_v50 = vmul.f32 %v3213_v29, %v133_v9  ;;  %v159_v62 = vld [vmem:[%s3990_s0 + $0x460] sm:$0xff]  ;;  %v160_v9 = vld [vmem:[%s3990_s0 + $0x468] sm:$0xff] }
  0x76   :  { %1357 = vmatmul.mubr.f32.gmra.mrb[40].mxu1 %v591_v0  ;;  %1216 = vmatprep.mubr.f32.mxu0 %v599_v1  ;;  %v315_v0 = vmul.f32 %v3196_v25, %v122_v43  ;;  %v616_v1 = vmax.f32 %v3481_v56, 0.0  ;;  %v327_v4 = vmul.f32 %v3175_v18, %v134_v52  ;;  %v3612_v56 = vadd.f32 %v3191_v24, %v318_v63 }
  0x77   :  { %1361 = vmatprep.mubr.f32.mxu1 %v601_v3  ;;  %2208 = vmatpush3.bf16.msra.mxu0 %v2205_v35  ;;  %v334_v38 = vmul.f32 %v3155_v14, %v141_v13  ;;  %v336_v30 = vmul.f32 %v3175_v18, %v143_v58  ;;  %v635_v11 = vmax.f32 %v3538_v31, 0.0  ;;  %v3666_v39 = vadd.f32 %v3218_v34, %v326_v50 }
  0x78   :  { %2233 = vmatpush3.bf16.msra.mxu1 %v2205_v35  ;;  %2210 = vmatprep.subr.bf16.mxu0 %v2209_v59  ;;  %v3615_v3 = vadd.f32 %v3208_v20, %v315_v0  ;;  %v3628_v35 = vadd.f32 %v3160_v40, %v325_v54  ;;  %v3631_v12 = vadd.f32 %v3191_v24, %v327_v4  ;;  %v634_v63 = vmax.f32 %v3550_v16, 0.0  ;;  %v158_v54 = vld [vmem:[%s3990_s0 + $0x458] sm:$0xff] }
  0x79   :  { %1217 = vmatmul.mubr.f32.gmra.mrb[42].mxu0 %v598_v45  ;;  %2226 = vmatprep.subr.bf16.mxu1 %v2209_v59  ;;  %v3625_v45 = vadd.f32 %v3218_v34, %v317_v53  ;;  %v333_v33 = vmul.f32 %v3196_v25, %v140_v32  ;;  %v3675_v48 = vadd.f32 %v3160_v40, %v334_v38  ;;  %v161_v53 = vld [vmem:[%s3990_s0 + $0x470] sm:$0xff]  ;;  %v636_v4 = vmax.f32 %v3553_v27, 0.0  ;;  %v3780_v38 = vld [vmem:[%s3992_s2 + $0x8] ss:$0 sm:$0xff] }
  0x7a   :  { %1362 = vmatmul.mubr.f32.gmra.mrb[42].mxu1 %v600_v37  ;;  %1221 = vmatprep.mubr.f32.mxu0 %v608_v17  ;;  %v834_v37 = vld [vmem:[%s3989_s3 + $0x468] sm:$0xff]  ;;  %v142_v17 = vld [vmem:[%s3990_s0 + $0x3d8] sm:$0xff]  ;;  %v3678_v31 = vadd.f32 %v3191_v24, %v336_v30  ;;  %v343_v49 = vmul.f32 %v3155_v14, %v150_v2  ;;  %v644_v16 = vmax.f32 %v3562_v22, 0.0  ;;  %v352_v27 = vmul.f32 %v3155_v14, %v159_v62  ;;  %v135_v62 = vld [vmem:[%s3990_s0 + $0x3a0] sm:$0xff] }
  0x7b   :  { %1366 = vmatprep.mubr.f32.mxu1 %v610_v23  ;;  %2212 = vmatpush3.bf16.msra.mxu0 %v2209_v59  ;;  %v3657_v23 = vadd.f32 %v3208_v20, %v324_v41  ;;  %v2213_v28 = vpack.c.bf16 %v834_v37, %v833_v10  ;;  %v335_v43 = vmul.f32 %v3213_v29, %v142_v17  ;;  %v646_v10 = vmax.f32 %v3565_v19, 0.0 }
  0x7c   :  { %2234 = vmatpush3.bf16.msra.mxu1 %v2209_v59  ;;  %v3685_v52 = vadd.f32 %v3208_v20, %v333_v33  ;;  %v836_v59 = vld [vmem:[%s3989_s3 + $0x478] sm:$0xff]  ;;  %v3702_v0 = vadd.f32 %v3160_v40, %v343_v49  ;;  %v354_v13 = vmul.f32 %v3175_v18, %v161_v53  ;;  %v351_v58 = vmul.f32 %v3196_v25, %v158_v54 }
  0x7d   :  { %1222 = vmatmul.mubr.f32.gmra.mrb[44].mxu0 %v607_v46  ;;  %v149_v46 = vld [vmem:[%s3990_s0 + $0x410] sm:$0xff]  ;;  %2214 = vmatprep.subr.bf16.mxu0 %v2213_v28  ;;  %v3732_v41 = vadd.f32 %v3160_v40, %v352_v27  ;;  %v353_v19 = vmul.f32 %v3213_v29, %v160_v9  ;;  %v645_v14 = vmax.f32 %v3595_v60, 0.0  ;;  %v653_v32 = vmax.f32 %v3609_v7, 0.0  ;;  %v54_v49 = vld [vmem:[%s3990_s0 + $0x118] sm:$0xff] }
  0x7e   :  { %1367 = vmatmul.mubr.f32.gmra.mrb[44].mxu1 %v609_v47  ;;  %1226 = vmatprep.mubr.f32.mxu0 %v617_v36  ;;  %v637_v47 = vmax.f32 %v3547_v26, 0.0  ;;  %v3688_v36 = vadd.f32 %v3218_v34, %v335_v43  ;;  %v345_v26 = vmul.f32 %v3175_v18, %v152_v8  ;;  %v3738_v17 = vadd.f32 %v3191_v24, %v354_v13  ;;  %v45_v8 = vld [vmem:[%s3990_s0 + $0xd0] sm:$0xff] }
  0x7f   :  { %1371 = vmatprep.mubr.f32.mxu1 %v619_v21  ;;  %2216 = vmatpush3.bf16.msra.mxu0 %v2213_v28  ;;  %v835_v21 = vld [vmem:[%s3989_s3 + $0x470] sm:$0xff]  ;;  %v3741_v18 = vadd.f32 %v3208_v20, %v351_v58  ;;  %v3745_v40 = vadd.f32 %v3218_v34, %v353_v19  ;;  %v661_v60 = vmax.f32 %v3657_v23, 0.0  ;;  %v671_v7 = vmax.f32 %v3675_v48, 0.0  ;;  %v108_v23 = vld [vmem:[%s3990_s0 + $0x2c8] sm:$0xff] }
  0x80   :  { %2227 = vmatprep.subr.bf16.mxu1 %v2213_v28  ;;  %v3714_v5 = vadd.f32 %v3191_v24, %v345_v26  ;;  %v2217_v37 = vpack.c.bf16 %v836_v59, %v835_v21  ;;  %v654_v24 = vmax.f32 %v3625_v45, 0.0  ;;  %v3761_v45 = vld [vmem:[%s3991_s1 + $0x8] ss:$0 sm:$0xff]  ;;  %v680_v50 = vmax.f32 %v3702_v0, 0.0  ;;  %v63_v21 = vld [vmem:[%s3990_s0 + $0x160] sm:$0xff]  ;;  %v81_v27 = vld [vmem:[%s3990_s0 + $0x1f0] sm:$0xff] }
  0x81   :  { %1227 = vmatmul.mubr.f32.gmra.mrb[46].mxu0 %v616_v1  ;;  %v342_v1 = vmul.f32 %v3196_v25, %v149_v46  ;;  %2235 = vmatpush3.bf16.msra.mxu1 %v2213_v28  ;;  %v655_v25 = vmax.f32 %v3612_v56, 0.0  ;;  %v673_v56 = vmax.f32 %v3678_v31, 0.0  ;;  %v301_v43 = vmul.f32 %v3761_v45, %v108_v23  ;;  %v153_v13 = vld [vmem:[%s3990_s0 + $0x430] sm:$0xff] }
  0x82   :  { %1372 = vmatmul.mubr.f32.gmra.mrb[46].mxu1 %v618_v6  ;;  %1231 = vmatprep.mubr.f32.mxu0 %v626_v57  ;;  %v344_v6 = vmul.f32 %v3213_v29, %v151_v51  ;;  %v652_v29 = vmax.f32 %v3615_v3, 0.0  ;;  %v27_v3 = vld [vmem:[%s3990_s0 + $0x40] sm:$0xff]  ;;  %v682_v28 = vmax.f32 %v3714_v5, 0.0  ;;  %v238_v31 = vmul.f32 %v3761_v45, %v45_v8  ;;  %v126_v51 = vld [vmem:[%s3990_s0 + $0x358] sm:$0xff] }
  0x83   :  { %1376 = vmatprep.mubr.f32.mxu1 %v628_v44  ;;  %v3722_v57 = vadd.f32 %v3208_v20, %v342_v1  ;;  %v643_v44 = vmax.f32 %v3592_v55, 0.0  ;;  %2218 = vmatprep.subr.bf16.mxu0 %v2217_v37  ;;  %v662_v55 = vmax.f32 %v3628_v35, 0.0  ;;  %v664_v20 = vmax.f32 %v3631_v12, 0.0  ;;  %v99_v35 = vld [vmem:[%s3990_s0 + $0x280] sm:$0xff] }
  0x84   :  { %v3726_v22 = vadd.f32 %v3218_v34, %v344_v6  ;;  %2220 = vmatpush3.bf16.msra.mxu0 %v2217_v37  ;;  %2228 = vmatprep.subr.bf16.mxu1 %v2217_v37  ;;  %v663_v34 = vmax.f32 %v3666_v39, 0.0  ;;  %v670_v12 = vmax.f32 %v3685_v52, 0.0  ;;  %v220_v2 = vmul.f32 %v3761_v45, %v27_v3  ;;  %v117_v39 = vld [vmem:[%s3990_s0 + $0x310] sm:$0xff]  ;;  %v72_v6 = vld [vmem:[%s3990_s0 + $0x1a8] sm:$0xff] }
  0x85   :  { %1232 = vmatmul.mubr.f32.gmra.mrb[48].mxu0 %v625_v15  ;;  %2236 = vmatpush3.bf16.msra.mxu1 %v2217_v37  ;;  %v36_v15 = vld [vmem:[%s3990_s0 + $0x88] sm:$0xff]  ;;  %v292_v30 = vmul.f32 %v3761_v45, %v99_v35  ;;  %v679_v33 = vmax.f32 %v3722_v57, 0.0  ;;  %v691_v52 = vmax.f32 %v3738_v17, 0.0  ;;  %v310_v26 = vmul.f32 %v3761_v45, %v117_v39 }
  0x86   :  { %1377 = vmatmul.mubr.f32.gmra.mrb[48].mxu1 %v627_v42  ;;  %1236 = vmatprep.mubr.f32.mxu0 %v635_v11  ;;  %v672_v42 = vmax.f32 %v3688_v36, 0.0  ;;  %v229_v11 = vmul.f32 %v3761_v45, %v36_v15  ;;  %v681_v46 = vmax.f32 %v3726_v22, 0.0  ;;  %v413_v48 = vadd.f32 %v3780_v38, %v220_v2  ;;  %v144_v37 = vld [vmem:[%s3990_s0 + $0x3e8] sm:$0xff] }
  0x87   :  { %1381 = vmatprep.mubr.f32.mxu1 %v637_v47  ;;  %v689_v47 = vmax.f32 %v3732_v41, 0.0  ;;  %v485_v36 = vadd.f32 %v3780_v38, %v292_v30  ;;  %v494_v0 = vadd.f32 %v3780_v38, %v301_v43  ;;  %v247_v1 = vmul.f32 %v3761_v45, %v54_v49 }
  0x88   :  { %v422_v59 = vadd.f32 %v3780_v38, %v229_v11  ;;  %v319_v53 = vmul.f32 %v3761_v45, %v126_v51  ;;  %v690_v54 = vmax.f32 %v3745_v40, 0.0  ;;  %v256_v5 = vmul.f32 %v3761_v45, %v63_v21 }
  0x89   :  { %1237 = vmatmul.mubr.f32.gmra.mrb[50].mxu0 %v634_v63  ;;  %v688_v63 = vmax.f32 %v3741_v18, 0.0  ;;  %v629_v9 = vmax.f32 %v485_v36, 0.0  ;;  %v328_v57 = vmul.f32 %v3761_v45, %v135_v62  ;;  %v638_v58 = vmax.f32 %v494_v0, 0.0 }
  0x8a   :  { %1382 = vmatmul.mubr.f32.gmra.mrb[50].mxu1 %v636_v4  ;;  %1241 = vmatprep.mubr.f32.mxu0 %v644_v16  ;;  %v557_v4 = vmax.f32 %v413_v48, 0.0  ;;  %v431_v16 = vadd.f32 %v3780_v38, %v238_v31  ;;  %v566_v22 = vmax.f32 %v422_v59, 0.0  ;;  %v512_v41 = vadd.f32 %v3780_v38, %v319_v53 }
  0x8b   :  { %1386 = vmatprep.mubr.f32.mxu1 %v646_v10  ;;  %v503_v10 = vadd.f32 %v3780_v38, %v310_v26  ;;  %v265_v19 = vmul.f32 %v3761_v45, %v72_v6  ;;  %v337_v17 = vmul.f32 %v3761_v45, %v144_v37  ;;  %v274_v18 = vmul.f32 %v3761_v45, %v81_v27 }
  0x8d   :  { %1242 = vmatmul.mubr.f32.gmra.mrb[52].mxu0 %v643_v44  ;;  %v440_v44 = vadd.f32 %v3780_v38, %v247_v1  ;;  %v647_v40 = vmax.f32 %v503_v10, 0.0  ;;  %v530_v3 = vadd.f32 %v3780_v38, %v337_v17  ;;  %v467_v35 = vadd.f32 %v3780_v38, %v274_v18 }
  0x8e   :  { %1387 = vmatmul.mubr.f32.gmra.mrb[52].mxu1 %v645_v14  ;;  %1246 = vmatprep.mubr.f32.mxu0 %v653_v32  ;;  %v575_v14 = vmax.f32 %v431_v16, 0.0  ;;  %v449_v32 = vadd.f32 %v3780_v38, %v256_v5 }
  0x8f   :  { %1391 = vmatprep.mubr.f32.mxu1 %v655_v25  ;;  %v90_v25 = vld [vmem:[%s3990_s0 + $0x238] sm:$0xff]  ;;  %v674_v23 = vmax.f32 %v530_v3, 0.0 }
  0x91   :  { %1247 = vmatmul.mubr.f32.gmra.mrb[54].mxu0 %v652_v29  ;;  %v521_v29 = vadd.f32 %v3780_v38, %v328_v57 }
  0x92   :  { %1392 = vmatmul.mubr.f32.gmra.mrb[54].mxu1 %v654_v24  ;;  %1251 = vmatprep.mubr.f32.mxu0 %v662_v55  ;;  %v346_v24 = vmul.f32 %v3761_v45, %v153_v13  ;;  %v162_v55 = vld [vmem:[%s3990_s0 + $0x478] sm:$0xff] }
  0x93   :  { %1396 = vmatprep.mubr.f32.mxu1 %v664_v20  ;;  %v584_v20 = vmax.f32 %v440_v44, 0.0  ;;  %v665_v15 = vmax.f32 %v521_v29, 0.0 }
  0x95   :  { %1252 = vmatmul.mubr.f32.gmra.mrb[56].mxu0 %v661_v60  ;;  %v656_v60 = vmax.f32 %v512_v41, 0.0 }
  0x96   :  { %1397 = vmatmul.mubr.f32.gmra.mrb[56].mxu1 %v663_v34  ;;  %1256 = vmatprep.mubr.f32.mxu0 %v671_v7  ;;  %v458_v34 = vadd.f32 %v3780_v38, %v265_v19  ;;  %v283_v7 = vmul.f32 %v3761_v45, %v90_v25 }
  0x97   :  { %1401 = vmatprep.mubr.f32.mxu1 %v673_v56  ;;  %v593_v56 = vmax.f32 %v449_v32, 0.0 }
  0x98   :  { %v476_v2 = vadd.f32 %v3780_v38, %v283_v7 }
  0x99   :  { %1257 = vmatmul.mubr.f32.gmra.mrb[58].mxu0 %v670_v12  ;;  %v355_v12 = vmul.f32 %v3761_v45, %v162_v55 }
  0x9a   :  { %1402 = vmatmul.mubr.f32.gmra.mrb[58].mxu1 %v672_v42  ;;  %1261 = vmatprep.mubr.f32.mxu0 %v680_v50  ;;  %v539_v42 = vadd.f32 %v3780_v38, %v346_v24  ;;  %v602_v50 = vmax.f32 %v458_v34, 0.0  ;;  %v620_v11 = vmax.f32 %v476_v2, 0.0 }
  0x9b   :  { %1406 = vmatprep.mubr.f32.mxu1 %v682_v28  ;;  %v611_v28 = vmax.f32 %v467_v35, 0.0  ;;  %v548_v30 = vadd.f32 %v3780_v38, %v355_v12 }
  0x9c   :  { %v683_v8 = vmax.f32 %v539_v42, 0.0 }
  0x9d   :  { %1262 = vmatmul.mubr.f32.gmra.mrb[60].mxu0 %v679_v33  ;;  %v692_v45 = vmax.f32 %v548_v30, 0.0 }
  0x9e   :  { %1407 = vmatmul.mubr.f32.gmra.mrb[60].mxu1 %v681_v46  ;;  %1266 = vmatprep.mubr.f32.mxu0 %v689_v47 }
  0x9f   :  { %1411 = vmatprep.mubr.f32.mxu1 %v691_v52 }
  0xa1   :  { %1267 = vmatmul.mubr.f32.gmra.mrb[62].mxu0 %v688_v63 }
  0xa2   :  { %1412 = vmatmul.mubr.f32.gmra.mrb[62].mxu1 %v690_v54  ;;  %2037 = vmatprep.mubr.f32.mxu0 %v557_v4 }
  0xa3   :  { %2049 = vmatprep.mubr.f32.mxu1 %v629_v9 }
  0xa5   :  { %2038 = vmatmul.mubr.f32.vlgmr.msra.gmra.mrb[64].mxu0 %v566_v22 }
  0xa6   :  { %2050 = vmatmul.mubr.f32.vlgmr.msra.gmra.mrb[64].mxu1 %v638_v58  ;;  %2040 = vmatprep.mubr.f32.mxu0 %v575_v14 }
  0xa7   :  { %2052 = vmatprep.mubr.f32.mxu1 %v647_v40 }
  0xa9   :  { %2041 = vmatmul.mubr.f32.gmra.mrb[66].mxu0 %v584_v20 }
  0xaa   :  { %2053 = vmatmul.mubr.f32.gmra.mrb[66].mxu1 %v656_v60  ;;  %2043 = vmatprep.mubr.f32.mxu0 %v593_v56 }
  0xab   :  { %2055 = vmatprep.mubr.f32.mxu1 %v665_v15 }
  0xad   :  { %2044 = vmatmul.mubr.f32.gmra.mrb[68].mxu0 %v602_v50 }
  0xae   :  { %2056 = vmatmul.mubr.f32.gmra.mrb[68].mxu1 %v674_v23  ;;  %2046 = vmatprep.mubr.f32.mxu0 %v611_v28 }
  0xaf   :  { %2058 = vmatprep.mubr.f32.mxu1 %v683_v8 }
  0xb1   :  { %2047 = vmatmul.mubr.f32.gmra.mrb[70].mxu0 %v620_v11 }
  0xb2   :  { %2059 = vmatmul.mubr.f32.gmra.mrb[70].mxu1 %v692_v45 }
  0xf8   :  { %v1685_v39 = vpop.f32.mrb[0].mxu0 }
  0xf9   :  { %v1765_v33 = vpop.f32.mrb[0].mxu1  ;;  %v1686_v43 = vpop.f32.mrb[1].mxu0 }
  0xfa   :  { %v1687_v46 = vadd.f32 %v1686_v43, %v1685_v39  ;;  %v1766_v47 = vpop.f32.mrb[1].mxu1 }
  0xfb   :  { %v1767_v48 = vadd.f32 %v1766_v47, %v1765_v33 }
  0xfc   :  { %v1688_v31 = vpop.f32.mrb[2].mxu0 }
  0xfd   :  { %v3855_v49 = vadd.f32 %v1767_v48, %v1687_v46  ;;  %v1768_v38 = vpop.f32.mrb[2].mxu1  ;;  %v1689_v51 = vpop.f32.mrb[3].mxu0 }
  0xfe   :  { %v1690_v52 = vadd.f32 %v1689_v51, %v1688_v31  ;;  %v1769_v36 = vpop.f32.mrb[3].mxu1 }
  0xff   :  { %v1770_v26 = vadd.f32 %v1769_v36, %v1768_v38 }
 0x100   :  { %v1691_v21 = vpop.f32.mrb[4].mxu0 }
 0x101   :  { %v3857_v59 = vadd.f32 %v1770_v26, %v1690_v52  ;;  %v1771_v62 = vpop.f32.mrb[4].mxu1  ;;  %v1692_v63 = vpop.f32.mrb[5].mxu0 }
 0x102   :  { %v1693_v0 = vadd.f32 %v1692_v63, %v1691_v21  ;;  %v1772_v1 = vpop.f32.mrb[5].mxu1 }
 0x103   :  { %v1773_v53 = vadd.f32 %v1772_v1, %v1771_v62 }
 0x104   :  { %v1694_v54 = vpop.f32.mrb[6].mxu0 }
 0x105   :  { %v3859_v4 = vadd.f32 %v1773_v53, %v1693_v0  ;;  %v1774_v16 = vpop.f32.mrb[6].mxu1  ;;  %v1695_v5 = vpop.f32.mrb[7].mxu0 }
 0x106   :  { %v1696_v6 = vadd.f32 %v1695_v5, %v1694_v54  ;;  %v1775_v9 = vpop.f32.mrb[7].mxu1 }
 0x107   :  { %v1776_v10 = vadd.f32 %v1775_v9, %v1774_v16 }
 0x108   :  { %v1697_v57 = vpop.f32.mrb[8].mxu0 }
 0x109   :  { %v3861_v37 = vadd.f32 %v1776_v10, %v1696_v6  ;;  %v1777_v27 = vpop.f32.mrb[8].mxu1  ;;  %v1698_v22 = vpop.f32.mrb[9].mxu0 }
 0x10a   :  { %v1699_v13 = vadd.f32 %v1698_v22, %v1697_v57  ;;  %v1778_v58 = vpop.f32.mrb[9].mxu1 }
 0x10b   :  { %v1779_v44 = vadd.f32 %v1778_v58, %v1777_v27 }
 0x10c   :  { %v1700_v41 = vpop.f32.mrb[10].mxu0 }
 0x10d   :  { %v3863_v19 = vadd.f32 %v1779_v44, %v1699_v13  ;;  %v1780_v14 = vpop.f32.mrb[10].mxu1  ;;  %v1701_v32 = vpop.f32.mrb[11].mxu0 }
 0x10e   :  { %v1702_v17 = vadd.f32 %v1701_v32, %v1700_v41  ;;  %v1781_v18 = vpop.f32.mrb[11].mxu1 }
 0x10f   :  { %v1782_v25 = vadd.f32 %v1781_v18, %v1780_v14 }
 0x110   :  { %v1703_v40 = vpop.f32.mrb[12].mxu0 }
 0x111   :  { %v3865_v29 = vadd.f32 %v1782_v25, %v1702_v17  ;;  %v1783_v24 = vpop.f32.mrb[12].mxu1  ;;  %v1704_v55 = vpop.f32.mrb[13].mxu0 }
 0x112   :  { %v1705_v20 = vadd.f32 %v1704_v55, %v1703_v40  ;;  %v1784_v60 = vpop.f32.mrb[13].mxu1 }
 0x113   :  { %v1785_v34 = vadd.f32 %v1784_v60, %v1783_v24 }
 0x114   :  { %v1706_v7 = vpop.f32.mrb[14].mxu0 }
 0x115   :  { %v3867_v56 = vadd.f32 %v1785_v34, %v1705_v20  ;;  %v1786_v3 = vpop.f32.mrb[14].mxu1  ;;  %v1707_v35 = vpop.f32.mrb[15].mxu0 }
 0x116   :  { %v1708_v12 = vadd.f32 %v1707_v35, %v1706_v7  ;;  %v1787_v15 = vpop.f32.mrb[15].mxu1 }
 0x117   :  { %v1788_v42 = vadd.f32 %v1787_v15, %v1786_v3 }
 0x118   :  { %v1709_v50 = vpop.f32.mrb[16].mxu0 }
 0x119   :  { %v3869_v2 = vadd.f32 %v1788_v42, %v1708_v12  ;;  %v1789_v23 = vpop.f32.mrb[16].mxu1  ;;  %v1710_v28 = vpop.f32.mrb[17].mxu0 }
 0x11a   :  { %v1711_v30 = vadd.f32 %v1710_v28, %v1709_v50  ;;  %v1790_v8 = vpop.f32.mrb[17].mxu1 }
 0x11b   :  { %v1791_v11 = vadd.f32 %v1790_v8, %v1789_v23 }
 0x11c   :  { %v1712_v45 = vpop.f32.mrb[18].mxu0 }
 0x11d   :  { %v3871_v39 = vadd.f32 %v1791_v11, %v1711_v30  ;;  %v1792_v33 = vpop.f32.mrb[18].mxu1  ;;  %v1713_v43 = vpop.f32.mrb[19].mxu0 }
 0x11e   :  { %v1714_v46 = vadd.f32 %v1713_v43, %v1712_v45  ;;  %v1793_v47 = vpop.f32.mrb[19].mxu1 }
 0x11f   :  { %v1794_v48 = vadd.f32 %v1793_v47, %v1792_v33 }
 0x120   :  { %v1715_v31 = vpop.f32.mrb[20].mxu0 }
 0x121   :  { %v3873_v38 = vadd.f32 %v1794_v48, %v1714_v46  ;;  %v1795_v51 = vpop.f32.mrb[20].mxu1  ;;  %v1716_v52 = vpop.f32.mrb[21].mxu0 }
 0x122   :  { %v1717_v36 = vadd.f32 %v1716_v52, %v1715_v31  ;;  %v1796_v26 = vpop.f32.mrb[21].mxu1 }
 0x123   :  { %v1797_v21 = vadd.f32 %v1796_v26, %v1795_v51 }
 0x124   :  { %v1718_v62 = vpop.f32.mrb[22].mxu0 }
 0x125   :  { %v3875_v63 = vadd.f32 %v1797_v21, %v1717_v36  ;;  %v1798_v0 = vpop.f32.mrb[22].mxu1  ;;  %v1719_v1 = vpop.f32.mrb[23].mxu0 }
 0x126   :  { %v1720_v53 = vadd.f32 %v1719_v1, %v1718_v62  ;;  %v1799_v54 = vpop.f32.mrb[23].mxu1 }
 0x127   :  { %v1800_v16 = vadd.f32 %v1799_v54, %v1798_v0 }
 0x128   :  { %v1721_v5 = vpop.f32.mrb[24].mxu0 }
 0x129   :  { %v3877_v6 = vadd.f32 %v1800_v16, %v1720_v53  ;;  %v1801_v9 = vpop.f32.mrb[24].mxu1  ;;  %v1722_v10 = vpop.f32.mrb[25].mxu0 }
 0x12a   :  { %v1723_v57 = vadd.f32 %v1722_v10, %v1721_v5  ;;  %v1802_v27 = vpop.f32.mrb[25].mxu1 }
 0x12b   :  { %v1803_v22 = vadd.f32 %v1802_v27, %v1801_v9 }
 0x12c   :  { %v1724_v13 = vpop.f32.mrb[26].mxu0 }
 0x12d   :  { %v3879_v58 = vadd.f32 %v1803_v22, %v1723_v57  ;;  %v1804_v44 = vpop.f32.mrb[26].mxu1  ;;  %v1725_v41 = vpop.f32.mrb[27].mxu0 }
 0x12e   :  { %v1726_v14 = vadd.f32 %v1725_v41, %v1724_v13  ;;  %v1805_v32 = vpop.f32.mrb[27].mxu1 }
 0x12f   :  { %v1806_v17 = vadd.f32 %v1805_v32, %v1804_v44 }
 0x130   :  { %v1727_v18 = vpop.f32.mrb[28].mxu0 }
 0x131   :  { %v3881_v25 = vadd.f32 %v1806_v17, %v1726_v14  ;;  %v1807_v40 = vpop.f32.mrb[28].mxu1  ;;  %v1728_v24 = vpop.f32.mrb[29].mxu0 }
 0x132   :  { %v1729_v55 = vadd.f32 %v1728_v24, %v1727_v18  ;;  %v1808_v20 = vpop.f32.mrb[29].mxu1 }
 0x133   :  { %v1809_v60 = vadd.f32 %v1808_v20, %v1807_v40 }
 0x134   :  { %v1730_v34 = vpop.f32.mrb[30].mxu0 }
 0x135   :  { %v3883_v7 = vadd.f32 %v1809_v60, %v1729_v55  ;;  %v1810_v3 = vpop.f32.mrb[30].mxu1  ;;  %v1731_v35 = vpop.f32.mrb[31].mxu0 }
 0x136   :  { %v1732_v12 = vadd.f32 %v1731_v35, %v1730_v34  ;;  %v1811_v15 = vpop.f32.mrb[31].mxu1 }
 0x137   :  { %v1812_v42 = vadd.f32 %v1811_v15, %v1810_v3 }
 0x138   :  { %v1845_v50 = vpop.f32.mrb[32].mxu0 }
 0x139   :  { %v3885_v23 = vadd.f32 %v1812_v42, %v1732_v12  ;;  %v1846_v28 = vpop.f32.mrb[33].mxu0  ;;  %v1925_v30 = vpop.f32.mrb[32].mxu1 }
 0x13a   :  { %v1847_v8 = vadd.f32 %v1846_v28, %v1845_v50  ;;  %v1926_v11 = vpop.f32.mrb[33].mxu1 }
 0x13b   :  { %v1927_v45 = vadd.f32 %v1926_v11, %v1925_v30 }
 0x13c   :  { %v1194_v33 = vadd.f32 %v1847_v8, %v3855_v49  ;;  %v1848_v43 = vpop.f32.mrb[34].mxu0 }
 0x13d   :  { %v1849_v46 = vpop.f32.mrb[35].mxu0  ;;  %v1928_v47 = vpop.f32.mrb[34].mxu1 }
 0x13e   :  { %v1850_v48 = vadd.f32 %v1849_v46, %v1848_v43  ;;  %v1929_v31 = vpop.f32.mrb[35].mxu1  ;;  %v3888_v51 = vadd.f32 %v1927_v45, %v1194_v33 }
 0x13f   :  { %v1930_v52 = vadd.f32 %v1929_v31, %v1928_v47 }
 0x140   :  { %v1199_v36 = vadd.f32 %v1850_v48, %v3857_v59  ;;  %v1851_v26 = vpop.f32.mrb[36].mxu0 }
 0x141   :  { %v1852_v21 = vpop.f32.mrb[37].mxu0  ;;  %v1931_v62 = vpop.f32.mrb[36].mxu1 }
 0x142   :  { %v1853_v0 = vadd.f32 %v1852_v21, %v1851_v26  ;;  %v1932_v1 = vpop.f32.mrb[37].mxu1  ;;  %v3891_v53 = vadd.f32 %v1930_v52, %v1199_v36 }
 0x143   :  { %v1933_v54 = vadd.f32 %v1932_v1, %v1931_v62 }
 0x144   :  { %v1204_v49 = vadd.f32 %v1853_v0, %v3859_v4  ;;  %v1854_v16 = vpop.f32.mrb[38].mxu0 }
 0x145   :  { %v1855_v5 = vpop.f32.mrb[39].mxu0  ;;  %v1934_v9 = vpop.f32.mrb[38].mxu1 }
 0x146   :  { %v1856_v10 = vadd.f32 %v1855_v5, %v1854_v16  ;;  %v1935_v57 = vpop.f32.mrb[39].mxu1  ;;  %v3894_v27 = vadd.f32 %v1933_v54, %v1204_v49 }
 0x147   :  { %v1936_v22 = vadd.f32 %v1935_v57, %v1934_v9 }
 0x148   :  { %v1209_v59 = vadd.f32 %v1856_v10, %v3861_v37  ;;  %v1857_v13 = vpop.f32.mrb[40].mxu0 }
 0x149   :  { %v1858_v44 = vpop.f32.mrb[41].mxu0  ;;  %v1937_v41 = vpop.f32.mrb[40].mxu1 }
 0x14a   :  { %v1859_v14 = vadd.f32 %v1858_v44, %v1857_v13  ;;  %v1938_v32 = vpop.f32.mrb[41].mxu1  ;;  %v3897_v17 = vadd.f32 %v1936_v22, %v1209_v59 }
 0x14b   :  { %v1939_v18 = vadd.f32 %v1938_v32, %v1937_v41 }
 0x14c   :  { %v1214_v4 = vadd.f32 %v1859_v14, %v3863_v19  ;;  %v1860_v40 = vpop.f32.mrb[42].mxu0 }
 0x14d   :  { %v1861_v24 = vpop.f32.mrb[43].mxu0  ;;  %v1940_v55 = vpop.f32.mrb[42].mxu1 }
 0x14e   :  { %v1862_v20 = vadd.f32 %v1861_v24, %v1860_v40  ;;  %v1941_v60 = vpop.f32.mrb[43].mxu1  ;;  %v3900_v34 = vadd.f32 %v1939_v18, %v1214_v4 }
 0x14f   :  { %v1942_v3 = vadd.f32 %v1941_v60, %v1940_v55 }
 0x150   :  { %v1219_v37 = vadd.f32 %v1862_v20, %v3865_v29  ;;  %v1863_v35 = vpop.f32.mrb[44].mxu0 }
 0x151   :  { %v1864_v12 = vpop.f32.mrb[45].mxu0  ;;  %v1943_v15 = vpop.f32.mrb[44].mxu1 }
 0x152   :  { %v1865_v42 = vadd.f32 %v1864_v12, %v1863_v35  ;;  %v1944_v50 = vpop.f32.mrb[45].mxu1  ;;  %v3903_v28 = vadd.f32 %v1942_v3, %v1219_v37 }
 0x153   :  { %v1945_v30 = vadd.f32 %v1944_v50, %v1943_v15 }
 0x154   :  { %v1224_v19 = vadd.f32 %v1865_v42, %v3867_v56  ;;  %v1866_v8 = vpop.f32.mrb[46].mxu0 }
 0x155   :  { %v1867_v11 = vpop.f32.mrb[47].mxu0  ;;  %v1946_v45 = vpop.f32.mrb[46].mxu1 }
 0x156   :  { %v1868_v33 = vadd.f32 %v1867_v11, %v1866_v8  ;;  %v1947_v43 = vpop.f32.mrb[47].mxu1  ;;  %v3906_v46 = vadd.f32 %v1945_v30, %v1224_v19 }
 0x157   :  { %v1948_v47 = vadd.f32 %v1947_v43, %v1946_v45 }
 0x158   :  { %v1229_v29 = vadd.f32 %v1868_v33, %v3869_v2  ;;  %v1869_v48 = vpop.f32.mrb[48].mxu0 }
 0x159   :  { %v1870_v31 = vpop.f32.mrb[49].mxu0  ;;  %v1949_v52 = vpop.f32.mrb[48].mxu1 }
 0x15a   :  { %v1871_v36 = vadd.f32 %v1870_v31, %v1869_v48  ;;  %v1950_v26 = vpop.f32.mrb[49].mxu1  ;;  %v3909_v21 = vadd.f32 %v1948_v47, %v1229_v29 }
 0x15b   :  { %v1951_v62 = vadd.f32 %v1950_v26, %v1949_v52 }
 0x15c   :  { %v1234_v56 = vadd.f32 %v1871_v36, %v3871_v39  ;;  %v1872_v0 = vpop.f32.mrb[50].mxu0 }
 0x15d   :  { %v1873_v1 = vpop.f32.mrb[51].mxu0  ;;  %v1952_v54 = vpop.f32.mrb[50].mxu1 }
 0x15e   :  { %v1874_v49 = vadd.f32 %v1873_v1, %v1872_v0  ;;  %v1953_v16 = vpop.f32.mrb[51].mxu1  ;;  %v1379_v5 = vadd.f32 %v1951_v62, %v1234_v56 }
 0x15f   :  { %v1954_v9 = vadd.f32 %v1953_v16, %v1952_v54 }
 0x160   :  { %v1239_v10 = vadd.f32 %v1874_v49, %v3873_v38  ;;  %v1875_v2 = vpop.f32.mrb[52].mxu0 }
 0x161   :  { %v1876_v57 = vpop.f32.mrb[53].mxu0  ;;  %v1955_v22 = vpop.f32.mrb[52].mxu1 }
 0x162   :  { %v1877_v59 = vadd.f32 %v1876_v57, %v1875_v2  ;;  %v1956_v13 = vpop.f32.mrb[53].mxu1  ;;  %v1384_v44 = vadd.f32 %v1954_v9, %v1239_v10 }
 0x163   :  { %v1957_v41 = vadd.f32 %v1956_v13, %v1955_v22 }
 0x164   :  { %v1244_v14 = vadd.f32 %v1877_v59, %v3875_v63  ;;  %v1878_v32 = vpop.f32.mrb[54].mxu0 }
 0x165   :  { %v1879_v39 = vpop.f32.mrb[55].mxu0  ;;  %v1958_v18 = vpop.f32.mrb[54].mxu1 }
 0x166   :  { %v1880_v4 = vadd.f32 %v1879_v39, %v1878_v32  ;;  %v1959_v40 = vpop.f32.mrb[55].mxu1  ;;  %v1389_v24 = vadd.f32 %v1957_v41, %v1244_v14 }
 0x167   :  { %v1960_v55 = vadd.f32 %v1959_v40, %v1958_v18 }
 0x168   :  { %v1249_v20 = vadd.f32 %v1880_v4, %v3877_v6  ;;  %v1881_v60 = vpop.f32.mrb[56].mxu0 }
 0x169   :  { %v1882_v38 = vpop.f32.mrb[57].mxu0  ;;  %v1961_v3 = vpop.f32.mrb[56].mxu1 }
 0x16a   :  { %v1883_v37 = vadd.f32 %v1882_v38, %v1881_v60  ;;  %v1962_v35 = vpop.f32.mrb[57].mxu1  ;;  %v1394_v12 = vadd.f32 %v1960_v55, %v1249_v20 }
 0x16b   :  { %v1963_v15 = vadd.f32 %v1962_v35, %v1961_v3 }
 0x16c   :  { %v1254_v42 = vadd.f32 %v1883_v37, %v3879_v58  ;;  %v1884_v50 = vpop.f32.mrb[58].mxu0 }
 0x16d   :  { %v1885_v63 = vpop.f32.mrb[59].mxu0  ;;  %v1964_v30 = vpop.f32.mrb[58].mxu1 }
 0x16e   :  { %v1886_v19 = vadd.f32 %v1885_v63, %v1884_v50  ;;  %v1965_v8 = vpop.f32.mrb[59].mxu1  ;;  %v1399_v11 = vadd.f32 %v1963_v15, %v1254_v42 }
 0x16f   :  { %v1966_v45 = vadd.f32 %v1965_v8, %v1964_v30 }
 0x170   :  { %v1259_v33 = vadd.f32 %v1886_v19, %v3881_v25  ;;  %v1887_v43 = vpop.f32.mrb[60].mxu0 }
 0x171   :  { %v1888_v6 = vpop.f32.mrb[61].mxu0  ;;  %v1967_v47 = vpop.f32.mrb[60].mxu1 }
 0x172   :  { %v1889_v29 = vadd.f32 %v1888_v6, %v1887_v43  ;;  %v1968_v48 = vpop.f32.mrb[61].mxu1  ;;  %v1404_v31 = vadd.f32 %v1966_v45, %v1259_v33 }
 0x173   :  { %v1969_v52 = vadd.f32 %v1968_v48, %v1967_v47 }
 0x174   :  { %v1264_v36 = vadd.f32 %v1889_v29, %v3883_v7  ;;  %v1890_v26 = vpop.f32.mrb[62].mxu0 }
 0x175   :  { %v1891_v58 = vpop.f32.mrb[63].mxu0  ;;  %v1970_v62 = vpop.f32.mrb[62].mxu1 }
 0x176   :  { %v1892_v56 = vadd.f32 %v1891_v58, %v1890_v26  ;;  %v1971_v0 = vpop.f32.mrb[63].mxu1  ;;  %v3918_v1 = vadd.f32 %v1969_v52, %v1264_v36 }
 0x177   :  { %v1972_v54 = vadd.f32 %v1971_v0, %v1970_v62 }
 0x178   :  { %v1269_v49 = vadd.f32 %v1892_v56, %v3885_v23  ;;  %v2039_v25 = vpop.f32.mrb[64].mxu0 }
 0x179   :  { %v1489_v16 = vadd.f32 %v2039_v25, %v3891_v53  ;;  %v2051_v9 = vpop.f32.mrb[64].mxu1  ;;  %v1483_v10 = vpop.f32.mrb[65].mxu0 }
 0x17a   :  { %v3922_v2 = vadd.f32 %v2051_v9, %v1384_v44  ;;  %v1484_v57 = vadd.f32 %v1483_v10, %v3888_v51  ;;  %v1523_v7 = vpop.f32.mrb[65].mxu1  ;;  %v1414_v22 = vadd.f32 %v1972_v54, %v1269_v49 }
 0x17b   :  { %1563 = vst [vmem:[%s3993_s4 + $0x8] sm:$0xff] %v1489_v16  ;;  %v1600_v59 = vmul.f32 %v1489_v16, %v1489_v16  ;;  %v1524_v13 = vadd.f32 %v1523_v7, %v1379_v5 }
 0x17c   :  { %1571 = vst [vmem:[%s3993_s4 + $0x48] sm:$0xff] %v3922_v2  ;;  %1562 = vst [vmem:[%s3993_s4] sm:$0xff] %v1484_v57  ;;  %v1578_v23 = vadd.f32 %v1489_v16, %v1484_v57  ;;  %v1599_v53 = vmul.f32 %v1484_v57, %v1484_v57  ;;  %v2042_v51 = vpop.f32.mrb[66].mxu0  ;;  %v1608_v62 = vmul.f32 %v3922_v2, %v3922_v2 }
 0x17d   :  { %1570 = vst [vmem:[%s3993_s4 + $0x40] sm:$0xff] %v1524_v13  ;;  %v1499_v44 = vadd.f32 %v2042_v51, %v3897_v17  ;;  %v2054_v41 = vpop.f32.mrb[66].mxu1  ;;  %v1493_v5 = vpop.f32.mrb[67].mxu0  ;;  %v1607_v36 = vmul.f32 %v1524_v13, %v1524_v13 }
 0x17e   :  { %v1615_v14 = vadd.f32 %v1600_v59, %v1599_v53  ;;  %v1539_v32 = vadd.f32 %v2054_v41, %v1394_v12  ;;  %v1494_v39 = vadd.f32 %v1493_v5, %v3894_v27  ;;  %v1533_v18 = vpop.f32.mrb[67].mxu1 }
 0x17f   :  { %1565 = vst [vmem:[%s3993_s4 + $0x18] sm:$0xff] %v1499_v44  ;;  %v1534_v4 = vadd.f32 %v1533_v18, %v1389_v24  ;;  %v1602_v20 = vmul.f32 %v1499_v44, %v1499_v44 }
 0x180   :  { %1573 = vst [vmem:[%s3993_s4 + $0x58] sm:$0xff] %v1539_v32  ;;  %1564 = vst [vmem:[%s3993_s4 + $0x10] sm:$0xff] %v1494_v39  ;;  %v1579_v17 = vadd.f32 %v1578_v23, %v1494_v39  ;;  %v1601_v40 = vmul.f32 %v1494_v39, %v1494_v39  ;;  %v2045_v55 = vpop.f32.mrb[68].mxu0  ;;  %v1610_v25 = vmul.f32 %v1539_v32, %v1539_v32 }
 0x181   :  { %1572 = vst [vmem:[%s3993_s4 + $0x50] sm:$0xff] %v1534_v4  ;;  %v1509_v27 = vadd.f32 %v2045_v55, %v3903_v28  ;;  %v2057_v60 = vpop.f32.mrb[68].mxu1  ;;  %v1503_v24 = vpop.f32.mrb[69].mxu0 }
 0x182   :  { %v1616_v38 = vadd.f32 %v1615_v14, %v1601_v40  ;;  %v1549_v3 = vadd.f32 %v2057_v60, %v1404_v31  ;;  %v1504_v37 = vadd.f32 %v1503_v24, %v3900_v34  ;;  %v1580_v35 = vadd.f32 %v1579_v17, %v1499_v44  ;;  %v1543_v12 = vpop.f32.mrb[69].mxu1 }
 0x183   :  { %1567 = vst [vmem:[%s3993_s4 + $0x28] sm:$0xff] %v1509_v27  ;;  %v1544_v15 = vadd.f32 %v1543_v12, %v1399_v11  ;;  %v1604_v34 = vmul.f32 %v1509_v27, %v1509_v27 }
 0x184   :  { %1575 = vst [vmem:[%s3993_s4 + $0x68] sm:$0xff] %v1549_v3  ;;  %1566 = vst [vmem:[%s3993_s4 + $0x20] sm:$0xff] %v1504_v37  ;;  %v1581_v28 = vadd.f32 %v1580_v35, %v1504_v37  ;;  %v1603_v42 = vmul.f32 %v1504_v37, %v1504_v37  ;;  %v1617_v50 = vadd.f32 %v1616_v38, %v1602_v20  ;;  %v2048_v63 = vpop.f32.mrb[70].mxu0 }
 0x185   :  { %1574 = vst [vmem:[%s3993_s4 + $0x60] sm:$0xff] %v1544_v15  ;;  %v1519_v30 = vadd.f32 %v2048_v63, %v3909_v21  ;;  %v2060_v19 = vpop.f32.mrb[70].mxu1  ;;  %v1513_v8 = vpop.f32.mrb[71].mxu0  ;;  %v1611_v10 = vmul.f32 %v1544_v15, %v1544_v15 }
 0x186   :  { %v1618_v11 = vadd.f32 %v1617_v50, %v1603_v42  ;;  %v1559_v45 = vadd.f32 %v2060_v19, %v1414_v22  ;;  %v1514_v33 = vadd.f32 %v1513_v8, %v3906_v46  ;;  %v1582_v43 = vadd.f32 %v1581_v28, %v1509_v27  ;;  %v1553_v6 = vpop.f32.mrb[71].mxu1 }
 0x187   :  { %1569 = vst [vmem:[%s3993_s4 + $0x38] sm:$0xff] %v1519_v30  ;;  %v1554_v47 = vadd.f32 %v1553_v6, %v3918_v1  ;;  %v1606_v46 = vmul.f32 %v1519_v30, %v1519_v30  ;;  %v1609_v1 = vmul.f32 %v1534_v4, %v1534_v4  ;;  %v1612_v22 = vmul.f32 %v1549_v3, %v1549_v3 }
 0x188   :  { %1577 = vst [vmem:[%s3993_s4 + $0x78] sm:$0xff] %v1559_v45  ;;  %1568 = vst [vmem:[%s3993_s4 + $0x30] sm:$0xff] %v1514_v33  ;;  %v1583_v21 = vadd.f32 %v1582_v43, %v1514_v33  ;;  %v1605_v29 = vmul.f32 %v1514_v33, %v1514_v33  ;;  %v1619_v48 = vadd.f32 %v1618_v11, %v1604_v34 }
 0x189   :  { %1576 = vst [vmem:[%s3993_s4 + $0x70] sm:$0xff] %v1554_v47  ;;  %v1613_v53 = vmul.f32 %v1554_v47, %v1554_v47  ;;  %v1614_v44 = vmul.f32 %v1559_v45, %v1559_v45 }
 0x18a   :  { %v1584_v31 = vadd.f32 %v1583_v21, %v1519_v30  ;;  %v1620_v52 = vadd.f32 %v1619_v48, %v1605_v29 }
 0x18c   :  { %v1585_v26 = vadd.f32 %v1584_v31, %v1524_v13  ;;  %v1621_v58 = vadd.f32 %v1620_v52, %v1606_v46 }
 0x18e   :  { %v1586_v56 = vadd.f32 %v1585_v26, %v3922_v2  ;;  %v1622_v0 = vadd.f32 %v1621_v58, %v1607_v36 }
 0x190   :  { %v1623_v54 = vadd.f32 %v1622_v0, %v1608_v62  ;;  %v1587_v49 = vadd.f32 %v1586_v56, %v1534_v4 }
 0x192   :  { %v1588_v16 = vadd.f32 %v1587_v49, %v1539_v32  ;;  %v1624_v9 = vadd.f32 %v1623_v54, %v1609_v1 }
 0x194   :  { %v1589_v57 = vadd.f32 %v1588_v16, %v1544_v15  ;;  %v1625_v7 = vadd.f32 %v1624_v9, %v1610_v25 }
 0x196   :  { %v1590_v59 = vadd.f32 %v1589_v57, %v1549_v3  ;;  %v1626_v23 = vadd.f32 %v1625_v7, %v1611_v10 }
 0x198   :  { %v1591_v13 = vadd.f32 %v1590_v59, %v1554_v47  ;;  %v1627_v51 = vadd.f32 %v1626_v23, %v1612_v22 }
 0x19a   :  { %v1592_v41 = vadd.f32 %v1591_v13, %v1559_v45  ;;  %v1628_v5 = vadd.f32 %v1627_v51, %v1613_v53 }
 0x19c   :  { %v1593_v2 = vrot.slane %v1592_v41, 4  ;;  %v1629_v14 = vadd.f32 %v1628_v5, %v1614_v44 }
 0x19e   :  { %v1594_v39 = vadd.f32 %v1593_v2, %v1592_v41  ;;  %v1630_v18 = vrot.slane %v1629_v14, 4 }
 0x1a0   :  { %v1595_v4 = vrot.slane %v1594_v39, 2  ;;  %v1631_v17 = vadd.f32 %v1630_v18, %v1629_v14 }
 0x1a2   :  { %v1596_v32 = vadd.f32 %v1595_v4, %v1594_v39  ;;  %v1632_v40 = vrot.slane %v1631_v17, 2 }
 0x1a4   :  { %v1633_v55 = vadd.f32 %v1632_v40, %v1631_v17  ;;  %v1597_v20 = vrot.slane %v1596_v32, 1 }
 0x1a6   :  { %v1634_v27 = vrot.slane %v1633_v55, 1  ;;  %v1598_v24 = vadd.f32 %v1597_v20, %v1596_v32 }
 0x1a8   :  { %v1635_v60 = vadd.f32 %v1634_v27, %v1633_v55 }
 0x1aa   :  { %v1640_v38 = vsel %vm1639_vm0, %v1635_v60, 0.0 }
 0x1ab   :  { %v1641_v3 = vsel %vm1638_vm1, %v1598_v24, %v1640_v38 }
 0x1ac   :  { %1642 = vst [vmem:[%s3994_s5] sm:$0xff] %v1641_v3 }

</bundles_post_ra>
